<compile_context>
chip_gen: v5e
topology: v5e:2x2
jax: 0.10.0
libtpu: 0.0.40
codegen_flags: <defaults>
</compile_context>

<pallas_src>
import math
import functools

import jax
import jax.numpy as jnp
import numpy as np
from jax.experimental import pallas as pl
from jax.experimental.pallas import tpu as pltpu


# ---------------------------------------------------------------------------
# Fused kernel: QKV projection + attention + in-kernel RSA positional mixing
#               + per-head accumulation through Wf row-blocks
# ---------------------------------------------------------------------------
def _rsa_fused_kernel(w_ref, hp_ref, x_ref, wqkv_ref, bqkv_ref, wf_ref, bf_ref,
                      o_ref, *, n_heads, hidden, t, max_L):
    Hh = n_heads * hidden
    M = x_ref.shape[0]                 # block_b * t rows in this grid step
    block_b = M // t
    out_pad = wf_ref.shape[1]          # lane-dense (multiple of 128)

    # Fused Q|K|V projection: one wide MXU matmul (M x D) @ (D x 3Hh), f32 accumulation.
    x = x_ref[...]                                                     # (M, D) bf16
    qkv = jnp.dot(x, wqkv_ref[...],
                  preferred_element_type=jnp.float32) + bqkv_ref[...]  # (M, 3Hh) f32

    # Analytic positional-embedding scaffolding, computed once per block (VPU/EUP work,
    # off the MXU critical path; replaces the resident (H, T, T) f32 P input).
    row = jax.lax.broadcasted_iota(jnp.int32, (t, t), 0)
    col = jax.lax.broadcasted_iota(jnp.int32, (t, t), 1)
    mask = (row > col).astype(jnp.float32)                             # tril(diag=-1)
    L = jnp.minimum(jnp.maximum(row - col, 0), max_L).astype(jnp.float32)

    w = w_ref[0, 0]                                                    # sigmoid(mu)
    one_m_w = 1.0 - w                                                  # hoisted

    acc = jnp.zeros((M, out_pad), jnp.float32)

    # TODO(synk): replace the static unroll with a head grid axis / fori_loop once T
    #             is non-trivial (bounds live ranges and code size).
    for h in range(n_heads):
        q0 = h * hidden
        k0 = Hh + h * hidden
        v0 = 2 * Hh + h * hidden

        # Per-head w * P[h], generated in-kernel:
        #   P[h] = gamma^L * (sel ? sin(theta*L) : cos(theta*L)) * mask
        # (negative lam is encoded as theta = pi with cos: cos(pi*L) == (-1)^L)
        log_g = hp_ref[0, h]
        theta = hp_ref[1, h]
        sel = hp_ref[2, h]
        trig = sel * jnp.sin(theta * L) + (1.0 - sel) * jnp.cos(theta * L)
        wp_h = (w * mask) * jnp.exp(L * log_g) * trig                  # (t, t) f32

        houts = []
        for bi in range(block_b):                                      # attention per batch
            r0 = bi * t
            q = qkv[r0:r0 + t, q0:q0 + hidden]                         # (t, hid) f32
            k = qkv[r0:r0 + t, k0:k0 + hidden]
            v = qkv[r0:r0 + t, v0:v0 + hidden]

            # scores = Q @ K^T : bf16 MXU inputs, f32 accumulation, no transpose op.
            sc = jax.lax.dot_general(
                q.astype(jnp.bfloat16), k.astype(jnp.bfloat16),
                (((1,), (1,)), ((), ())),
                preferred_element_type=jnp.float32)                    # (t, t) f32

            # Numerically-stabilized softmax in f32; reciprocal on the EUP.
            sc = sc - jnp.max(sc, axis=-1, keepdims=True)
            e = jnp.exp(sc)
            att = e * pl.reciprocal(jnp.sum(e, axis=-1, keepdims=True), approx=True)

            # RSA mixing and mix@V stay in f32 (w*P can be huge-magnitude).
            mix = one_m_w * att + wp_h
            houts.append(jnp.dot(mix, v, preferred_element_type=jnp.float32))

        # Per-head accumulation through the matching Wf row-block (block-row
        # decomposition of the final projection); row-concat only (cheap, sublane dim).
        hout_all = jnp.concatenate(houts, axis=0)                      # (M, hid) f32
        acc = acc + jnp.dot(hout_all.astype(jnp.bfloat16),
                            wf_ref[q0:q0 + hidden, :],
                            preferred_element_type=jnp.float32)        # (M, out_pad)

    o_ref[...] = acc + bf_ref[...]                                     # lane-dense store


# ---------------------------------------------------------------------------
# Helpers
# ---------------------------------------------------------------------------
def _vmem_limit_bytes():
    cap = 128 * 1024 * 1024
    try:
        info = pltpu.get_tpu_info()
        cap = int(getattr(info, "vmem_capacity_bytes", cap))
    except Exception:
        pass
    # 64 MiB on v5e/v6e (128 MiB physical); ~48 MiB on v7x (64 MiB physical) so the
    # Pallas double-buffers / internal scratch still fit.
    return min(64 * 1024 * 1024, (cap * 3) // 4)


def _pick_block_b(b, t, target_rows=256, max_unroll=8):
    bb = max(1, min(b, -(-target_rows // t), max_unroll))
    while bb > 1 and (b % bb != 0 or (bb * t) % 8 != 0):
        bb -= 1
    if b % bb != 0 or (bb * t) % 8 != 0:
        bb = b                      # single block over the whole batch
    return bb


# ---------------------------------------------------------------------------
# Positional embedding (plain JAX, used only by the f32 reference)
# ---------------------------------------------------------------------------
def build_positional_embedding(t, max_L, lam, gamma1, theta1, gamma2, theta2):
    i = jnp.arange(t, dtype=jnp.float32)[:, None]
    j = jnp.arange(t, dtype=jnp.float32)[None, :]
    L = jnp.clip(i - j, 0.0, float(max_L))
    mask = (i > j).astype(jnp.float32)
    # lam may be negative; L is integer-valued -> lam**L = sign(lam)**L * |lam|**L.
    sign = jnp.where(lam < 0, 1.0 - 2.0 * jnp.mod(L, 2.0), 1.0)
    P_R = sign * jnp.power(jnp.abs(lam), L) * mask
    P_C1 = jnp.power(gamma1, L) * mask * jnp.sin(theta1 * L)
    P_C2 = jnp.power(gamma2, L) * mask * jnp.cos(theta2 * L)
    return jnp.concatenate([P_R, P_C1, P_C2], axis=0)                 # (H, T, T)


# ---------------------------------------------------------------------------
# Forward pass using the fused Pallas kernel
# ---------------------------------------------------------------------------
def rsa_forward_pallas(x, params, *, r, s, hidden, max_L, block_b=None):
    b, t, d = x.shape
    n_heads = r + 2 * s
    Hh = n_heads * hidden
    out_ch = params["Wf"].shape[1]
    out_pad = ((out_ch + 127) // 128) * 128

    if block_b is None:
        block_b = _pick_block_b(b, t)

    # Per-head analytic P parameters: [log|gamma|, theta, sin-vs-cos selector].
    lam = params["lam"].reshape(-1).astype(jnp.float32)
    g1 = params["gamma_c1"].reshape(-1).astype(jnp.float32)
    g2 = params["gamma_c2"].reshape(-1).astype(jnp.float32)
    th1 = params["theta_c1"].reshape(-1).astype(jnp.float32)
    th2 = params["theta_c2"].reshape(-1).astype(jnp.float32)
    log_gamma = jnp.concatenate([jnp.log(jnp.abs(lam)), jnp.log(g1), jnp.log(g2)])
    theta = jnp.concatenate([jnp.where(lam < 0, math.pi, 0.0), th1, th2])
    sel = jnp.concatenate([jnp.zeros_like(lam), jnp.ones_like(g1), jnp.zeros_like(g2)])
    head_params = jnp.stack([log_gamma, theta, sel], axis=0).astype(jnp.float32)  # (3, H)

    w_scalar = jax.nn.sigmoid(params["mu"]).reshape(1, 1).astype(jnp.float32)

    # Fused QKV weight slab (D, 3*H*hid): [Q heads | K heads | V heads].
    W_qkv = jnp.concatenate([params["Wq"], params["Wk"], params["Wv"]],
                            axis=1).astype(jnp.bfloat16)
    b_qkv = jnp.concatenate([params["bq"], params["bk"], params["bv"]]
                            ).reshape(1, 3 * Hh).astype(jnp.float32)
    # Zero-pad final projection to a 128-multiple column count (lane-dense stores);
    # padded columns are exactly zero and sliced off in the wrapper.
    Wf = jnp.pad(params["Wf"], ((0, 0), (0, out_pad - out_ch))).astype(jnp.bfloat16)
    bf = jnp.pad(params["bf"].reshape(1, out_ch),
                 ((0, 0), (0, out_pad - out_ch))).astype(jnp.float32)

    x_flat = x.reshape(b * t, d).astype(jnp.bfloat16)    # free XLA reshape, batch-major

    kernel = functools.partial(_rsa_fused_kernel, n_heads=n_heads, hidden=hidden,
                               t=t, max_L=max_L)

    out_flat = pl.pallas_call(
        kernel,
        out_shape=jax.ShapeDtypeStruct((b * t, out_pad), jnp.float32),
        grid=(b // block_b,),
        in_specs=[
            pl.BlockSpec(memory_space=pltpu.MemorySpace.SMEM),     # sigmoid(mu)
            pl.BlockSpec(memory_space=pltpu.MemorySpace.SMEM),     # per-head P params
            pl.BlockSpec((block_b * t, d), lambda bi: (bi, 0)),    # x rows (bf16)
            pl.BlockSpec((d, 3 * Hh), lambda bi: (0, 0)),          # fused Wqkv (resident)
            pl.BlockSpec((1, 3 * Hh), lambda bi: (0, 0)),          # fused bias
            pl.BlockSpec((Hh, out_pad), lambda bi: (0, 0)),        # Wf (padded, resident)
            pl.BlockSpec((1, out_pad), lambda bi: (0, 0)),         # bf (padded)
        ],
        out_specs=pl.BlockSpec((block_b * t, out_pad), lambda bi: (bi, 0)),
        compiler_params=pltpu.CompilerParams(
            dimension_semantics=("parallel",),
            vmem_limit_bytes=_vmem_limit_bytes()),
    )(w_scalar, head_params, x_flat, W_qkv, b_qkv, Wf, bf)

    return out_flat.reshape(b, t, out_pad)[:, :, :out_ch]


# ---------------------------------------------------------------------------
# Pure-JAX f32 reference (mirrors the PyTorch forward) for correctness checking
# ---------------------------------------------------------------------------
def rsa_reference(x, params, *, r, s, hidden, max_L):
    b, t, d = x.shape
    n_heads = r + 2 * s
    P = build_positional_embedding(t, max_L, params["lam"],
                                   params["gamma_c1"], params["theta_c1"],
                                   params["gamma_c2"], params["theta_c2"])
    w = jax.nn.sigmoid(params["mu"])[0]
    Q = (x @ params["Wq"] + params["bq"]).reshape(b, t, n_heads, hidden).transpose(0, 2, 1, 3)
    K = (x @ params["Wk"] + params["bk"]).reshape(b, t, n_heads, hidden).transpose(0, 2, 1, 3)
    V = (x @ params["Wv"] + params["bv"]).reshape(b, t, n_heads, hidden).transpose(0, 2, 1, 3)
    att = jax.nn.softmax(jnp.einsum("bhtd,bhsd->bhts", Q, K), axis=-1)
    mix = (1.0 - w) * att + w * P[None]
    out = jnp.einsum("bhts,bhsd->bhtd", mix, V)
    out = out.transpose(0, 2, 1, 3).reshape(b, t, -1)
    return out @ params["Wf"] + params["bf"]


# ---------------------------------------------------------------------------
# Deterministic parameter construction (same shapes/semantics as the nn.Module)
# ---------------------------------------------------------------------------
def make_params(key, in_channels, out_channels, r, s, hidden):
    n_heads = r + 2 * s
    ks = jax.random.split(key, 10)

    mu = jax.random.uniform(ks[0], (1,), dtype=jnp.float32) * 6.0 - 3.0
    flag_raw = jax.random.randint(ks[1], (r,), -1, 1)           # values in {-1, 0}
    flag = jnp.where(flag_raw < 0, flag_raw, 1).astype(jnp.float32)
    lam = ((jax.random.uniform(ks[2], (r,), dtype=jnp.float32) + 1.0) * flag)[:, None, None]
    gamma_c1 = jnp.tanh(jax.random.uniform(ks[3], (s,), dtype=jnp.float32) + 1.0)[:, None, None]
    gamma_c2 = jnp.tanh(jax.random.uniform(ks[4], (s,), dtype=jnp.float32) + 1.0)[:, None, None]
    theta_c1 = jnp.full((s, 1, 1), math.pi / 4, dtype=jnp.float32)
    theta_c2 = jnp.full((s, 1, 1), math.pi / 4, dtype=jnp.float32)

    def linear(k, fan_in, fan_out):
        k1, k2 = jax.random.split(k)
        bound = 1.0 / math.sqrt(fan_in)
        W = jax.random.uniform(k1, (fan_in, fan_out), minval=-bound, maxval=bound,
                               dtype=jnp.float32)
        b_ = jax.random.uniform(k2, (fan_out,), minval=-bound, maxval=bound,
                                dtype=jnp.float32)
        return W, b_

    Wq, bq = linear(ks[5], in_channels, hidden * n_heads)
    Wk, bk = linear(ks[6], in_channels, hidden * n_heads)
    Wv, bv = linear(ks[7], in_channels, hidden * n_heads)
    Wf, bf = linear(ks[8], hidden * n_heads, out_channels)

    return dict(mu=mu, lam=lam, gamma_c1=gamma_c1, gamma_c2=gamma_c2,
                theta_c1=theta_c1, theta_c2=theta_c2,
                Wq=Wq, bq=bq, Wk=Wk, bk=bk, Wv=Wv, bv=bv, Wf=Wf, bf=bf)


if __name__ == "__main__":
    B, T = 2, 8
    IN_CH, OUT_CH = 16, 16
    R, S, HIDDEN, MAX_L = 2, 2, 32, 100

    key = jax.random.PRNGKey(0)
    kp, kx = jax.random.split(key)
    params = make_params(kp, IN_CH, OUT_CH, R, S, HIDDEN)
    x = jax.random.normal(kx, (B, T, IN_CH), dtype=jnp.float32)

    out = rsa_forward_pallas(x, params, r=R, s=S, hidden=HIDDEN, max_L=MAX_L)
    out = jax.block_until_ready(out)

    ref = rsa_reference(x, params, r=R, s=S, hidden=HIDDEN, max_L=MAX_L)
    # bf16 MXU inputs (f32 accumulation, f32 softmax/mix) vs the pure-f32 reference.
    np.testing.assert_allclose(np.asarray(out), np.asarray(ref), rtol=2e-2, atol=5e-2)

    print("KERNEL_OK")
</pallas_src>

<mosaic_0001>
module attributes {stable_mosaic.version = 11 : i64} {
  func.func @_rsa_fused_kernel(%arg0: i32, %arg1: memref<1x1xf32, #tpu.memory_space<smem>>, %arg2: memref<3x6xf32, #tpu.memory_space<smem>>, %arg3: memref<16x16xbf16, #tpu.memory_space<vmem>>, %arg4: memref<16x576xbf16, #tpu.memory_space<vmem>>, %arg5: memref<1x576xf32, #tpu.memory_space<vmem>>, %arg6: memref<192x128xbf16, #tpu.memory_space<vmem>>, %arg7: memref<1x128xf32, #tpu.memory_space<vmem>>, %arg8: memref<16x128xf32, #tpu.memory_space<vmem>>) attributes {dimension_semantics = [#tpu.dimension_semantics<parallel>], iteration_bounds = array<i64: 1>, scalar_prefetch = 0 : i64, scratch_operands = 0 : i64, tpu.core_type = #tpu.core_type<tc>, window_params = [{transform_indices = @transform_0, window_bounds = array<i64: 1, 1>}, {transform_indices = @transform_1, window_bounds = array<i64: 3, 6>}, {transform_indices = @transform_2, window_bounds = array<i64: 16, 16>}, {pipeline_mode = #tpu.pipeline_mode<synchronous>, transform_indices = @transform_3, window_bounds = array<i64: 16, 576>}, {pipeline_mode = #tpu.pipeline_mode<synchronous>, transform_indices = @transform_4, window_bounds = array<i64: 1, 576>}, {pipeline_mode = #tpu.pipeline_mode<synchronous>, transform_indices = @transform_5, window_bounds = array<i64: 192, 128>}, {pipeline_mode = #tpu.pipeline_mode<synchronous>, transform_indices = @transform_6, window_bounds = array<i64: 1, 128>}, {transform_indices = @transform_7, window_bounds = array<i64: 16, 128>}]} {
    %c0 = arith.constant 0 : index
    %c0_0 = arith.constant 0 : index
    %0 = vector.load %arg3[%c0, %c0_0] : memref<16x16xbf16, #tpu.memory_space<vmem>>, vector<16x16xbf16>
    %c0_1 = arith.constant 0 : index
    %c0_2 = arith.constant 0 : index
    %1 = vector.load %arg4[%c0_1, %c0_2] : memref<16x576xbf16, #tpu.memory_space<vmem>>, vector<16x576xbf16>
    %cst = arith.constant dense<0.000000e+00> : vector<16x576xf32>
    %2 = tpu.matmul %0, %1, %cst {dimension_numbers = #tpu.dot_dimension_numbers<[1], [0], [0], [1], [0, 0, 1, 1], [], []>} : vector<16x16xbf16>, vector<16x576xbf16>, vector<16x576xf32> -> vector<16x576xf32>
    %c0_3 = arith.constant 0 : index
    %c0_4 = arith.constant 0 : index
    %3 = vector.load %arg5[%c0_3, %c0_4] : memref<1x576xf32, #tpu.memory_space<vmem>>, vector<1x576xf32>
    %4 = vector.broadcast %3 : vector<1x576xf32> to vector<16x576xf32>
    %5 = arith.addf %2, %4 : vector<16x576xf32>
    %6 = tpu.iota {dimensions = array<i32: 0>} : vector<8x8xi32>
    %7 = tpu.iota {dimensions = array<i32: 1>} : vector<8x8xi32>
    %8 = arith.cmpi sgt, %6, %7 : vector<8x8xi32>
    %9 = arith.extui %8 : vector<8x8xi1> to vector<8x8xi32>
    %10 = arith.sitofp %9 : vector<8x8xi32> to vector<8x8xf32>
    %11 = arith.subi %6, %7 : vector<8x8xi32>
    %c0_i32 = arith.constant 0 : i32
    %12 = vector.broadcast %c0_i32 : i32 to vector<8x8xi32>
    %13 = arith.maxsi %11, %12 : vector<8x8xi32>
    %c100_i32 = arith.constant 100 : i32
    %14 = vector.broadcast %c100_i32 : i32 to vector<8x8xi32>
    %15 = arith.minsi %13, %14 : vector<8x8xi32>
    %16 = arith.sitofp %15 : vector<8x8xi32> to vector<8x8xf32>
    %c0_5 = arith.constant 0 : index
    %c0_6 = arith.constant 0 : index
    %17 = memref.load %arg1[%c0_5, %c0_6] : memref<1x1xf32, #tpu.memory_space<smem>>
    %cst_7 = arith.constant 1.000000e+00 : f32
    %18 = arith.subf %cst_7, %17 : f32
    %cst_8 = arith.constant 0.000000e+00 : f32
    %19 = vector.broadcast %cst_8 : f32 to vector<16x128xf32>
    %c0_9 = arith.constant 0 : index
    %c0_10 = arith.constant 0 : index
    %20 = memref.load %arg2[%c0_9, %c0_10] : memref<3x6xf32, #tpu.memory_space<smem>>
    %c1 = arith.constant 1 : index
    %c0_11 = arith.constant 0 : index
    %21 = memref.load %arg2[%c1, %c0_11] : memref<3x6xf32, #tpu.memory_space<smem>>
    %c2 = arith.constant 2 : index
    %c0_12 = arith.constant 0 : index
    %22 = memref.load %arg2[%c2, %c0_12] : memref<3x6xf32, #tpu.memory_space<smem>>
    %23 = vector.broadcast %21 : f32 to vector<8x8xf32>
    %24 = arith.mulf %23, %16 : vector<8x8xf32>
    %25 = math.sin %24 : vector<8x8xf32>
    %26 = vector.broadcast %22 : f32 to vector<8x8xf32>
    %27 = arith.mulf %26, %25 : vector<8x8xf32>
    %cst_13 = arith.constant 1.000000e+00 : f32
    %28 = arith.subf %cst_13, %22 : f32
    %29 = vector.broadcast %21 : f32 to vector<8x8xf32>
    %30 = arith.mulf %29, %16 : vector<8x8xf32>
    %31 = math.cos %30 : vector<8x8xf32>
    %32 = vector.broadcast %28 : f32 to vector<8x8xf32>
    %33 = arith.mulf %32, %31 : vector<8x8xf32>
    %34 = arith.addf %27, %33 : vector<8x8xf32>
    %35 = vector.broadcast %17 : f32 to vector<8x8xf32>
    %36 = arith.mulf %35, %10 : vector<8x8xf32>
    %37 = vector.broadcast %20 : f32 to vector<8x8xf32>
    %38 = arith.mulf %16, %37 : vector<8x8xf32>
    %39 = math.exp %38 : vector<8x8xf32>
    %40 = arith.mulf %36, %39 : vector<8x8xf32>
    %41 = arith.mulf %40, %34 : vector<8x8xf32>
    %42 = vector.extract_strided_slice %5 {offsets = [0, 0], sizes = [8, 32], strides = [1, 1]} : vector<16x576xf32> to vector<8x32xf32>
    %43 = vector.extract_strided_slice %5 {offsets = [0, 192], sizes = [8, 32], strides = [1, 1]} : vector<16x576xf32> to vector<8x32xf32>
    %44 = vector.extract_strided_slice %5 {offsets = [0, 384], sizes = [8, 32], strides = [1, 1]} : vector<16x576xf32> to vector<8x32xf32>
    %45 = arith.truncf %42 : vector<8x32xf32> to vector<8x32xbf16>
    %46 = arith.truncf %43 : vector<8x32xf32> to vector<8x32xbf16>
    %cst_14 = arith.constant dense<0.000000e+00> : vector<8x8xf32>
    %47 = tpu.matmul %45, %46, %cst_14 {dimension_numbers = #tpu.dot_dimension_numbers<[1], [1], [0], [0], [0, 0, 1, 0], [], []>} : vector<8x32xbf16>, vector<8x32xbf16>, vector<8x8xf32> -> vector<8x8xf32>
    %cst_15 = arith.constant dense<0xFF800000> : vector<8xf32>
    %48 = vector.multi_reduction <maximumf>, %47, %cst_15 [1] : vector<8x8xf32> to vector<8xf32>
    %49 = vector.shape_cast %48 : vector<8xf32> to vector<8x1xf32>
    %50 = vector.broadcast %49 : vector<8x1xf32> to vector<8x8xf32>
    %51 = arith.subf %47, %50 : vector<8x8xf32>
    %52 = math.exp %51 : vector<8x8xf32>
    %cst_16 = arith.constant dense<0.000000e+00> : vector<8xf32>
    %53 = vector.multi_reduction <add>, %52, %cst_16 [1] : vector<8x8xf32> to vector<8xf32>
    %54 = vector.shape_cast %53 : vector<8xf32> to vector<8x1xf32>
    %55 = tpu.reciprocal %54 {approx = true} : vector<8x1xf32> -> vector<8x1xf32>
    %56 = vector.broadcast %55 : vector<8x1xf32> to vector<8x8xf32>
    %57 = arith.mulf %52, %56 : vector<8x8xf32>
    %58 = vector.broadcast %18 : f32 to vector<8x8xf32>
    %59 = arith.mulf %58, %57 : vector<8x8xf32>
    %60 = arith.addf %59, %41 : vector<8x8xf32>
    %cst_17 = arith.constant dense<0.000000e+00> : vector<8x32xf32>
    %61 = tpu.matmul %60, %44, %cst_17 {dimension_numbers = #tpu.dot_dimension_numbers<[1], [0], [0], [1], [0, 0, 1, 1], [], []>} : vector<8x8xf32>, vector<8x32xf32>, vector<8x32xf32> -> vector<8x32xf32>
    %62 = vector.extract_strided_slice %5 {offsets = [8, 0], sizes = [8, 32], strides = [1, 1]} : vector<16x576xf32> to vector<8x32xf32>
    %63 = vector.extract_strided_slice %5 {offsets = [8, 192], sizes = [8, 32], strides = [1, 1]} : vector<16x576xf32> to vector<8x32xf32>
    %64 = vector.extract_strided_slice %5 {offsets = [8, 384], sizes = [8, 32], strides = [1, 1]} : vector<16x576xf32> to vector<8x32xf32>
    %65 = arith.truncf %62 : vector<8x32xf32> to vector<8x32xbf16>
    %66 = arith.truncf %63 : vector<8x32xf32> to vector<8x32xbf16>
    %cst_18 = arith.constant dense<0.000000e+00> : vector<8x8xf32>
    %67 = tpu.matmul %65, %66, %cst_18 {dimension_numbers = #tpu.dot_dimension_numbers<[1], [1], [0], [0], [0, 0, 1, 0], [], []>} : vector<8x32xbf16>, vector<8x32xbf16>, vector<8x8xf32> -> vector<8x8xf32>
    %cst_19 = arith.constant dense<0xFF800000> : vector<8xf32>
    %68 = vector.multi_reduction <maximumf>, %67, %cst_19 [1] : vector<8x8xf32> to vector<8xf32>
    %69 = vector.shape_cast %68 : vector<8xf32> to vector<8x1xf32>
    %70 = vector.broadcast %69 : vector<8x1xf32> to vector<8x8xf32>
    %71 = arith.subf %67, %70 : vector<8x8xf32>
    %72 = math.exp %71 : vector<8x8xf32>
    %cst_20 = arith.constant dense<0.000000e+00> : vector<8xf32>
    %73 = vector.multi_reduction <add>, %72, %cst_20 [1] : vector<8x8xf32> to vector<8xf32>
    %74 = vector.shape_cast %73 : vector<8xf32> to vector<8x1xf32>
    %75 = tpu.reciprocal %74 {approx = true} : vector<8x1xf32> -> vector<8x1xf32>
    %76 = vector.broadcast %75 : vector<8x1xf32> to vector<8x8xf32>
    %77 = arith.mulf %72, %76 : vector<8x8xf32>
    %78 = vector.broadcast %18 : f32 to vector<8x8xf32>
    %79 = arith.mulf %78, %77 : vector<8x8xf32>
    %80 = arith.addf %79, %41 : vector<8x8xf32>
    %cst_21 = arith.constant dense<0.000000e+00> : vector<8x32xf32>
    %81 = tpu.matmul %80, %64, %cst_21 {dimension_numbers = #tpu.dot_dimension_numbers<[1], [0], [0], [1], [0, 0, 1, 1], [], []>} : vector<8x8xf32>, vector<8x32xf32>, vector<8x32xf32> -> vector<8x32xf32>
    %82 = tpu.concatenate %61, %81 in 0 : vector<8x32xf32>, vector<8x32xf32> -> vector<16x32xf32>
    %83 = arith.truncf %82 : vector<16x32xf32> to vector<16x32xbf16>
    %c0_22 = arith.constant 0 : index
    %c0_23 = arith.constant 0 : index
    %84 = vector.load %arg6[%c0_22, %c0_23] : memref<192x128xbf16, #tpu.memory_space<vmem>>, vector<32x128xbf16>
    %cst_24 = arith.constant dense<0.000000e+00> : vector<16x128xf32>
    %85 = tpu.matmul %83, %84, %cst_24 {dimension_numbers = #tpu.dot_dimension_numbers<[1], [0], [0], [1], [0, 0, 1, 1], [], []>} : vector<16x32xbf16>, vector<32x128xbf16>, vector<16x128xf32> -> vector<16x128xf32>
    %86 = arith.addf %19, %85 : vector<16x128xf32>
    %c0_25 = arith.constant 0 : index
    %c1_26 = arith.constant 1 : index
    %87 = memref.load %arg2[%c0_25, %c1_26] : memref<3x6xf32, #tpu.memory_space<smem>>
    %c1_27 = arith.constant 1 : index
    %c1_28 = arith.constant 1 : index
    %88 = memref.load %arg2[%c1_27, %c1_28] : memref<3x6xf32, #tpu.memory_space<smem>>
    %c2_29 = arith.constant 2 : index
    %c1_30 = arith.constant 1 : index
    %89 = memref.load %arg2[%c2_29, %c1_30] : memref<3x6xf32, #tpu.memory_space<smem>>
    %90 = vector.broadcast %88 : f32 to vector<8x8xf32>
    %91 = arith.mulf %90, %16 : vector<8x8xf32>
    %92 = math.sin %91 : vector<8x8xf32>
    %93 = vector.broadcast %89 : f32 to vector<8x8xf32>
    %94 = arith.mulf %93, %92 : vector<8x8xf32>
    %cst_31 = arith.constant 1.000000e+00 : f32
    %95 = arith.subf %cst_31, %89 : f32
    %96 = vector.broadcast %88 : f32 to vector<8x8xf32>
    %97 = arith.mulf %96, %16 : vector<8x8xf32>
    %98 = math.cos %97 : vector<8x8xf32>
    %99 = vector.broadcast %95 : f32 to vector<8x8xf32>
    %100 = arith.mulf %99, %98 : vector<8x8xf32>
    %101 = arith.addf %94, %100 : vector<8x8xf32>
    %102 = vector.broadcast %17 : f32 to vector<8x8xf32>
    %103 = arith.mulf %102, %10 : vector<8x8xf32>
    %104 = vector.broadcast %87 : f32 to vector<8x8xf32>
    %105 = arith.mulf %16, %104 : vector<8x8xf32>
    %106 = math.exp %105 : vector<8x8xf32>
    %107 = arith.mulf %103, %106 : vector<8x8xf32>
    %108 = arith.mulf %107, %101 : vector<8x8xf32>
    %109 = vector.extract_strided_slice %5 {offsets = [0, 32], sizes = [8, 32], strides = [1, 1]} : vector<16x576xf32> to vector<8x32xf32>
    %110 = vector.extract_strided_slice %5 {offsets = [0, 224], sizes = [8, 32], strides = [1, 1]} : vector<16x576xf32> to vector<8x32xf32>
    %111 = vector.extract_strided_slice %5 {offsets = [0, 416], sizes = [8, 32], strides = [1, 1]} : vector<16x576xf32> to vector<8x32xf32>
    %112 = arith.truncf %109 : vector<8x32xf32> to vector<8x32xbf16>
    %113 = arith.truncf %110 : vector<8x32xf32> to vector<8x32xbf16>
    %cst_32 = arith.constant dense<0.000000e+00> : vector<8x8xf32>
    %114 = tpu.matmul %112, %113, %cst_32 {dimension_numbers = #tpu.dot_dimension_numbers<[1], [1], [0], [0], [0, 0, 1, 0], [], []>} : vector<8x32xbf16>, vector<8x32xbf16>, vector<8x8xf32> -> vector<8x8xf32>
    %cst_33 = arith.constant dense<0xFF800000> : vector<8xf32>
    %115 = vector.multi_reduction <maximumf>, %114, %cst_33 [1] : vector<8x8xf32> to vector<8xf32>
    %116 = vector.shape_cast %115 : vector<8xf32> to vector<8x1xf32>
    %117 = vector.broadcast %116 : vector<8x1xf32> to vector<8x8xf32>
    %118 = arith.subf %114, %117 : vector<8x8xf32>
    %119 = math.exp %118 : vector<8x8xf32>
    %cst_34 = arith.constant dense<0.000000e+00> : vector<8xf32>
    %120 = vector.multi_reduction <add>, %119, %cst_34 [1] : vector<8x8xf32> to vector<8xf32>
    %121 = vector.shape_cast %120 : vector<8xf32> to vector<8x1xf32>
    %122 = tpu.reciprocal %121 {approx = true} : vector<8x1xf32> -> vector<8x1xf32>
    %123 = vector.broadcast %122 : vector<8x1xf32> to vector<8x8xf32>
    %124 = arith.mulf %119, %123 : vector<8x8xf32>
    %125 = vector.broadcast %18 : f32 to vector<8x8xf32>
    %126 = arith.mulf %125, %124 : vector<8x8xf32>
    %127 = arith.addf %126, %108 : vector<8x8xf32>
    %cst_35 = arith.constant dense<0.000000e+00> : vector<8x32xf32>
    %128 = tpu.matmul %127, %111, %cst_35 {dimension_numbers = #tpu.dot_dimension_numbers<[1], [0], [0], [1], [0, 0, 1, 1], [], []>} : vector<8x8xf32>, vector<8x32xf32>, vector<8x32xf32> -> vector<8x32xf32>
    %129 = vector.extract_strided_slice %5 {offsets = [8, 32], sizes = [8, 32], strides = [1, 1]} : vector<16x576xf32> to vector<8x32xf32>
    %130 = vector.extract_strided_slice %5 {offsets = [8, 224], sizes = [8, 32], strides = [1, 1]} : vector<16x576xf32> to vector<8x32xf32>
    %131 = vector.extract_strided_slice %5 {offsets = [8, 416], sizes = [8, 32], strides = [1, 1]} : vector<16x576xf32> to vector<8x32xf32>
    %132 = arith.truncf %129 : vector<8x32xf32> to vector<8x32xbf16>
    %133 = arith.truncf %130 : vector<8x32xf32> to vector<8x32xbf16>
    %cst_36 = arith.constant dense<0.000000e+00> : vector<8x8xf32>
    %134 = tpu.matmul %132, %133, %cst_36 {dimension_numbers = #tpu.dot_dimension_numbers<[1], [1], [0], [0], [0, 0, 1, 0], [], []>} : vector<8x32xbf16>, vector<8x32xbf16>, vector<8x8xf32> -> vector<8x8xf32>
    %cst_37 = arith.constant dense<0xFF800000> : vector<8xf32>
    %135 = vector.multi_reduction <maximumf>, %134, %cst_37 [1] : vector<8x8xf32> to vector<8xf32>
    %136 = vector.shape_cast %135 : vector<8xf32> to vector<8x1xf32>
    %137 = vector.broadcast %136 : vector<8x1xf32> to vector<8x8xf32>
    %138 = arith.subf %134, %137 : vector<8x8xf32>
    %139 = math.exp %138 : vector<8x8xf32>
    %cst_38 = arith.constant dense<0.000000e+00> : vector<8xf32>
    %140 = vector.multi_reduction <add>, %139, %cst_38 [1] : vector<8x8xf32> to vector<8xf32>
    %141 = vector.shape_cast %140 : vector<8xf32> to vector<8x1xf32>
    %142 = tpu.reciprocal %141 {approx = true} : vector<8x1xf32> -> vector<8x1xf32>
    %143 = vector.broadcast %142 : vector<8x1xf32> to vector<8x8xf32>
    %144 = arith.mulf %139, %143 : vector<8x8xf32>
    %145 = vector.broadcast %18 : f32 to vector<8x8xf32>
    %146 = arith.mulf %145, %144 : vector<8x8xf32>
    %147 = arith.addf %146, %108 : vector<8x8xf32>
    %cst_39 = arith.constant dense<0.000000e+00> : vector<8x32xf32>
    %148 = tpu.matmul %147, %131, %cst_39 {dimension_numbers = #tpu.dot_dimension_numbers<[1], [0], [0], [1], [0, 0, 1, 1], [], []>} : vector<8x8xf32>, vector<8x32xf32>, vector<8x32xf32> -> vector<8x32xf32>
    %149 = tpu.concatenate %128, %148 in 0 : vector<8x32xf32>, vector<8x32xf32> -> vector<16x32xf32>
    %150 = arith.truncf %149 : vector<16x32xf32> to vector<16x32xbf16>
    %c32 = arith.constant 32 : index
    %c0_40 = arith.constant 0 : index
    %151 = vector.load %arg6[%c32, %c0_40] : memref<192x128xbf16, #tpu.memory_space<vmem>>, vector<32x128xbf16>
    %cst_41 = arith.constant dense<0.000000e+00> : vector<16x128xf32>
    %152 = tpu.matmul %150, %151, %cst_41 {dimension_numbers = #tpu.dot_dimension_numbers<[1], [0], [0], [1], [0, 0, 1, 1], [], []>} : vector<16x32xbf16>, vector<32x128xbf16>, vector<16x128xf32> -> vector<16x128xf32>
    %153 = arith.addf %86, %152 : vector<16x128xf32>
    %c0_42 = arith.constant 0 : index
    %c2_43 = arith.constant 2 : index
    %154 = memref.load %arg2[%c0_42, %c2_43] : memref<3x6xf32, #tpu.memory_space<smem>>
    %c1_44 = arith.constant 1 : index
    %c2_45 = arith.constant 2 : index
    %155 = memref.load %arg2[%c1_44, %c2_45] : memref<3x6xf32, #tpu.memory_space<smem>>
    %c2_46 = arith.constant 2 : index
    %c2_47 = arith.constant 2 : index
    %156 = memref.load %arg2[%c2_46, %c2_47] : memref<3x6xf32, #tpu.memory_space<smem>>
    %157 = vector.broadcast %155 : f32 to vector<8x8xf32>
    %158 = arith.mulf %157, %16 : vector<8x8xf32>
    %159 = math.sin %158 : vector<8x8xf32>
    %160 = vector.broadcast %156 : f32 to vector<8x8xf32>
    %161 = arith.mulf %160, %159 : vector<8x8xf32>
    %cst_48 = arith.constant 1.000000e+00 : f32
    %162 = arith.subf %cst_48, %156 : f32
    %163 = vector.broadcast %155 : f32 to vector<8x8xf32>
    %164 = arith.mulf %163, %16 : vector<8x8xf32>
    %165 = math.cos %164 : vector<8x8xf32>
    %166 = vector.broadcast %162 : f32 to vector<8x8xf32>
    %167 = arith.mulf %166, %165 : vector<8x8xf32>
    %168 = arith.addf %161, %167 : vector<8x8xf32>
    %169 = vector.broadcast %17 : f32 to vector<8x8xf32>
    %170 = arith.mulf %169, %10 : vector<8x8xf32>
    %171 = vector.broadcast %154 : f32 to vector<8x8xf32>
    %172 = arith.mulf %16, %171 : vector<8x8xf32>
    %173 = math.exp %172 : vector<8x8xf32>
    %174 = arith.mulf %170, %173 : vector<8x8xf32>
    %175 = arith.mulf %174, %168 : vector<8x8xf32>
    %176 = vector.extract_strided_slice %5 {offsets = [0, 64], sizes = [8, 32], strides = [1, 1]} : vector<16x576xf32> to vector<8x32xf32>
    %177 = vector.extract_strided_slice %5 {offsets = [0, 256], sizes = [8, 32], strides = [1, 1]} : vector<16x576xf32> to vector<8x32xf32>
    %178 = vector.extract_strided_slice %5 {offsets = [0, 448], sizes = [8, 32], strides = [1, 1]} : vector<16x576xf32> to vector<8x32xf32>
    %179 = arith.truncf %176 : vector<8x32xf32> to vector<8x32xbf16>
    %180 = arith.truncf %177 : vector<8x32xf32> to vector<8x32xbf16>
    %cst_49 = arith.constant dense<0.000000e+00> : vector<8x8xf32>
    %181 = tpu.matmul %179, %180, %cst_49 {dimension_numbers = #tpu.dot_dimension_numbers<[1], [1], [0], [0], [0, 0, 1, 0], [], []>} : vector<8x32xbf16>, vector<8x32xbf16>, vector<8x8xf32> -> vector<8x8xf32>
    %cst_50 = arith.constant dense<0xFF800000> : vector<8xf32>
    %182 = vector.multi_reduction <maximumf>, %181, %cst_50 [1] : vector<8x8xf32> to vector<8xf32>
    %183 = vector.shape_cast %182 : vector<8xf32> to vector<8x1xf32>
    %184 = vector.broadcast %183 : vector<8x1xf32> to vector<8x8xf32>
    %185 = arith.subf %181, %184 : vector<8x8xf32>
    %186 = math.exp %185 : vector<8x8xf32>
    %cst_51 = arith.constant dense<0.000000e+00> : vector<8xf32>
    %187 = vector.multi_reduction <add>, %186, %cst_51 [1] : vector<8x8xf32> to vector<8xf32>
    %188 = vector.shape_cast %187 : vector<8xf32> to vector<8x1xf32>
    %189 = tpu.reciprocal %188 {approx = true} : vector<8x1xf32> -> vector<8x1xf32>
    %190 = vector.broadcast %189 : vector<8x1xf32> to vector<8x8xf32>
    %191 = arith.mulf %186, %190 : vector<8x8xf32>
    %192 = vector.broadcast %18 : f32 to vector<8x8xf32>
    %193 = arith.mulf %192, %191 : vector<8x8xf32>
    %194 = arith.addf %193, %175 : vector<8x8xf32>
    %cst_52 = arith.constant dense<0.000000e+00> : vector<8x32xf32>
    %195 = tpu.matmul %194, %178, %cst_52 {dimension_numbers = #tpu.dot_dimension_numbers<[1], [0], [0], [1], [0, 0, 1, 1], [], []>} : vector<8x8xf32>, vector<8x32xf32>, vector<8x32xf32> -> vector<8x32xf32>
    %196 = vector.extract_strided_slice %5 {offsets = [8, 64], sizes = [8, 32], strides = [1, 1]} : vector<16x576xf32> to vector<8x32xf32>
    %197 = vector.extract_strided_slice %5 {offsets = [8, 256], sizes = [8, 32], strides = [1, 1]} : vector<16x576xf32> to vector<8x32xf32>
    %198 = vector.extract_strided_slice %5 {offsets = [8, 448], sizes = [8, 32], strides = [1, 1]} : vector<16x576xf32> to vector<8x32xf32>
    %199 = arith.truncf %196 : vector<8x32xf32> to vector<8x32xbf16>
    %200 = arith.truncf %197 : vector<8x32xf32> to vector<8x32xbf16>
    %cst_53 = arith.constant dense<0.000000e+00> : vector<8x8xf32>
    %201 = tpu.matmul %199, %200, %cst_53 {dimension_numbers = #tpu.dot_dimension_numbers<[1], [1], [0], [0], [0, 0, 1, 0], [], []>} : vector<8x32xbf16>, vector<8x32xbf16>, vector<8x8xf32> -> vector<8x8xf32>
    %cst_54 = arith.constant dense<0xFF800000> : vector<8xf32>
    %202 = vector.multi_reduction <maximumf>, %201, %cst_54 [1] : vector<8x8xf32> to vector<8xf32>
    %203 = vector.shape_cast %202 : vector<8xf32> to vector<8x1xf32>
    %204 = vector.broadcast %203 : vector<8x1xf32> to vector<8x8xf32>
    %205 = arith.subf %201, %204 : vector<8x8xf32>
    %206 = math.exp %205 : vector<8x8xf32>
    %cst_55 = arith.constant dense<0.000000e+00> : vector<8xf32>
    %207 = vector.multi_reduction <add>, %206, %cst_55 [1] : vector<8x8xf32> to vector<8xf32>
    %208 = vector.shape_cast %207 : vector<8xf32> to vector<8x1xf32>
    %209 = tpu.reciprocal %208 {approx = true} : vector<8x1xf32> -> vector<8x1xf32>
    %210 = vector.broadcast %209 : vector<8x1xf32> to vector<8x8xf32>
    %211 = arith.mulf %206, %210 : vector<8x8xf32>
    %212 = vector.broadcast %18 : f32 to vector<8x8xf32>
    %213 = arith.mulf %212, %211 : vector<8x8xf32>
    %214 = arith.addf %213, %175 : vector<8x8xf32>
    %cst_56 = arith.constant dense<0.000000e+00> : vector<8x32xf32>
    %215 = tpu.matmul %214, %198, %cst_56 {dimension_numbers = #tpu.dot_dimension_numbers<[1], [0], [0], [1], [0, 0, 1, 1], [], []>} : vector<8x8xf32>, vector<8x32xf32>, vector<8x32xf32> -> vector<8x32xf32>
    %216 = tpu.concatenate %195, %215 in 0 : vector<8x32xf32>, vector<8x32xf32> -> vector<16x32xf32>
    %217 = arith.truncf %216 : vector<16x32xf32> to vector<16x32xbf16>
    %c64 = arith.constant 64 : index
    %c0_57 = arith.constant 0 : index
    %218 = vector.load %arg6[%c64, %c0_57] : memref<192x128xbf16, #tpu.memory_space<vmem>>, vector<32x128xbf16>
    %cst_58 = arith.constant dense<0.000000e+00> : vector<16x128xf32>
    %219 = tpu.matmul %217, %218, %cst_58 {dimension_numbers = #tpu.dot_dimension_numbers<[1], [0], [0], [1], [0, 0, 1, 1], [], []>} : vector<16x32xbf16>, vector<32x128xbf16>, vector<16x128xf32> -> vector<16x128xf32>
    %220 = arith.addf %153, %219 : vector<16x128xf32>
    %c0_59 = arith.constant 0 : index
    %c3 = arith.constant 3 : index
    %221 = memref.load %arg2[%c0_59, %c3] : memref<3x6xf32, #tpu.memory_space<smem>>
    %c1_60 = arith.constant 1 : index
    %c3_61 = arith.constant 3 : index
    %222 = memref.load %arg2[%c1_60, %c3_61] : memref<3x6xf32, #tpu.memory_space<smem>>
    %c2_62 = arith.constant 2 : index
    %c3_63 = arith.constant 3 : index
    %223 = memref.load %arg2[%c2_62, %c3_63] : memref<3x6xf32, #tpu.memory_space<smem>>
    %224 = vector.broadcast %222 : f32 to vector<8x8xf32>
    %225 = arith.mulf %224, %16 : vector<8x8xf32>
    %226 = math.sin %225 : vector<8x8xf32>
    %227 = vector.broadcast %223 : f32 to vector<8x8xf32>
    %228 = arith.mulf %227, %226 : vector<8x8xf32>
    %cst_64 = arith.constant 1.000000e+00 : f32
    %229 = arith.subf %cst_64, %223 : f32
    %230 = vector.broadcast %222 : f32 to vector<8x8xf32>
    %231 = arith.mulf %230, %16 : vector<8x8xf32>
    %232 = math.cos %231 : vector<8x8xf32>
    %233 = vector.broadcast %229 : f32 to vector<8x8xf32>
    %234 = arith.mulf %233, %232 : vector<8x8xf32>
    %235 = arith.addf %228, %234 : vector<8x8xf32>
    %236 = vector.broadcast %17 : f32 to vector<8x8xf32>
    %237 = arith.mulf %236, %10 : vector<8x8xf32>
    %238 = vector.broadcast %221 : f32 to vector<8x8xf32>
    %239 = arith.mulf %16, %238 : vector<8x8xf32>
    %240 = math.exp %239 : vector<8x8xf32>
    %241 = arith.mulf %237, %240 : vector<8x8xf32>
    %242 = arith.mulf %241, %235 : vector<8x8xf32>
    %243 = vector.extract_strided_slice %5 {offsets = [0, 96], sizes = [8, 32], strides = [1, 1]} : vector<16x576xf32> to vector<8x32xf32>
    %244 = vector.extract_strided_slice %5 {offsets = [0, 288], sizes = [8, 32], strides = [1, 1]} : vector<16x576xf32> to vector<8x32xf32>
    %245 = vector.extract_strided_slice %5 {offsets = [0, 480], sizes = [8, 32], strides = [1, 1]} : vector<16x576xf32> to vector<8x32xf32>
    %246 = arith.truncf %243 : vector<8x32xf32> to vector<8x32xbf16>
    %247 = arith.truncf %244 : vector<8x32xf32> to vector<8x32xbf16>
    %cst_65 = arith.constant dense<0.000000e+00> : vector<8x8xf32>
    %248 = tpu.matmul %246, %247, %cst_65 {dimension_numbers = #tpu.dot_dimension_numbers<[1], [1], [0], [0], [0, 0, 1, 0], [], []>} : vector<8x32xbf16>, vector<8x32xbf16>, vector<8x8xf32> -> vector<8x8xf32>
    %cst_66 = arith.constant dense<0xFF800000> : vector<8xf32>
    %249 = vector.multi_reduction <maximumf>, %248, %cst_66 [1] : vector<8x8xf32> to vector<8xf32>
    %250 = vector.shape_cast %249 : vector<8xf32> to vector<8x1xf32>
    %251 = vector.broadcast %250 : vector<8x1xf32> to vector<8x8xf32>
    %252 = arith.subf %248, %251 : vector<8x8xf32>
    %253 = math.exp %252 : vector<8x8xf32>
    %cst_67 = arith.constant dense<0.000000e+00> : vector<8xf32>
    %254 = vector.multi_reduction <add>, %253, %cst_67 [1] : vector<8x8xf32> to vector<8xf32>
    %255 = vector.shape_cast %254 : vector<8xf32> to vector<8x1xf32>
    %256 = tpu.reciprocal %255 {approx = true} : vector<8x1xf32> -> vector<8x1xf32>
    %257 = vector.broadcast %256 : vector<8x1xf32> to vector<8x8xf32>
    %258 = arith.mulf %253, %257 : vector<8x8xf32>
    %259 = vector.broadcast %18 : f32 to vector<8x8xf32>
    %260 = arith.mulf %259, %258 : vector<8x8xf32>
    %261 = arith.addf %260, %242 : vector<8x8xf32>
    %cst_68 = arith.constant dense<0.000000e+00> : vector<8x32xf32>
    %262 = tpu.matmul %261, %245, %cst_68 {dimension_numbers = #tpu.dot_dimension_numbers<[1], [0], [0], [1], [0, 0, 1, 1], [], []>} : vector<8x8xf32>, vector<8x32xf32>, vector<8x32xf32> -> vector<8x32xf32>
    %263 = vector.extract_strided_slice %5 {offsets = [8, 96], sizes = [8, 32], strides = [1, 1]} : vector<16x576xf32> to vector<8x32xf32>
    %264 = vector.extract_strided_slice %5 {offsets = [8, 288], sizes = [8, 32], strides = [1, 1]} : vector<16x576xf32> to vector<8x32xf32>
    %265 = vector.extract_strided_slice %5 {offsets = [8, 480], sizes = [8, 32], strides = [1, 1]} : vector<16x576xf32> to vector<8x32xf32>
    %266 = arith.truncf %263 : vector<8x32xf32> to vector<8x32xbf16>
    %267 = arith.truncf %264 : vector<8x32xf32> to vector<8x32xbf16>
    %cst_69 = arith.constant dense<0.000000e+00> : vector<8x8xf32>
    %268 = tpu.matmul %266, %267, %cst_69 {dimension_numbers = #tpu.dot_dimension_numbers<[1], [1], [0], [0], [0, 0, 1, 0], [], []>} : vector<8x32xbf16>, vector<8x32xbf16>, vector<8x8xf32> -> vector<8x8xf32>
    %cst_70 = arith.constant dense<0xFF800000> : vector<8xf32>
    %269 = vector.multi_reduction <maximumf>, %268, %cst_70 [1] : vector<8x8xf32> to vector<8xf32>
    %270 = vector.shape_cast %269 : vector<8xf32> to vector<8x1xf32>
    %271 = vector.broadcast %270 : vector<8x1xf32> to vector<8x8xf32>
    %272 = arith.subf %268, %271 : vector<8x8xf32>
    %273 = math.exp %272 : vector<8x8xf32>
    %cst_71 = arith.constant dense<0.000000e+00> : vector<8xf32>
    %274 = vector.multi_reduction <add>, %273, %cst_71 [1] : vector<8x8xf32> to vector<8xf32>
    %275 = vector.shape_cast %274 : vector<8xf32> to vector<8x1xf32>
    %276 = tpu.reciprocal %275 {approx = true} : vector<8x1xf32> -> vector<8x1xf32>
    %277 = vector.broadcast %276 : vector<8x1xf32> to vector<8x8xf32>
    %278 = arith.mulf %273, %277 : vector<8x8xf32>
    %279 = vector.broadcast %18 : f32 to vector<8x8xf32>
    %280 = arith.mulf %279, %278 : vector<8x8xf32>
    %281 = arith.addf %280, %242 : vector<8x8xf32>
    %cst_72 = arith.constant dense<0.000000e+00> : vector<8x32xf32>
    %282 = tpu.matmul %281, %265, %cst_72 {dimension_numbers = #tpu.dot_dimension_numbers<[1], [0], [0], [1], [0, 0, 1, 1], [], []>} : vector<8x8xf32>, vector<8x32xf32>, vector<8x32xf32> -> vector<8x32xf32>
    %283 = tpu.concatenate %262, %282 in 0 : vector<8x32xf32>, vector<8x32xf32> -> vector<16x32xf32>
    %284 = arith.truncf %283 : vector<16x32xf32> to vector<16x32xbf16>
    %c96 = arith.constant 96 : index
    %c0_73 = arith.constant 0 : index
    %285 = vector.load %arg6[%c96, %c0_73] : memref<192x128xbf16, #tpu.memory_space<vmem>>, vector<32x128xbf16>
    %cst_74 = arith.constant dense<0.000000e+00> : vector<16x128xf32>
    %286 = tpu.matmul %284, %285, %cst_74 {dimension_numbers = #tpu.dot_dimension_numbers<[1], [0], [0], [1], [0, 0, 1, 1], [], []>} : vector<16x32xbf16>, vector<32x128xbf16>, vector<16x128xf32> -> vector<16x128xf32>
    %287 = arith.addf %220, %286 : vector<16x128xf32>
    %c0_75 = arith.constant 0 : index
    %c4 = arith.constant 4 : index
    %288 = memref.load %arg2[%c0_75, %c4] : memref<3x6xf32, #tpu.memory_space<smem>>
    %c1_76 = arith.constant 1 : index
    %c4_77 = arith.constant 4 : index
    %289 = memref.load %arg2[%c1_76, %c4_77] : memref<3x6xf32, #tpu.memory_space<smem>>
    %c2_78 = arith.constant 2 : index
    %c4_79 = arith.constant 4 : index
    %290 = memref.load %arg2[%c2_78, %c4_79] : memref<3x6xf32, #tpu.memory_space<smem>>
    %291 = vector.broadcast %289 : f32 to vector<8x8xf32>
    %292 = arith.mulf %291, %16 : vector<8x8xf32>
    %293 = math.sin %292 : vector<8x8xf32>
    %294 = vector.broadcast %290 : f32 to vector<8x8xf32>
    %295 = arith.mulf %294, %293 : vector<8x8xf32>
    %cst_80 = arith.constant 1.000000e+00 : f32
    %296 = arith.subf %cst_80, %290 : f32
    %297 = vector.broadcast %289 : f32 to vector<8x8xf32>
    %298 = arith.mulf %297, %16 : vector<8x8xf32>
    %299 = math.cos %298 : vector<8x8xf32>
    %300 = vector.broadcast %296 : f32 to vector<8x8xf32>
    %301 = arith.mulf %300, %299 : vector<8x8xf32>
    %302 = arith.addf %295, %301 : vector<8x8xf32>
    %303 = vector.broadcast %17 : f32 to vector<8x8xf32>
    %304 = arith.mulf %303, %10 : vector<8x8xf32>
    %305 = vector.broadcast %288 : f32 to vector<8x8xf32>
    %306 = arith.mulf %16, %305 : vector<8x8xf32>
    %307 = math.exp %306 : vector<8x8xf32>
    %308 = arith.mulf %304, %307 : vector<8x8xf32>
    %309 = arith.mulf %308, %302 : vector<8x8xf32>
    %310 = vector.extract_strided_slice %5 {offsets = [0, 128], sizes = [8, 32], strides = [1, 1]} : vector<16x576xf32> to vector<8x32xf32>
    %311 = vector.extract_strided_slice %5 {offsets = [0, 320], sizes = [8, 32], strides = [1, 1]} : vector<16x576xf32> to vector<8x32xf32>
    %312 = vector.extract_strided_slice %5 {offsets = [0, 512], sizes = [8, 32], strides = [1, 1]} : vector<16x576xf32> to vector<8x32xf32>
    %313 = arith.truncf %310 : vector<8x32xf32> to vector<8x32xbf16>
    %314 = arith.truncf %311 : vector<8x32xf32> to vector<8x32xbf16>
    %cst_81 = arith.constant dense<0.000000e+00> : vector<8x8xf32>
    %315 = tpu.matmul %313, %314, %cst_81 {dimension_numbers = #tpu.dot_dimension_numbers<[1], [1], [0], [0], [0, 0, 1, 0], [], []>} : vector<8x32xbf16>, vector<8x32xbf16>, vector<8x8xf32> -> vector<8x8xf32>
    %cst_82 = arith.constant dense<0xFF800000> : vector<8xf32>
    %316 = vector.multi_reduction <maximumf>, %315, %cst_82 [1] : vector<8x8xf32> to vector<8xf32>
    %317 = vector.shape_cast %316 : vector<8xf32> to vector<8x1xf32>
    %318 = vector.broadcast %317 : vector<8x1xf32> to vector<8x8xf32>
    %319 = arith.subf %315, %318 : vector<8x8xf32>
    %320 = math.exp %319 : vector<8x8xf32>
    %cst_83 = arith.constant dense<0.000000e+00> : vector<8xf32>
    %321 = vector.multi_reduction <add>, %320, %cst_83 [1] : vector<8x8xf32> to vector<8xf32>
    %322 = vector.shape_cast %321 : vector<8xf32> to vector<8x1xf32>
    %323 = tpu.reciprocal %322 {approx = true} : vector<8x1xf32> -> vector<8x1xf32>
    %324 = vector.broadcast %323 : vector<8x1xf32> to vector<8x8xf32>
    %325 = arith.mulf %320, %324 : vector<8x8xf32>
    %326 = vector.broadcast %18 : f32 to vector<8x8xf32>
    %327 = arith.mulf %326, %325 : vector<8x8xf32>
    %328 = arith.addf %327, %309 : vector<8x8xf32>
    %cst_84 = arith.constant dense<0.000000e+00> : vector<8x32xf32>
    %329 = tpu.matmul %328, %312, %cst_84 {dimension_numbers = #tpu.dot_dimension_numbers<[1], [0], [0], [1], [0, 0, 1, 1], [], []>} : vector<8x8xf32>, vector<8x32xf32>, vector<8x32xf32> -> vector<8x32xf32>
    %330 = vector.extract_strided_slice %5 {offsets = [8, 128], sizes = [8, 32], strides = [1, 1]} : vector<16x576xf32> to vector<8x32xf32>
    %331 = vector.extract_strided_slice %5 {offsets = [8, 320], sizes = [8, 32], strides = [1, 1]} : vector<16x576xf32> to vector<8x32xf32>
    %332 = vector.extract_strided_slice %5 {offsets = [8, 512], sizes = [8, 32], strides = [1, 1]} : vector<16x576xf32> to vector<8x32xf32>
    %333 = arith.truncf %330 : vector<8x32xf32> to vector<8x32xbf16>
    %334 = arith.truncf %331 : vector<8x32xf32> to vector<8x32xbf16>
    %cst_85 = arith.constant dense<0.000000e+00> : vector<8x8xf32>
    %335 = tpu.matmul %333, %334, %cst_85 {dimension_numbers = #tpu.dot_dimension_numbers<[1], [1], [0], [0], [0, 0, 1, 0], [], []>} : vector<8x32xbf16>, vector<8x32xbf16>, vector<8x8xf32> -> vector<8x8xf32>
    %cst_86 = arith.constant dense<0xFF800000> : vector<8xf32>
    %336 = vector.multi_reduction <maximumf>, %335, %cst_86 [1] : vector<8x8xf32> to vector<8xf32>
    %337 = vector.shape_cast %336 : vector<8xf32> to vector<8x1xf32>
    %338 = vector.broadcast %337 : vector<8x1xf32> to vector<8x8xf32>
    %339 = arith.subf %335, %338 : vector<8x8xf32>
    %340 = math.exp %339 : vector<8x8xf32>
    %cst_87 = arith.constant dense<0.000000e+00> : vector<8xf32>
    %341 = vector.multi_reduction <add>, %340, %cst_87 [1] : vector<8x8xf32> to vector<8xf32>
    %342 = vector.shape_cast %341 : vector<8xf32> to vector<8x1xf32>
    %343 = tpu.reciprocal %342 {approx = true} : vector<8x1xf32> -> vector<8x1xf32>
    %344 = vector.broadcast %343 : vector<8x1xf32> to vector<8x8xf32>
    %345 = arith.mulf %340, %344 : vector<8x8xf32>
    %346 = vector.broadcast %18 : f32 to vector<8x8xf32>
    %347 = arith.mulf %346, %345 : vector<8x8xf32>
    %348 = arith.addf %347, %309 : vector<8x8xf32>
    %cst_88 = arith.constant dense<0.000000e+00> : vector<8x32xf32>
    %349 = tpu.matmul %348, %332, %cst_88 {dimension_numbers = #tpu.dot_dimension_numbers<[1], [0], [0], [1], [0, 0, 1, 1], [], []>} : vector<8x8xf32>, vector<8x32xf32>, vector<8x32xf32> -> vector<8x32xf32>
    %350 = tpu.concatenate %329, %349 in 0 : vector<8x32xf32>, vector<8x32xf32> -> vector<16x32xf32>
    %351 = arith.truncf %350 : vector<16x32xf32> to vector<16x32xbf16>
    %c128 = arith.constant 128 : index
    %c0_89 = arith.constant 0 : index
    %352 = vector.load %arg6[%c128, %c0_89] : memref<192x128xbf16, #tpu.memory_space<vmem>>, vector<32x128xbf16>
    %cst_90 = arith.constant dense<0.000000e+00> : vector<16x128xf32>
    %353 = tpu.matmul %351, %352, %cst_90 {dimension_numbers = #tpu.dot_dimension_numbers<[1], [0], [0], [1], [0, 0, 1, 1], [], []>} : vector<16x32xbf16>, vector<32x128xbf16>, vector<16x128xf32> -> vector<16x128xf32>
    %354 = arith.addf %287, %353 : vector<16x128xf32>
    %c0_91 = arith.constant 0 : index
    %c5 = arith.constant 5 : index
    %355 = memref.load %arg2[%c0_91, %c5] : memref<3x6xf32, #tpu.memory_space<smem>>
    %c1_92 = arith.constant 1 : index
    %c5_93 = arith.constant 5 : index
    %356 = memref.load %arg2[%c1_92, %c5_93] : memref<3x6xf32, #tpu.memory_space<smem>>
    %c2_94 = arith.constant 2 : index
    %c5_95 = arith.constant 5 : index
    %357 = memref.load %arg2[%c2_94, %c5_95] : memref<3x6xf32, #tpu.memory_space<smem>>
    %358 = vector.broadcast %356 : f32 to vector<8x8xf32>
    %359 = arith.mulf %358, %16 : vector<8x8xf32>
    %360 = math.sin %359 : vector<8x8xf32>
    %361 = vector.broadcast %357 : f32 to vector<8x8xf32>
    %362 = arith.mulf %361, %360 : vector<8x8xf32>
    %cst_96 = arith.constant 1.000000e+00 : f32
    %363 = arith.subf %cst_96, %357 : f32
    %364 = vector.broadcast %356 : f32 to vector<8x8xf32>
    %365 = arith.mulf %364, %16 : vector<8x8xf32>
    %366 = math.cos %365 : vector<8x8xf32>
    %367 = vector.broadcast %363 : f32 to vector<8x8xf32>
    %368 = arith.mulf %367, %366 : vector<8x8xf32>
    %369 = arith.addf %362, %368 : vector<8x8xf32>
    %370 = vector.broadcast %17 : f32 to vector<8x8xf32>
    %371 = arith.mulf %370, %10 : vector<8x8xf32>
    %372 = vector.broadcast %355 : f32 to vector<8x8xf32>
    %373 = arith.mulf %16, %372 : vector<8x8xf32>
    %374 = math.exp %373 : vector<8x8xf32>
    %375 = arith.mulf %371, %374 : vector<8x8xf32>
    %376 = arith.mulf %375, %369 : vector<8x8xf32>
    %377 = vector.extract_strided_slice %5 {offsets = [0, 160], sizes = [8, 32], strides = [1, 1]} : vector<16x576xf32> to vector<8x32xf32>
    %378 = vector.extract_strided_slice %5 {offsets = [0, 352], sizes = [8, 32], strides = [1, 1]} : vector<16x576xf32> to vector<8x32xf32>
    %379 = vector.extract_strided_slice %5 {offsets = [0, 544], sizes = [8, 32], strides = [1, 1]} : vector<16x576xf32> to vector<8x32xf32>
    %380 = arith.truncf %377 : vector<8x32xf32> to vector<8x32xbf16>
    %381 = arith.truncf %378 : vector<8x32xf32> to vector<8x32xbf16>
    %cst_97 = arith.constant dense<0.000000e+00> : vector<8x8xf32>
    %382 = tpu.matmul %380, %381, %cst_97 {dimension_numbers = #tpu.dot_dimension_numbers<[1], [1], [0], [0], [0, 0, 1, 0], [], []>} : vector<8x32xbf16>, vector<8x32xbf16>, vector<8x8xf32> -> vector<8x8xf32>
    %cst_98 = arith.constant dense<0xFF800000> : vector<8xf32>
    %383 = vector.multi_reduction <maximumf>, %382, %cst_98 [1] : vector<8x8xf32> to vector<8xf32>
    %384 = vector.shape_cast %383 : vector<8xf32> to vector<8x1xf32>
    %385 = vector.broadcast %384 : vector<8x1xf32> to vector<8x8xf32>
    %386 = arith.subf %382, %385 : vector<8x8xf32>
    %387 = math.exp %386 : vector<8x8xf32>
    %cst_99 = arith.constant dense<0.000000e+00> : vector<8xf32>
    %388 = vector.multi_reduction <add>, %387, %cst_99 [1] : vector<8x8xf32> to vector<8xf32>
    %389 = vector.shape_cast %388 : vector<8xf32> to vector<8x1xf32>
    %390 = tpu.reciprocal %389 {approx = true} : vector<8x1xf32> -> vector<8x1xf32>
    %391 = vector.broadcast %390 : vector<8x1xf32> to vector<8x8xf32>
    %392 = arith.mulf %387, %391 : vector<8x8xf32>
    %393 = vector.broadcast %18 : f32 to vector<8x8xf32>
    %394 = arith.mulf %393, %392 : vector<8x8xf32>
    %395 = arith.addf %394, %376 : vector<8x8xf32>
    %cst_100 = arith.constant dense<0.000000e+00> : vector<8x32xf32>
    %396 = tpu.matmul %395, %379, %cst_100 {dimension_numbers = #tpu.dot_dimension_numbers<[1], [0], [0], [1], [0, 0, 1, 1], [], []>} : vector<8x8xf32>, vector<8x32xf32>, vector<8x32xf32> -> vector<8x32xf32>
    %397 = vector.extract_strided_slice %5 {offsets = [8, 160], sizes = [8, 32], strides = [1, 1]} : vector<16x576xf32> to vector<8x32xf32>
    %398 = vector.extract_strided_slice %5 {offsets = [8, 352], sizes = [8, 32], strides = [1, 1]} : vector<16x576xf32> to vector<8x32xf32>
    %399 = vector.extract_strided_slice %5 {offsets = [8, 544], sizes = [8, 32], strides = [1, 1]} : vector<16x576xf32> to vector<8x32xf32>
    %400 = arith.truncf %397 : vector<8x32xf32> to vector<8x32xbf16>
    %401 = arith.truncf %398 : vector<8x32xf32> to vector<8x32xbf16>
    %cst_101 = arith.constant dense<0.000000e+00> : vector<8x8xf32>
    %402 = tpu.matmul %400, %401, %cst_101 {dimension_numbers = #tpu.dot_dimension_numbers<[1], [1], [0], [0], [0, 0, 1, 0], [], []>} : vector<8x32xbf16>, vector<8x32xbf16>, vector<8x8xf32> -> vector<8x8xf32>
    %cst_102 = arith.constant dense<0xFF800000> : vector<8xf32>
    %403 = vector.multi_reduction <maximumf>, %402, %cst_102 [1] : vector<8x8xf32> to vector<8xf32>
    %404 = vector.shape_cast %403 : vector<8xf32> to vector<8x1xf32>
    %405 = vector.broadcast %404 : vector<8x1xf32> to vector<8x8xf32>
    %406 = arith.subf %402, %405 : vector<8x8xf32>
    %407 = math.exp %406 : vector<8x8xf32>
    %cst_103 = arith.constant dense<0.000000e+00> : vector<8xf32>
    %408 = vector.multi_reduction <add>, %407, %cst_103 [1] : vector<8x8xf32> to vector<8xf32>
    %409 = vector.shape_cast %408 : vector<8xf32> to vector<8x1xf32>
    %410 = tpu.reciprocal %409 {approx = true} : vector<8x1xf32> -> vector<8x1xf32>
    %411 = vector.broadcast %410 : vector<8x1xf32> to vector<8x8xf32>
    %412 = arith.mulf %407, %411 : vector<8x8xf32>
    %413 = vector.broadcast %18 : f32 to vector<8x8xf32>
    %414 = arith.mulf %413, %412 : vector<8x8xf32>
    %415 = arith.addf %414, %376 : vector<8x8xf32>
    %cst_104 = arith.constant dense<0.000000e+00> : vector<8x32xf32>
    %416 = tpu.matmul %415, %399, %cst_104 {dimension_numbers = #tpu.dot_dimension_numbers<[1], [0], [0], [1], [0, 0, 1, 1], [], []>} : vector<8x8xf32>, vector<8x32xf32>, vector<8x32xf32> -> vector<8x32xf32>
    %417 = tpu.concatenate %396, %416 in 0 : vector<8x32xf32>, vector<8x32xf32> -> vector<16x32xf32>
    %418 = arith.truncf %417 : vector<16x32xf32> to vector<16x32xbf16>
    %c160 = arith.constant 160 : index
    %c0_105 = arith.constant 0 : index
    %419 = vector.load %arg6[%c160, %c0_105] : memref<192x128xbf16, #tpu.memory_space<vmem>>, vector<32x128xbf16>
    %cst_106 = arith.constant dense<0.000000e+00> : vector<16x128xf32>
    %420 = tpu.matmul %418, %419, %cst_106 {dimension_numbers = #tpu.dot_dimension_numbers<[1], [0], [0], [1], [0, 0, 1, 1], [], []>} : vector<16x32xbf16>, vector<32x128xbf16>, vector<16x128xf32> -> vector<16x128xf32>
    %421 = arith.addf %354, %420 : vector<16x128xf32>
    %c0_107 = arith.constant 0 : index
    %c0_108 = arith.constant 0 : index
    %422 = vector.load %arg7[%c0_107, %c0_108] : memref<1x128xf32, #tpu.memory_space<vmem>>, vector<1x128xf32>
    %423 = vector.broadcast %422 : vector<1x128xf32> to vector<16x128xf32>
    %424 = arith.addf %421, %423 : vector<16x128xf32>
    %c0_109 = arith.constant 0 : index
    %c0_110 = arith.constant 0 : index
    %425 = vector.load %arg8[%c0_109, %c0_110] : memref<16x128xf32, #tpu.memory_space<vmem>>, vector<16x128xf32>
    tpu.vector_store %arg8[%c0_109, %c0_110], %424 {strides = array<i32>} : memref<16x128xf32, #tpu.memory_space<vmem>>, vector<16x128xf32>,
    return
  }
  func.func @transform_0(%arg0: i32) -> (i32, i32) {
    %c0_i32 = arith.constant 0 : i32
    %c0_i32_0 = arith.constant 0 : i32
    %c0_i32_1 = arith.constant 0 : i32
    return %c0_i32, %c0_i32_0 : i32, i32
  }
  func.func @transform_1(%arg0: i32) -> (i32, i32) {
    %c0_i32 = arith.constant 0 : i32
    %c0_i32_0 = arith.constant 0 : i32
    %c0_i32_1 = arith.constant 0 : i32
    return %c0_i32, %c0_i32_0 : i32, i32
  }
  func.func @transform_2(%arg0: i32) -> (i32, i32) {
    %c0_i32 = arith.constant 0 : i32
    %c0_i32_0 = arith.constant 0 : i32
    return %arg0, %c0_i32 : i32, i32
  }
  func.func @transform_3(%arg0: i32) -> (i32, i32) {
    %c0_i32 = arith.constant 0 : i32
    %c0_i32_0 = arith.constant 0 : i32
    %c0_i32_1 = arith.constant 0 : i32
    return %c0_i32, %c0_i32_0 : i32, i32
  }
  func.func @transform_4(%arg0: i32) -> (i32, i32) {
    %c0_i32 = arith.constant 0 : i32
    %c0_i32_0 = arith.constant 0 : i32
    %c0_i32_1 = arith.constant 0 : i32
    return %c0_i32, %c0_i32_0 : i32, i32
  }
  func.func @transform_5(%arg0: i32) -> (i32, i32) {
    %c0_i32 = arith.constant 0 : i32
    %c0_i32_0 = arith.constant 0 : i32
    %c0_i32_1 = arith.constant 0 : i32
    return %c0_i32, %c0_i32_0 : i32, i32
  }
  func.func @transform_6(%arg0: i32) -> (i32, i32) {
    %c0_i32 = arith.constant 0 : i32
    %c0_i32_0 = arith.constant 0 : i32
    %c0_i32_1 = arith.constant 0 : i32
    return %c0_i32, %c0_i32_0 : i32, i32
  }
  func.func @transform_7(%arg0: i32) -> (i32, i32) {
    %c0_i32 = arith.constant 0 : i32
    %c0_i32_0 = arith.constant 0 : i32
    return %arg0, %c0_i32 : i32, i32
  }
}

</mosaic_0001>

<bundles_post_ra>
// kernel: tpu_custom_call.1
= control target key start
LH: loop header
LB: loop body
LE: loop exit
PB: predicated region body
PF: predicated region fallthrough
CT: control target
= control target key end

     0   :  { %13 = vsyncpa [#allocation6], 0  ;;  %s4653_s0 = inlined_call_operand.<no memory space> [shape: f32[1,1], index: 0, kind: input, shape index: {}]   ;;  %s4654_s1 = inlined_call_operand.hbm [shape: f32[3,6], index: 1, kind: input, shape index: {}]   ;;  %s4655_s2 = inlined_call_operand.hbm [shape: bf16[16,16], index: 2, kind: input, shape index: {}]   ;;  %s4656_s3 = inlined_call_operand.hbm [shape: bf16[16,576], index: 3, kind: input, shape index: {}]   ;;  %s4657_s4 = inlined_call_operand.hbm [shape: f32[1,576], index: 4, kind: input, shape index: {}]   ;;  %s4658_s5 = inlined_call_operand.hbm [shape: bf16[192,128], index: 5, kind: input, shape index: {}]   ;;  %s4659_s6 = inlined_call_operand.vmem [shape: f32[1,128], index: 6, kind: input, shape index: {}]   ;;  %s4660_s7 = inlined_call_operand.hbm [shape: f32[16,128], index: 7, kind: output, shape index: {}]  }
   0x1   :  { %14 = vsyncpa [#allocation4], 0 }
   0x2   :  { %15 = vsyncpa [#allocation9], 0 }
   0x3   :  { %16 = vsyncpa [#allocation12], 0  ;;  %s46_s26 = sshll.u32 %s4656_s3, 4  ;;  %s47_s26 = int_to_ptr.hbm [resolvable:$true] %s46_s26 }
   0x4   :  { %17 = vsyncpa [#allocation5], 0  ;;  %s3598_s27 = smov [#allocation8]   ;;  %s25_s8 = sshll.u32 %s4654_s1, 4  ;;  %s26_s8 = int_to_ptr.hbm [resolvable:$true] %s25_s8 }
   0x5   :  { %s48_s28 = sshll.u32 %s3598_s27, 4  ;;  %s3599_s9 = smov 320   ;;  %s49_s28 = int_to_ptr.vmem [resolvable:$true] %s48_s28 }
   0x6   :  { %s3600_s10 = smov 20   ;;  %s3601_s11 = smov [#allocation3]  }
   0x7   :  { %54 = dma.hbm_to_vmem [thread:$0]  %s47_s26, 640, %s49_s28, [#allocation9], %s3599_s9, %s3599_s9, %s3600_s10  }
   0x8   :  { %28 = dma.hbm_to_smem %s26_s8, 64, %s3601_s11, [#allocation6]  }
   0x9   :  { %s33_s14 = sshll.u32 %s4655_s2, 4  ;;  %s3602_s3 = smov [#allocation7]   ;;  %s34_s14 = int_to_ptr.hbm [resolvable:$true] %s33_s14 }
   0xa   :  { %s35_s15 = sshll.u32 %s3602_s3, 4  ;;  %s60_s18 = sshll.u32 %s4657_s4, 4  ;;  %s36_s15 = int_to_ptr.vmem [resolvable:$true] %s35_s15  ;;  %s61_s18 = int_to_ptr.hbm [resolvable:$true] %s60_s18 }
   0xb   :  { %s3603_s19 = smov 64   ;;  %s3604_s1 = smov 4  }
   0xc   :  { %41 = dma.hbm_to_vmem [thread:$0]  %s34_s14, 128, %s36_s15, [#allocation4], %s3603_s19, %s3603_s19, %s3604_s1  }
   0xd   :  { %s3605_s20 = smov [#allocation10]   ;;  %s70_s2 = sshll.u32 %s4658_s5, 4  ;;  %s71_s2 = int_to_ptr.hbm [resolvable:$true] %s70_s2 }
   0xe   :  { %s62_s21 = sshll.u32 %s3605_s20, 4  ;;  %s3606_s24 = smov [#allocation11]   ;;  %s63_s21 = int_to_ptr.vmem [resolvable:$true] %s62_s21 }
   0xf   :  { %65 = dma.hbm_to_vmem [thread:$0]  %s61_s18, 80, %s63_s21, [#allocation9]  }
  0x10   :  { %s72_s25 = sshll.u32 %s3606_s24, 4  ;;  %s73_s25 = int_to_ptr.vmem [resolvable:$true] %s72_s25 }
  0x11   :  { %78 = dma.hbm_to_vmem [thread:$0]  %s71_s2, 1536, %s73_s25, [#allocation12], %s3603_s19, %s3603_s19, %s3604_s1  }
  0x12   :  { %3588 = dma.done.wait [#allocation6], 64  }
  0x13   :  { %3589 = vsyncadd [#allocation6], 4294967232 }
  0x14   :  { %3590 = dma.done.wait [#allocation4], 128  }
  0x15   :  { %3591 = vsyncadd [#allocation4], 4294967168 }
  0x16   :  { %3592 = dma.done.wait [#allocation9], 720  }
  0x17   :  { %3593 = vsyncadd [#allocation9], 4294966576 }
  0x18   :  { %3594 = dma.done.wait [#allocation12], 1536  }
  0x19   :  { %3595 = vsyncadd [#allocation12], 4294965760 }
  0x1a   :  { %101 = sfence }
  0x1b   :  { %v3346_v0 = vld [vmem:[#allocation8 + $0x4] sm:$0xf]  ;;  %v3190_v1 = vld [vmem:[#allocation8 + $0x14] sm:$0xf0]  ;;  %v3188_v3 = vld [vmem:[#allocation8] sm:$0xf]  ;;  %v228_v43 = vlaneseq }
  0x1c   :  { %v3193_v2 = vor.u32 %v3346_v0, %v3190_v1  ;;  %v3348_v4 = vld [vmem:[#allocation8 + $0x10] sm:$0xf0]  ;;  %v3679_v5 = vld [vmem:[#allocation7] sm:$0xff]  ;;  %vm154_vm0 = vcmask 130048   ;;  %v3347_v7 = vld [vmem:[#allocation8 + $0xc] sm:$0xf] }
  0x1d   :  { %v3189_v6 = vor.u32 %v3348_v4, %v3188_v3  ;;  %v3198_v8 = vld [vmem:[#allocation8 + $0x1c] sm:$0xf0]  ;;  %v3685_v10 = vld [vmem:[#allocation10] sm:$0x1f]  ;;  %s3607_s4 = smov 32   ;;  %s3608_s5 = smov 96  }
  0x1e   :  { %179 = vmatpush.bf16.msra.mxu1 %v3193_v2  ;;  %v3201_v9 = vor.u32 %v3347_v7, %v3198_v8  ;;  %v114_v11 = vperm.slane %v3685_v10, 1  ;;  %v113_v18 = vperm.slane %v3685_v10, 0  ;;  %vm576_vm1 = vcmask 261120   ;;  %v3196_v32 = vld [vmem:[#allocation8 + $0x8] sm:$0xf]  ;;  %s3214_s26 = sld [smem:[#allocation3 + $0x80]] }
  0x1f   :  { %165 = vmatpush.bf16.msra.mxu0 %v3189_v6  ;;  %v116_v30 = vperm.slane %v3685_v10, 3  ;;  %v3349_v33 = vld [vmem:[#allocation8 + $0x18] sm:$0xf0]  ;;  %vm596_vm2 = vcmask 64512   ;;  %v3726_v44 = vshrl.u32 %v228_v43, 7  ;;  %v3728_v45 = vand.u32 127, %v228_v43 }
  0x20   :  { %207 = vmatpush.bf16.msra.mxu3 %v3201_v9  ;;  %v3197_v34 = vor.u32 %v3349_v33, %v3196_v32  ;;  %v3609_v3 = vmov 2102212464   ;;  %v3610_v8 = vmov 683565275   ;;  %v4662_v32 = vmov 1326507024  }
  0x21   :  { %3207 = vmatmul.msk.bf16.vlgmr.msra.gmra.mxu1 %vm154_vm0, %v3679_v5  ;;  %v235_v46 = vsub.s32 %v3726_v44, %v3728_v45  ;;  %s243_s27 = sld [smem:[#allocation3]]  ;;  %s3166_s9 = sshll.u32 %s4660_s7, 4  ;;  %s3167_s9 = int_to_ptr.hbm [resolvable:$true] %s3166_s9 }
  0x22   :  { %3206 = vmatmul.msk.bf16.vlgmr.msra.gmra.mxu0 %vm154_vm0, %v3679_v5  ;;  %193 = vmatpush.bf16.msra.mxu2 %v3197_v34  ;;  %s3215_s28 = sld [smem:[#allocation3 + $0x100]]  ;;  %s3619_s10 = smov 8  }
  0x23   :  { %3209 = vmatmul.msk.bf16.vlgmr.msra.gmra.mxu3 %vm154_vm0, %v3679_v5  ;;  %v3212_v49 = vcvt.s32.f32 %v235_v46  ;;  %vm236_vm3 = vcmp.gt.s32.totalorder %v235_v46, 0  ;;  %s242_s11 = ssub.f32 1.0, %s4653_s0 }
  0x24   :  { %v246_v52 = vstv %s3214_s26  ;;  %s3226_s12 = sld [smem:[#allocation3 + $0x1]] }
  0x25   :  { %3208 = vmatmul.msk.bf16.vlgmr.msra.gmra.mxu2 %vm154_vm0, %v3679_v5  ;;  %v3732_v51 = vsel %vm236_vm3, %v3212_v49, 0.0  ;;  %s3986_s13 = sld [smem:[#allocation3 + $0x101]] }
  0x26   :  { %v3735_v53 = vmul.f32 %v3732_v51, %v246_v52  ;;  %s3258_s3 = sld [smem:[#allocation3 + $0x82]] }
  0x27   :  { %s3280_s15 = sld [smem:[#allocation3 + $0x83]] }
  0x28   :  { %v251_v54 = vand.u32 2139095040, %v3735_v53  ;;  %v248_v2 = vand.u32 2147483647, %v3735_v53  ;;  %vm250_vm3 = vcmp.lt.s32.totalorder %v3735_v53, 0  ;;  %s405_s29 = ssub.f32 1.0, %s3215_s28 }
  0x29   :  { %s3257_s16 = sld [smem:[#allocation3 + $0x2]] }
  0x2a   :  { %v252_v55 = vshrl.u32 %v251_v54, 23  ;;  %v255_v6 = vand.u32 8388607, %v248_v2  ;;  %s4250_s17 = sld [smem:[#allocation3 + $0x102]] }
  0x2b   :  { %s861_s14 = ssub.f32 1.0, %s3986_s13 }
  0x2c   :  { %v3216_v56 = vadd.s32 4294967169, %v252_v55  ;;  %s4253_s18 = sld [smem:[#allocation3 + $0x84]] }
  0x2d   :  { %s4305_s1 = sld [smem:[#allocation3 + $0x85]] }
  0x2e   :  { %v258_v59 = vadd.s32 1, %v3216_v56  ;;  %s3279_s20 = sld [smem:[#allocation3 + $0x3]] }
  0x2f   :  { %s4538_s21 = sld [smem:[#allocation3 + $0x103]] }
  0x30   :  { %vm259_vm4 = vcmp.gt.s32.totalorder %v258_v59, 0  ;;  %s4569_s23 = sld [smem:[#allocation3 + $0x4]] }
  0x31   :  { %v260_v62 = vsel %vm259_vm4, %v258_v59, 0  ;;  %vm3807_vm4 = vcmp.le.f32.partialorder %v248_v2, 0.7853982  ;;  %s4579_s2 = sld [smem:[#allocation3 + $0x104]] }
  0x32   :  { %v262_v63 = vand.u32 31, %v260_v62  ;;  %v3748_v7 = vshrl.u32 %v260_v62, 5  ;;  %s4598_s25 = sld [smem:[#allocation3 + $0x5]] }
  0x34   :  { %v3742_v1 = vsub.s32 32, %v262_v63  ;;  %v274_v4 = vshll.u32 %v3609_v3, %v262_v63  ;;  %v265_v9 = vshll.u32 %v3610_v8, %v262_v63  ;;  %vm280_vm5 = vcmp.lt.s32.totalorder %v3748_v7, 1 }
  0x35   :  { %vm282_vm6 = vcmp.lt.s32.totalorder %v3748_v7, 3  ;;  %vm281_vm7 = vcmp.lt.s32.totalorder %v3748_v7, 2  ;;  %vm283_vm8 = vcmp.lt.s32.totalorder %v3748_v7, 4  ;;  %s1862_s22 = ssub.f32 1.0, %s4538_s21 }
  0x36   :  { %v278_v33 = vshrl.u32 %v4662_v32, %v3742_v1 }
  0x37   :  { %s2350_s24 = ssub.f32 1.0, %s4579_s2 }
  0x9e   :  { %v181_v12 = vpop.f32.mrf.mxu1 }
  0x9f   :  { %v182_v13 = vadd.f32 %v181_v12, %v114_v11  ;;  %v167_v19 = vpop.f32.mrf.mxu0 }
  0xa0   :  { %v168_v20 = vadd.f32 %v167_v19, %v113_v18  ;;  %v272_v19 = vshrl.u32 %v3609_v3, %v3742_v1 }
  0xa1   :  { %v3690_v14 = vpack.c.bf16 %v182_v13, %v182_v13 }
  0xa2   :  { %v3701_v21 = vpack.c.bf16 %v168_v20, %v168_v20  ;;  %v256_v20 = vor.u32 8388608, %v255_v6 }
  0xa3   :  { %574 = vrot.lane.b32.xlu0 %v3690_v14, %s3603_s19 }
  0xa6   :  { %v183_v15 = vpop.f32.mrf.mxu1  ;;  %v209_v29 = vpop.f32.mrf.mxu3 }
  0xa7   :  { %v184_v16 = vadd.f32 %v183_v15, %v114_v11  ;;  %v169_v25 = vpop.f32.mrf.mxu0  ;;  %v3714_v31 = vadd.f32 %v209_v29, %v116_v30  ;;  %v3611_v11 = vmov 2475754826   ;;  %v3612_v15 = vmov 2131351028  }
  0xa8   :  { %v170_v27 = vadd.f32 %v169_v25, %v113_v18  ;;  %v266_v12 = vshrl.u32 %v3611_v11, %v3742_v1  ;;  %v268_v13 = vshll.u32 %v3611_v11, %v262_v63  ;;  %v271_v18 = vshll.u32 %v3612_v15, %v262_v63 }
  0xa9   :  { %v3694_v17 = vpack.c.bf16 %v184_v16, %v184_v16  ;;  %629 = vmatpush.msrb.mxu2 %v3714_v31  ;;  %v269_v16 = vshrl.u32 %v3612_v15, %v3742_v1 }
  0xaa   :  { %v3709_v28 = vpack.c.bf16 %v170_v27, %v170_v27  ;;  %v273_v27 = vor.u32 %v272_v19, %v271_v18  ;;  %v3615_v18 = vmov 0  }
  0xab   :  { %637 = vrot.lane.b32.xlu0 %v3694_v17, %s3603_s19 }
  0xae   :  { %v211_v35 = vpop.f32.mrf.mxu3 }
  0xaf   :  { %v3717_v36 = vadd.f32 %v211_v35, %v116_v30 }
  0xb1   :  { %689 = vmatpush.msra.mxu2 %v3717_v36 }
  0xb3   :  { %1092 = vrot.lane.b32.xlu0 %v3694_v17, %s3607_s4 }
  0xbb   :  { %1026 = vrot.lane.b32.xlu0 %v3701_v21, %s3608_s5 }
 0x115   :  { %v575_v22 = vpop.permute.xlu0 %574 }
 0x116   :  { %v581_v23 = vsel %vm576_vm1, %v575_v22, 0  ;;  %v267_v22 = vor.u32 %v266_v12, %v265_v9 }
 0x117   :  { %590 = vmatpush.bf16.xpose.msrb.mxu1 %v581_v23  ;;  %v3613_v23 = vmov 920167782  }
 0x118   :  { %v277_v25 = vshll.u32 %v3613_v23, %v262_v63 }
 0x11d   :  { %v638_v24 = vpop.permute.xlu0 %637 }
 0x11e   :  { %3222 = vmatmul.msk.bf16.vlgmr.msrb.gmra.mxu1 %vm576_vm1, %v3701_v21  ;;  %v643_v26 = vsel %vm576_vm1, %v638_v24, 0  ;;  %v275_v24 = vshrl.u32 %v3613_v23, %v3742_v1 }
 0x11f   :  { %652 = vmatpush.bf16.xpose.msrb.mxu3 %v643_v26  ;;  %v270_v26 = vor.u32 %v269_v16, %v268_v13 }
 0x120   :  { %v276_v30 = vor.u32 %v275_v24, %v274_v4 }
 0x121   :  { %v288_v35 = vsel %vm280_vm5, %v267_v22, %v270_v26 }
 0x126   :  { %3224 = vmatmul.msk.bf16.vlgmr.msrb.gmra.mxu3 %vm576_vm1, %v3709_v28 }
 0x19b   :  { %v592_v37 = vpop.f32.mrf.mxu1 }
 0x19c   :  { %v597_v38 = vsel %vm596_vm2, %v592_v37, -inf }
 0x19d   :  { %598 = vmax.xlane.f32.xlu1 %v597_v38  ;;  %v289_v38 = vsel %vm283_vm8, %v276_v30, 920167782 }
 0x1a3   :  { %v594_v39 = vpop.f32.mrf.mxu1 }
 0x1a4   :  { %v296_v39 = vshll.u32 %v256_v20, 8 }
 0x1a6   :  { %v297_v46 = vand.u32 65535, %v296_v39 }
 0x1a9   :  { %v654_v40 = vpop.f32.mrf.mxu3 }
 0x1aa   :  { %v658_v41 = vsel %vm596_vm2, %v654_v40, -inf }
 0x1ab   :  { %659 = vmax.xlane.f32.xlu1 %v658_v41  ;;  %v292_v41 = vsel %vm280_vm5, %v270_v26, %v273_v27 }
 0x1b1   :  { %v656_v42 = vpop.f32.mrf.mxu3 }
 0x1c4   :  { %1090 = vrot.lane.b32.xlu1 %v3709_v28, %s3608_s5 }
 0x210   :  { %v599_v47 = vpop.xlane.xlu1 %598 }
 0x211   :  { %v600_v48 = vsub.f32 %v592_v37, %v599_v47  ;;  %v279_v37 = vor.u32 %v278_v33, %v277_v25  ;;  %v298_v47 = vshrl.u32 %v296_v39, 16  ;;  %v264_v25 = vshrl.u32 %v3610_v8, %v3742_v1 }
 0x213   :  { %v601_v50 = vmul.f32 1.442695, %v600_v48  ;;  %v293_v43 = vsel %vm283_vm8, %v279_v37, 1326507024 }
 0x214   :  { %v294_v48 = vsel %vm282_vm6, %v276_v30, %v293_v43 }
 0x215   :  { %3396 = vpow2.f32 %v601_v50  ;;  %v295_v52 = vsel %vm281_vm7, %v292_v41, %v294_v48 }
 0x216   :  { %v299_v54 = vand.u32 65535, %v295_v52  ;;  %v300_v55 = vshrl.u32 %v295_v52, 16 }
 0x218   :  { %v303_v62 = vmul.u32 %v299_v54, %v298_v47  ;;  %v304_v6 = vmul.u32 %v300_v55, %v298_v47 }
 0x21a   :  { %v307_v12 = vshll.u32 %v303_v62, 16 }
 0x21b   :  { %v3738_v57 = vpop.eup %3396 }
 0x21c   :  { %v603_v58 = vsel %vm596_vm2, %v3738_v57, 0.0 }
 0x21d   :  { %604 = vadd.xlane.f32.xlu2 %v603_v58 }
 0x21e   :  { %v660_v60 = vpop.xlane.xlu1 %659 }
 0x21f   :  { %v661_v61 = vsub.f32 %v654_v40, %v660_v60  ;;  %v290_v40 = vsel %vm282_vm6, %v273_v27, %v289_v38  ;;  %v301_v60 = vmul.u32 %v299_v54, %v297_v46 }
 0x220   :  { %v291_v42 = vsel %vm281_vm7, %v288_v35, %v290_v40  ;;  %v284_v40 = vsel %vm280_vm5, %v264_v25, %v267_v22 }
 0x221   :  { %v662_v0 = vmul.f32 1.442695, %v661_v61  ;;  %v321_v49 = vand.u32 65535, %v291_v42  ;;  %v322_v50 = vshrl.u32 %v291_v42, 16  ;;  %v302_v61 = vmul.u32 %v300_v55, %v297_v46 }
 0x222   :  { %v308_v42 = vshrl.u32 %v303_v62, 16 }
 0x223   :  { %3398 = vpow2.f32 %v662_v0  ;;  %v324_v56 = vmul.u32 %v322_v50, %v297_v46  ;;  %v323_v58 = vmul.u32 %v321_v49, %v297_v46  ;;  %v325_v59 = vmul.u32 %v321_v49, %v298_v47 }
 0x224   :  { %v326_v63 = vmul.u32 %v322_v50, %v298_v47  ;;  %v305_v9 = vshll.u32 %v302_v61, 16  ;;  %v306_v30 = vshrl.u32 %v302_v61, 16 }
 0x225   :  { %v327_v0 = vshll.u32 %v324_v56, 16  ;;  %v329_v4 = vshll.u32 %v325_v59, 16  ;;  %v328_v37 = vshrl.u32 %v324_v56, 16  ;;  %v330_v1 = vshrl.u32 %v325_v59, 16 }
 0x226   :  { %vm309_vm10 = vc.u32 %v301_v60, %v305_v9  ;;  %v311_v16 = vadd.s32 %v305_v9, %v301_v60 }
 0x227   :  { %vm331_vm9 = vc.u32 %v323_v58, %v327_v0  ;;  %v333_v13 = vadd.s32 %v327_v0, %v323_v58  ;;  %v310_v20 = vsel %vm309_vm10, 1, %v3615_v18 }
 0x228   :  { %v332_v19 = vsel %vm331_vm9, 1, %v3615_v18  ;;  %v312_v33 = vadd.s32 %v310_v20, %v304_v6  ;;  %vm313_vm12 = vc.u32 %v311_v16, %v307_v12 }
 0x229   :  { %v3763_v29 = vpop.eup %3398  ;;  %v334_v24 = vadd.s32 %v332_v19, %v326_v63  ;;  %vm335_vm11 = vc.u32 %v333_v13, %v329_v4  ;;  %v314_v35 = vsel %vm313_vm12, 1, %v3615_v18  ;;  %v337_v48 = vadd.s32 %v333_v13, %v329_v4 }
 0x22a   :  { %v664_v34 = vsel %vm596_vm2, %v3763_v29, 0.0  ;;  %v336_v38 = vsel %vm335_vm11, 1, %v3615_v18  ;;  %v316_v43 = vadd.s32 %v314_v35, %v312_v33  ;;  %vm391_vm11 = vweird.f32 %v3735_v53 }
 0x22b   :  { %665 = vadd.xlane.f32.xlu2 %v664_v34  ;;  %v285_v34 = vsel %vm283_vm8, %v273_v27, 2102212464  ;;  %v338_v46 = vadd.s32 %v336_v38, %v334_v24  ;;  %v563_v33 = vstv %s4653_s0  ;;  %s3227_s0 = sld [smem:[#allocation3 + $0x81]] }
 0x22c   :  { %v286_v41 = vsel %vm282_vm6, %v270_v26, %v285_v34  ;;  %v317_v47 = vadd.s32 %v316_v43, %v306_v30 }
 0x22d   :  { %v287_v27 = vsel %vm281_vm7, %v284_v40, %v286_v41  ;;  %v339_v49 = vadd.s32 %v338_v46, %v328_v37 }
 0x22e   :  { %v318_v50 = vadd.s32 %v317_v47, %v308_v42  ;;  %v341_v54 = vmul.u32 %v296_v39, %v287_v27 }
 0x22f   :  { %v340_v52 = vadd.s32 %v339_v49, %v330_v1 }
 0x230   :  { %vm343_vm13 = vc.u32 %v318_v50, %v337_v48  ;;  %v342_v0 = vadd.s32 %v337_v48, %v318_v50  ;;  %v3204_v50 = vld [vmem:[#allocation8 + $0x10] sm:$0xf] }
 0x231   :  { %v344_v55 = vadd.s32 1, %v340_v52 }
 0x233   :  { %v345_v22 = vsel %vm343_vm13, %v344_v55, %v340_v52  ;;  %v3350_v52 = vld [vmem:[#allocation8 + $0x20] sm:$0xf0] }
 0x234   :  { %v346_v26 = vadd.s32 %v345_v22, %v341_v54  ;;  %v3205_v54 = vor.u32 %v3350_v52, %v3204_v50 }
 0x236   :  { %v347_v56 = vadd.s32 536870912, %v346_v26  ;;  %221 = vmatpush.bf16.msrb.mxu0 %v3205_v54 }
 0x238   :  { %v348_v58 = vshrl.u32 %v347_v56, 30 }
 0x239   :  { %3210 = vmatmul.msk.bf16.vlgmr.msrb.gmra.mxu0 %vm154_vm0, %v3679_v5  ;;  %vm232_vm0 = vcmp.gt.s32.totalorder %v3726_v44, %v3728_v45 }
 0x23a   :  { %v349_v59 = vshll.u32 %v348_v58, 30  ;;  %v372_v46 = vsub.s32 4, %v348_v58 }
 0x23c   :  { %v350_v60 = vsub.s32 %v346_v26, %v349_v59  ;;  %v373_v27 = vsel %vm250_vm3, %v372_v46, %v348_v58  ;;  %v1093_v46 = vpop.permute.xlu0 %1092 }
 0x23d   :  { %v375_v55 = vsel %vm3807_vm4, 0, %v373_v27 }
 0x23e   :  { %vm351_vm14 = vcmp.lt.s32.totalorder %v350_v60, 0  ;;  %v352_v61 = vsub.s32 0, %v350_v60  ;;  %v392_v56 = vadd.s32 3, %v375_v55 }
 0x240   :  { %v353_v62 = vsel %vm351_vm14, %v352_v61, %v350_v60  ;;  %v565_v61 = vstv %s243_s27  ;;  %v393_v58 = vand.u32 3, %v392_v56  ;;  %v195_v56 = vpop.f32.mrf.mxu2 }
 0x241   :  { %v354_v7 = vclz %v353_v62  ;;  %v550_v62 = vand.u32 3, %v375_v55 }
 0x242   :  { %vm395_vm5 = vcmp.eq.s32.totalorder %v393_v58, 0  ;;  %vm398_vm6 = vcmp.eq.s32.totalorder %v393_v58, 2  ;;  %vm394_vm9 = vcmp.lt.s32.totalorder %v393_v58, 2  ;;  %v117_v58 = vperm.slane %v3685_v10, 4 }
 0x243   :  { %1028 = vrot.lane.b32.xlu2 %v3690_v14, %s3607_s4  ;;  %v3217_v63 = vadd.s32 4294967294, %v354_v7  ;;  %v566_v7 = vmul.f32 %v3732_v51, %v565_v61  ;;  %vm552_vm7 = vcmp.eq.s32.totalorder %v550_v62, 0  ;;  %vm555_vm8 = vcmp.eq.s32.totalorder %v550_v62, 2 }
 0x244   :  { %vm551_vm10 = vcmp.lt.s32.totalorder %v550_v62, 2  ;;  %v1027_v55 = vpop.permute.xlu0 %1026 }
 0x245   :  { %vm3218_vm15 = vcmp.lt.s32.totalorder %v3217_v63, 0 }
 0x246   :  { %v357_v4 = vsel %vm3218_vm15, 0, %v3217_v63 }
 0x247   :  { %v358_v39 = vsub.s32 32, %v357_v4  ;;  %v359_v6 = vshll.u32 %v350_v60, %v357_v4  ;;  %v362_v9 = vsub.s32 4294967266, %v357_v4  ;;  %v567_v4 = vmul.f32 1.442695, %v566_v7 }
 0x249   :  { %v360_v12 = vshrl.u32 %v342_v0, %v358_v39  ;;  %v363_v13 = vadd.s32 127, %v362_v9  ;;  %3400 = vpow2.f32 %v567_v4 }
 0x24b   :  { %v361_v16 = vor.u32 %v360_v12, %v359_v6  ;;  %v364_v19 = vshll.u32 %v363_v13, 23 }
 0x24d   :  { %v365_v20 = vor.u32 4788187, %v364_v19  ;;  %v368_v24 = vcvt.s32.f32 %v361_v16  ;;  %v3616_v16 = vmov 0.0  }
 0x24e   :  { %v3211_v19 = vsel %vm232_vm0, 1.0, %v3616_v16 }
 0x24f   :  { %v366_v25 = vand.u32 2147483647, %v365_v20  ;;  %v403_v20 = vstv %s3215_s28  ;;  %v3825_v44 = vmul.f32 %v3211_v19, %v563_v33  ;;  %v3401_v45 = vpop.eup %3400  ;;  %s3617_s28 = smov [#allocation13]  }
 0x251   :  { %v369_v30 = vmul.f32 %v368_v24, %v366_v25 }
 0x253   :  { %v370_v34 = vxor.u32 2147483648, %v369_v30 }
 0x255   :  { %v371_v35 = vsel %vm250_vm3, %v370_v34, %v369_v30  ;;  %v560_v30 = vstv %s405_s29  ;;  %s3164_s29 = sshll.u32 %s3617_s28, 4  ;;  %s3165_s29 = int_to_ptr.vmem [resolvable:$true] %s3164_s29 }
 0x256   :  { %v374_v37 = vsel %vm3807_vm4, %v3735_v53, %v371_v35 }
 0x257   :  { %v376_v38 = vmul.f32 %v374_v37, %v374_v37 }
 0x259   :  { %v384_v40 = vmul.f32 -0.00019511016, %v376_v38  ;;  %v377_v41 = vmul.f32 -0.001358992, %v376_v38 }
 0x25b   :  { %v385_v42 = vadd.f32 0.008332121, %v384_v40  ;;  %v378_v43 = vadd.f32 0.041655596, %v377_v41  ;;  %v3831_v41 = vstv %s242_s11 }
 0x25d   :  { %v386_v1 = vmul.f32 %v385_v42, %v376_v38  ;;  %v379_v47 = vmul.f32 %v378_v43, %v376_v38 }
 0x25f   :  { %v387_v48 = vadd.f32 -0.16666654, %v386_v1  ;;  %v380_v2 = vadd.f32 -0.4999988, %v379_v47 }
 0x261   :  { %v388_v49 = vmul.f32 %v387_v48, %v376_v38  ;;  %v381_v22 = vmul.f32 %v380_v2, %v376_v38  ;;  %v569_v38 = vmul.f32 %v3401_v45, %v3825_v44  ;;  %v1098_v48 = vsel %vm576_vm1, %v1093_v46, 0 }
 0x263   :  { %v389_v26 = vadd.f32 1.0, %v388_v49  ;;  %v382_v59 = vadd.f32 1.0, %v381_v22  ;;  %v1091_v22 = vpop.permute.xlu1 %1090 }
 0x265   :  { %v390_v60 = vmul.f32 %v389_v26, %v374_v37  ;;  %v399_v0 = vxor.u32 2147483648, %v382_v59  ;;  %v115_v26 = vperm.slane %v3685_v10, 2 }
 0x267   :  { %v396_v63 = vxor.u32 2147483648, %v390_v60  ;;  %v400_v6 = vsel %vm398_vm6, %v399_v0, %v390_v60  ;;  %v557_v9 = vsel %vm555_vm8, %v399_v0, %v390_v60 }
 0x269   :  { %v397_v39 = vsel %vm395_vm5, %v382_v59, %v396_v63  ;;  %v554_v5 = vsel %vm552_vm7, %v382_v59, %v396_v63  ;;  %v3857_v63 = vpop.f32.mrf.mxu2 }
 0x26a   :  { %v401_v12 = vsel %vm394_vm9, %v397_v39, %v400_v6  ;;  %v558_v13 = vsel %vm551_vm10, %v554_v5, %v557_v9 }
 0x26b   :  { %v402_v24 = vsel %vm391_vm11, nan, %v401_v12  ;;  %v559_v25 = vsel %vm391_vm11, nan, %v558_v13 }
 0x26c   :  { %v404_v35 = vmul.f32 %v403_v20, %v402_v24  ;;  %v561_v37 = vmul.f32 %v560_v30, %v559_v25  ;;  %v702_v25 = vstv %s3227_s0 }
 0x26d   :  { %v3878_v30 = vmul.f32 %v3732_v51, %v702_v25 }
 0x26e   :  { %v562_v53 = vadd.f32 %v561_v37, %v404_v35 }
 0x26f   :  { %v707_v33 = vand.u32 2139095040, %v3878_v30  ;;  %vm706_vm0 = vcmp.lt.s32.totalorder %v3878_v30, 0 }
 0x270   :  { %v570_v43 = vmul.f32 %v569_v38, %v562_v53 }
 0x271   :  { %v708_v35 = vshrl.u32 %v707_v33, 23 }
 0x273   :  { %v3229_v53 = vadd.s32 4294967169, %v708_v35 }
 0x290   :  { %v605_v34 = vpop.xlane.xlu2 %604 }
 0x291   :  { %3402 = vrcp.f32 %v605_v34 }
 0x297   :  { %v3403_v40 = vpop.eup %3402 }
 0x298   :  { %v607_v42 = vmul.f32 %v3403_v40, %v3738_v57 }
 0x29a   :  { %v609_v1 = vmul.f32 %v3831_v41, %v607_v42  ;;  %v714_v42 = vadd.s32 1, %v3229_v53 }
 0x29c   :  { %v610_v47 = vadd.f32 %v609_v1, %v570_v43  ;;  %vm715_vm12 = vcmp.gt.s32.totalorder %v714_v42, 0 }
 0x29d   :  { %v716_v46 = vsel %vm715_vm12, %v714_v42, 0 }
 0x29e   :  { %3223 = vmatmul.msk.f32.vlgmr.msrb.gmra.mxu2 %vm596_vm2, %v610_v47  ;;  %v666_v27 = vpop.xlane.xlu2 %665 }
 0x29f   :  { %1107 = vmatpush.bf16.xpose.msrb.mxu2 %v1098_v48  ;;  %3404 = vrcp.f32 %v666_v27  ;;  %v718_v48 = vand.u32 31, %v716_v46 }
 0x2a1   :  { %v3886_v27 = vsub.s32 32, %v718_v48 }
 0x2a5   :  { %v3405_v2 = vpop.eup %3404 }
 0x2a6   :  { %v668_v49 = vmul.f32 %v3405_v2, %v3763_v29  ;;  %v1029_v50 = vpop.permute.xlu2 %1028  ;;  %v196_v29 = vadd.f32 %v195_v56, %v115_v26  ;;  %v704_v2 = vand.u32 2147483647, %v3878_v30 }
 0x2a7   :  { %v1034_v52 = vsel %vm576_vm1, %v1029_v50, 0  ;;  %v731_v50 = vshrl.u32 %v3613_v23, %v3886_v27 }
 0x2a8   :  { %v669_v57 = vmul.f32 %v668_v49, %v3831_v41  ;;  %1043 = vmatpush.bf16.xpose.msra.mxu0 %v1034_v52  ;;  %v3846_v59 = vpack.c.bf16 %v196_v29, %v196_v29  ;;  %v730_v49 = vshll.u32 %v3609_v3, %v718_v48  ;;  %v724_v29 = vshll.u32 %v3611_v11, %v718_v48 }
 0x2a9   :  { %vm3977_vm11 = vcmp.le.f32.partialorder %v704_v2, 0.7853982 }
 0x2aa   :  { %v670_v54 = vadd.f32 %v669_v57, %v570_v43  ;;  %v1549_v61 = vsel %vm576_vm1, %v3846_v59, 0  ;;  %v711_v57 = vand.u32 8388607, %v704_v2 }
 0x2ac   :  { %3225 = vmatmul.msk.f32.vlgmr.msra.gmra.mxu2 %vm596_vm2, %v670_v54  ;;  %v3896_v54 = vshrl.u32 %v716_v46, 5 }
 0x2ae   :  { %vm736_vm13 = vcmp.lt.s32.totalorder %v3896_v54, 1  ;;  %vm737_vm14 = vcmp.lt.s32.totalorder %v3896_v54, 2  ;;  %vm738_vm15 = vcmp.lt.s32.totalorder %v3896_v54, 3  ;;  %vm739_vm3 = vcmp.lt.s32.totalorder %v3896_v54, 4 }
 0x2af   :  { %3235 = vmatmul.msk.bf16.vlgmr.msra.gmra.mxu0 %vm576_vm1, %v1027_v55  ;;  %v721_v55 = vshll.u32 %v3610_v8, %v718_v48 }
 0x2b0   :  { %1558 = vmatpush.bf16.xpose.msrb.mxu0 %v1549_v61  ;;  %v725_v61 = vshrl.u32 %v3612_v15, %v3886_v27 }
 0x2b4   :  { %3237 = vmatmul.msk.bf16.vlgmr.msrb.gmra.mxu2 %vm576_vm1, %v1091_v22  ;;  %v722_v22 = vshrl.u32 %v3611_v11, %v3886_v27 }
 0x2b6   :  { %v3848_v60 = vpop.f32.mrf.mxu0 }
 0x2be   :  { %v225_v62 = vpop.f32.mrf.mxu0 }
 0x2bf   :  { %v3855_v7 = vadd.f32 %v225_v62, %v117_v58  ;;  %v727_v62 = vshll.u32 %v3612_v15, %v718_v48 }
 0x321   :  { %v3859_v0 = vpop.f32.mrf.mxu2 }
 0x32c   :  { %v1045_v4 = vpop.f32.mrf.mxu0 }
 0x32d   :  { %v1049_v39 = vsel %vm596_vm2, %v1045_v4, -inf }
 0x32e   :  { %1050 = vmax.xlane.f32.xlu2 %v1049_v39  ;;  %v723_v39 = vor.u32 %v722_v22, %v721_v55 }
 0x32f   :  { %v3862_v6 = vpop.f32.mrf.mxu2 }
 0x330   :  { %v694_v5 = vpack.c.bf16 %v3862_v6, %v3859_v0 }
 0x334   :  { %v1047_v9 = vpop.f32.mrf.mxu0 }
 0x335   :  { %v728_v9 = vshrl.u32 %v3609_v3, %v3886_v27 }
 0x337   :  { %v1109_v12 = vpop.f32.mrf.mxu2 }
 0x338   :  { %v1113_v13 = vsel %vm596_vm2, %v1109_v12, -inf }
 0x339   :  { %1114 = vmax.xlane.f32.xlu0 %v1113_v13  ;;  %v726_v13 = vor.u32 %v725_v61, %v724_v29 }
 0x33b   :  { %v744_v25 = vsel %vm736_vm13, %v723_v39, %v726_v13 }
 0x33f   :  { %v1111_v16 = vpop.f32.mrf.mxu2 }
 0x340   :  { %v733_v16 = vshll.u32 %v3613_v23, %v718_v48 }
 0x346   :  { %1127 = vrot.lane.b32.xlu2 %v3717_v36, %s3608_s5 }
 0x34e   :  { %2029 = vrot.lane.b32.xlu2 %v3846_v59, %s3608_s5 }
 0x356   :  { %2089 = vrot.lane.b32.xlu2 %v3709_v28, %s3607_s4 }
 0x35e   :  { %2992 = vrot.lane.b32.xlu2 %v3846_v59, %s3607_s4 }
 0x366   :  { %3053 = vrot.lane.b32.xlu2 %v3694_v17, %s3608_s5 }
 0x3a1   :  { %v1051_v19 = vpop.xlane.xlu2 %1050 }
 0x3a2   :  { %v1052_v20 = vsub.f32 %v1045_v4, %v1051_v19  ;;  %v712_v4 = vor.u32 8388608, %v711_v57  ;;  %v734_v19 = vshrl.u32 %v4662_v32, %v3886_v27 }
 0x3a4   :  { %v1053_v24 = vmul.f32 1.442695, %v1052_v20  ;;  %v729_v20 = vor.u32 %v728_v9, %v727_v62 }
 0x3a6   :  { %3406 = vpow2.f32 %v1053_v24  ;;  %v735_v24 = vor.u32 %v734_v19, %v733_v16 }
 0x3a9   :  { %v1128_v34 = vpop.permute.xlu2 %1127 }
 0x3aa   :  { %1148 = vmatpush.msra.mxu3 %v1128_v34  ;;  %v3920_v34 = vshll.u32 %v712_v4, 8 }
 0x3ac   :  { %v3881_v37 = vpop.eup %3406  ;;  %v1115_v45 = vpop.xlane.xlu0 %1114 }
 0x3ad   :  { %v1116_v38 = vsub.f32 %v1109_v12, %v1115_v45  ;;  %v1055_v40 = vsel %vm596_vm2, %v3881_v37, 0.0  ;;  %v732_v12 = vor.u32 %v731_v50, %v730_v49  ;;  %v748_v45 = vsel %vm736_vm13, %v726_v13, %v729_v20 }
 0x3ae   :  { %1056 = vadd.xlane.f32.xlu0 %v1055_v40  ;;  %v753_v40 = vand.u32 65535, %v3920_v34 }
 0x3af   :  { %v1117_v43 = vmul.f32 1.442695, %v1116_v38  ;;  %v745_v33 = vsel %vm739_vm3, %v732_v12, 920167782  ;;  %v749_v38 = vsel %vm739_vm3, %v735_v24, 1326507024 }
 0x3b0   :  { %v746_v35 = vsel %vm738_vm15, %v729_v20, %v745_v33  ;;  %v750_v42 = vsel %vm738_vm15, %v732_v12, %v749_v38  ;;  %v720_v38 = vshrl.u32 %v3610_v8, %v3886_v27 }
 0x3b1   :  { %3408 = vpow2.f32 %v1117_v43  ;;  %v2030_v1 = vpop.permute.xlu2 %2029  ;;  %v747_v53 = vsel %vm737_vm14, %v744_v25, %v746_v35  ;;  %v754_v43 = vshrl.u32 %v3920_v34, 16 }
 0x3b2   :  { %v2035_v47 = vsel %vm576_vm1, %v2030_v1, 0  ;;  %v777_v1 = vand.u32 65535, %v747_v53  ;;  %v778_v46 = vshrl.u32 %v747_v53, 16 }
 0x3b3   :  { %2044 = vmatpush.bf16.xpose.msra.mxu0 %v2035_v47  ;;  %v751_v47 = vsel %vm737_vm14, %v748_v45, %v750_v42 }
 0x3b4   :  { %v755_v48 = vand.u32 65535, %v751_v47  ;;  %v756_v49 = vshrl.u32 %v751_v47, 16  ;;  %v780_v50 = vmul.u32 %v778_v46, %v753_v40  ;;  %v779_v57 = vmul.u32 %v777_v1, %v753_v40 }
 0x3b5   :  { %v781_v55 = vmul.u32 %v777_v1, %v754_v43  ;;  %v782_v61 = vmul.u32 %v778_v46, %v754_v43  ;;  %v198_v1 = vadd.f32 %v3857_v63, %v115_v26 }
 0x3b6   :  { %v757_v22 = vmul.u32 %v755_v48, %v753_v40  ;;  %v759_v29 = vmul.u32 %v755_v48, %v754_v43  ;;  %v783_v62 = vshll.u32 %v780_v50, 16  ;;  %v760_v9 = vmul.u32 %v756_v49, %v754_v43 }
 0x3b7   :  { %v3892_v52 = vpop.eup %3408  ;;  %v785_v4 = vshll.u32 %v781_v55, 16  ;;  %v784_v43 = vshrl.u32 %v780_v50, 16  ;;  %v786_v48 = vshrl.u32 %v781_v55, 16 }
 0x3b8   :  { %v1119_v56 = vsel %vm596_vm2, %v3892_v52, 0.0  ;;  %v763_v16 = vshll.u32 %v759_v29, 16  ;;  %vm787_vm4 = vc.u32 %v779_v57, %v783_v62  ;;  %v789_v19 = vadd.s32 %v783_v62, %v779_v57 }
 0x3b9   :  { %1120 = vadd.xlane.f32.xlu1 %v1119_v56  ;;  %v758_v56 = vmul.u32 %v756_v49, %v753_v40  ;;  %v788_v25 = vsel %vm787_vm4, 1, %v3615_v18  ;;  %v741_v40 = vsel %vm739_vm3, %v729_v20, 2102212464  ;;  %v764_v49 = vshrl.u32 %v759_v29, 16 }
 0x3ba   :  { %v790_v35 = vadd.s32 %v788_v25, %v782_v61  ;;  %vm791_vm6 = vc.u32 %v789_v19, %v785_v4  ;;  %v742_v46 = vsel %vm738_vm15, %v726_v13, %v741_v40  ;;  %v3957_v61 = vpack.c.bf16 %v198_v1, %v198_v1 }
 0x3bb   :  { %v761_v12 = vshll.u32 %v758_v56, 16  ;;  %v792_v53 = vsel %vm791_vm6, 1, %v3615_v18  ;;  %v762_v42 = vshrl.u32 %v758_v56, 16 }
 0x3bc   :  { %v794_v57 = vadd.s32 %v792_v53, %v790_v35 }
 0x3bd   :  { %vm765_vm5 = vc.u32 %v757_v22, %v761_v12  ;;  %v767_v24 = vadd.s32 %v761_v12, %v757_v22  ;;  %v793_v22 = vadd.s32 %v789_v19, %v785_v4 }
 0x3be   :  { %v766_v33 = vsel %vm765_vm5, 1, %v3615_v18  ;;  %v795_v56 = vadd.s32 %v794_v57, %v784_v43  ;;  %vm847_vm5 = vweird.f32 %v3878_v30 }
 0x3bf   :  { %v768_v45 = vadd.s32 %v766_v33, %v760_v9  ;;  %vm769_vm7 = vc.u32 %v767_v24, %v763_v16 }
 0x3c0   :  { %v770_v47 = vsel %vm769_vm7, 1, %v3615_v18  ;;  %v796_v63 = vadd.s32 %v795_v56, %v786_v48 }
 0x3c1   :  { %v772_v27 = vadd.s32 %v770_v47, %v768_v45 }
 0x3c2   :  { %1063 = vrot.lane.b32.xlu0 %v3714_v31, %s3608_s5 }
 0x3c3   :  { %v773_v50 = vadd.s32 %v772_v27, %v762_v42 }
 0x3c5   :  { %v774_v26 = vadd.s32 %v773_v50, %v764_v49 }
 0x3c7   :  { %vm799_vm8 = vc.u32 %v774_v26, %v793_v22  ;;  %v798_v24 = vadd.s32 %v793_v22, %v774_v26 }
 0x3ca   :  { %1604 = vrot.lane.b32.xlu0 %v3709_v28, %s3603_s19  ;;  %v740_v28 = vsel %vm736_vm13, %v720_v38, %v723_v39  ;;  %v800_v39 = vadd.s32 1, %v796_v63 }
 0x3cb   :  { %v743_v20 = vsel %vm737_vm14, %v740_v28, %v742_v46 }
 0x3cc   :  { %v797_v13 = vmul.u32 %v3920_v34, %v743_v20  ;;  %v801_v55 = vsel %vm799_vm8, %v800_v39, %v796_v63 }
 0x3ce   :  { %v802_v54 = vadd.s32 %v801_v55, %v797_v13 }
 0x3d0   :  { %v803_v29 = vadd.s32 536870912, %v802_v54 }
 0x3d2   :  { %2092 = vrot.lane.b32.xlu0 %v3957_v61, %s3608_s5  ;;  %1543 = vrot.lane.b32.xlu1 %v3701_v21, %s3603_s19  ;;  %v804_v62 = vshrl.u32 %v803_v29, 30 }
 0x3d4   :  { %v805_v4 = vshll.u32 %v804_v62, 30  ;;  %v828_v56 = vsub.s32 4, %v804_v62 }
 0x3d6   :  { %v806_v34 = vsub.s32 %v802_v54, %v805_v4  ;;  %v829_v13 = vsel %vm706_vm0, %v828_v56, %v804_v62 }
 0x3d7   :  { %v831_v55 = vsel %vm3977_vm11, 0, %v829_v13  ;;  %v3354_v13 = vld [vmem:[#allocation11 + $0x18] sm:$0xff] }
 0x3d8   :  { %vm807_vm9 = vcmp.lt.s32.totalorder %v806_v34, 0  ;;  %v808_v9 = vsub.s32 0, %v806_v34  ;;  %v848_v4 = vadd.s32 3, %v831_v55 }
 0x3da   :  { %2571 = vrot.lane.b32.xlu0 %v3957_v61, %s3603_s19  ;;  %2026 = vrot.lane.b32.xlu1 %v3701_v21, %s3607_s4  ;;  %v809_v12 = vsel %vm807_vm9, %v808_v9, %v806_v34 }
 0x3db   :  { %v810_v16 = vclz %v809_v12  ;;  %v1019_v12 = vstv %s3226_s12 }
 0x3dd   :  { %v3230_v19 = vadd.s32 4294967294, %v810_v16  ;;  %v849_v16 = vand.u32 3, %v848_v4 }
 0x3df   :  { %vm3231_vm10 = vcmp.lt.s32.totalorder %v3230_v19, 0  ;;  %vm851_vm12 = vcmp.eq.s32.totalorder %v849_v16, 0  ;;  %vm854_vm13 = vcmp.eq.s32.totalorder %v849_v16, 2  ;;  %vm850_vm3 = vcmp.lt.s32.totalorder %v849_v16, 2 }
 0x3e0   :  { %v813_v25 = vsel %vm3231_vm10, 0, %v3230_v19  ;;  %v1006_v19 = vand.u32 3, %v831_v55 }
 0x3e1   :  { %v814_v33 = vsub.s32 32, %v813_v25  ;;  %v815_v35 = vshll.u32 %v806_v34, %v813_v25  ;;  %v818_v45 = vsub.s32 4294967266, %v813_v25  ;;  %v3352_v25 = vld [vmem:[#allocation11 + $0x8] sm:$0xff] }
 0x3e2   :  { %3055 = vrot.lane.b32.xlu0 %v3957_v61, %s3607_s4  ;;  %2514 = vrot.lane.b32.xlu1 %v3846_v59, %s3603_s19  ;;  %vm1008_vm14 = vcmp.eq.s32.totalorder %v1006_v19, 0  ;;  %vm1011_vm15 = vcmp.eq.s32.totalorder %v1006_v19, 2  ;;  %vm1007_vm4 = vcmp.lt.s32.totalorder %v1006_v19, 2 }
 0x3e3   :  { %v816_v21 = vshrl.u32 %v798_v24, %v814_v33  ;;  %v819_v53 = vadd.s32 127, %v818_v45  ;;  %v1020_v24 = vmul.f32 %v3732_v51, %v1019_v12  ;;  %1208 = vmatpush.bf16.msrb.mxu3 %v3352_v25 }
 0x3e5   :  { %v817_v38 = vor.u32 %v816_v21, %v815_v35  ;;  %v820_v40 = vshll.u32 %v819_v53, 23  ;;  %v3351_v35 = vld [vmem:[#allocation11] sm:$0xff]  ;;  %v1021_v45 = vmul.f32 1.442695, %v1020_v24 }
 0x3e7   :  { %v821_v42 = vor.u32 4788187, %v820_v40  ;;  %v824_v43 = vcvt.s32.f32 %v817_v38  ;;  %1209 = vmatpush.bf16.msrb.mxu3 %v3351_v35  ;;  %3410 = vpow2.f32 %v1021_v45 }
 0x3e9   :  { %v822_v1 = vand.u32 2147483647, %v821_v42 }
 0x3ea   :  { %2990 = vrot.lane.b32.xlu1 %v3690_v14, %s3608_s5 }
 0x3eb   :  { %v825_v46 = vmul.f32 %v824_v43, %v822_v1 }
 0x3ed   :  { %v826_v59 = vxor.u32 2147483648, %v825_v46 }
 0x3ef   :  { %v827_v48 = vsel %vm706_vm0, %v826_v59, %v825_v46  ;;  %v859_v59 = vstv %s3986_s13 }
 0x3f0   :  { %v830_v28 = vsel %vm3977_vm11, %v3878_v30, %v827_v48  ;;  %v1016_v48 = vstv %s861_s14 }
 0x3f1   :  { %v832_v49 = vmul.f32 %v830_v28, %v830_v28 }
 0x3f3   :  { %v840_v27 = vmul.f32 -0.00019511016, %v832_v49  ;;  %v833_v57 = vmul.f32 -0.001358992, %v832_v49 }
 0x3f5   :  { %v841_v20 = vadd.f32 0.008332121, %v840_v27  ;;  %v834_v50 = vadd.f32 0.041655596, %v833_v57 }
 0x3f7   :  { %v842_v22 = vmul.f32 %v841_v20, %v832_v49  ;;  %v835_v26 = vmul.f32 %v834_v50, %v832_v49 }
 0x3f9   :  { %v843_v63 = vadd.f32 -0.16666654, %v842_v22  ;;  %v836_v2 = vadd.f32 -0.4999988, %v835_v26 }
 0x3fb   :  { %v844_v39 = vmul.f32 %v843_v63, %v832_v49  ;;  %v837_v54 = vmul.f32 %v836_v2, %v832_v49 }
 0x3fd   :  { %v845_v29 = vadd.f32 1.0, %v844_v39  ;;  %v838_v34 = vadd.f32 1.0, %v837_v54 }
 0x3ff   :  { %v846_v9 = vmul.f32 %v845_v29, %v830_v28  ;;  %v855_v33 = vxor.u32 2147483648, %v838_v34  ;;  %v3411_v28 = vpop.eup %3410  ;;  %v3353_v29 = vld [vmem:[#allocation11 + $0x10] sm:$0xff] }
 0x400   :  { %v1023_v50 = vmul.f32 %v3411_v28, %v3825_v44 }
 0x401   :  { %v852_v62 = vxor.u32 2147483648, %v846_v9  ;;  %v856_v53 = vsel %vm854_vm13, %v855_v33, %v846_v9  ;;  %v1013_v40 = vsel %vm1011_vm15, %v855_v33, %v846_v9 }
 0x403   :  { %v853_v21 = vsel %vm851_vm12, %v838_v34, %v852_v62  ;;  %v1010_v38 = vsel %vm1008_vm14, %v838_v34, %v852_v62  ;;  %v2090_v34 = vpop.permute.xlu2 %2089 }
 0x404   :  { %v857_v43 = vsel %vm850_vm3, %v853_v21, %v856_v53  ;;  %v1014_v1 = vsel %vm1007_vm4, %v1010_v38, %v1013_v40 }
 0x405   :  { %v858_v46 = vsel %vm847_vm5, nan, %v857_v43  ;;  %v1015_v47 = vsel %vm847_vm5, nan, %v1014_v1 }
 0x406   :  { %v860_v49 = vmul.f32 %v859_v59, %v858_v46  ;;  %v1017_v27 = vmul.f32 %v1016_v48, %v1015_v47 }
 0x408   :  { %v1018_v20 = vadd.f32 %v1017_v27, %v860_v49 }
 0x40a   :  { %v1024_v30 = vmul.f32 %v1023_v50, %v1018_v20 }
 0x40b   :  { %v2993_v12 = vpop.permute.xlu2 %2992 }
 0x40c   :  { %v2998_v24 = vsel %vm576_vm1, %v2993_v12, 0  ;;  %v1703_v12 = vstv %s3280_s15 }
 0x413   :  { %v3054_v28 = vpop.permute.xlu2 %3053 }
 0x421   :  { %v1057_v42 = vpop.xlane.xlu0 %1056 }
 0x422   :  { %3412 = vrcp.f32 %v1057_v42 }
 0x428   :  { %v3413_v57 = vpop.eup %3412 }
 0x429   :  { %v1059_v22 = vmul.f32 %v3413_v57, %v3881_v37  ;;  %v1610_v37 = vsel %vm576_vm1, %v3957_v61, 0 }
 0x42b   :  { %v1060_v26 = vmul.f32 %v1059_v22, %v3831_v41 }
 0x42c   :  { %v1121_v56 = vpop.xlane.xlu1 %1120 }
 0x42d   :  { %3414 = vrcp.f32 %v1121_v56  ;;  %v1061_v2 = vadd.f32 %v1060_v26, %v1024_v30 }
 0x433   :  { %v3415_v63 = vpop.eup %3414 }
 0x434   :  { %v1123_v39 = vmul.f32 %v3415_v63, %v3892_v52  ;;  %v1064_v55 = vpop.permute.xlu0 %1063 }
 0x435   :  { %1084 = vmatpush.msra.mxu1 %v1064_v55  ;;  %v1219_v55 = vstv %s3258_s3 }
 0x436   :  { %v1124_v54 = vmul.f32 %v1123_v39, %v3831_v41  ;;  %3236 = vmatmul.msk.f32.vlgmr.msra.gmra.mxu1 %vm596_vm2, %v1061_v2 }
 0x437   :  { %1179 = vmatpush.bf16.msrb.mxu1 %v3354_v13 }
 0x438   :  { %v1125_v4 = vadd.f32 %v1124_v54, %v1024_v30  ;;  %v4042_v54 = vmul.f32 %v3732_v51, %v1219_v55 }
 0x43a   :  { %3238 = vmatmul.msk.f32.vlgmr.msra.gmra.mxu3 %vm596_vm2, %v1125_v4  ;;  %v1224_v4 = vand.u32 2139095040, %v4042_v54 }
 0x43b   :  { %1180 = vmatpush.bf16.msrb.mxu1 %v3353_v29 }
 0x43c   :  { %v1605_v6 = vpop.permute.xlu0 %1604 }
 0x43f   :  { %1619 = vmatpush.bf16.xpose.msra.mxu1 %v1610_v37 }
 0x442   :  { %3256 = vmatmul.msk.bf16.vlgmr.msrb.gmra.mxu3 %vm576_vm1, %v694_v5 }
 0x444   :  { %v1544_v52 = vpop.permute.xlu1 %1543  ;;  %v2093_v5 = vpop.permute.xlu0 %2092 }
 0x445   :  { %3266 = vmatmul.msk.bf16.vlgmr.msrb.gmra.mxu0 %vm576_vm1, %v1544_v52  ;;  %v2098_v33 = vsel %vm576_vm1, %v2093_v5, 0 }
 0x44c   :  { %v2027_v9 = vpop.permute.xlu1 %2026  ;;  %v2572_v53 = vpop.permute.xlu0 %2571 }
 0x454   :  { %v2515_v16 = vpop.permute.xlu1 %2514  ;;  %v3056_v43 = vpop.permute.xlu0 %3055 }
 0x455   :  { %v2520_v19 = vsel %vm576_vm1, %v2515_v16, 0  ;;  %3288 = vmatmul.msk.bf16.vlgmr.msra.gmra.mxu0 %vm576_vm1, %v2027_v9  ;;  %v3061_v1 = vsel %vm576_vm1, %v3056_v43, 0  ;;  %v1225_v9 = vshrl.u32 %v1224_v4, 23 }
 0x456   :  { %2529 = vmatpush.bf16.xpose.msrb.mxu0 %v2520_v19 }
 0x457   :  { %v3260_v16 = vadd.s32 4294967169, %v1225_v9 }
 0x45c   :  { %v2991_v0 = vpop.permute.xlu1 %2990 }
 0x45e   :  { %3007 = vmatpush.bf16.xpose.msra.mxu0 %v2998_v24  ;;  %v4054_v24 = vmul.f32 %v3732_v51, %v1703_v12 }
 0x460   :  { %v1708_v5 = vand.u32 2139095040, %v4054_v24 }
 0x465   :  { %3310 = vmatmul.msk.bf16.vlgmr.msrb.gmra.mxu0 %vm576_vm1, %v3690_v14  ;;  %v2577_v14 = vsel %vm576_vm1, %v2572_v53, 0 }
 0x475   :  { %3332 = vmatmul.msk.bf16.vlgmr.msra.gmra.mxu0 %vm576_vm1, %v2991_v0 }
 0x4b3   :  { %v1086_v61 = vpop.f32.mrf.mxu1 }
 0x4bd   :  { %v1150_v25 = vpop.f32.mrf.mxu3 }
 0x4be   :  { %v1153_v62 = vpack.c.bf16 %v1150_v25, %v1086_v61 }
 0x4c0   :  { %3247 = vmatmul.msk.bf16.vlgmr.msrb.gmra.mxu1 %vm576_vm1, %v1153_v62  ;;  %v1709_v62 = vshrl.u32 %v1708_v5, 23 }
 0x4c1   :  { %2107 = vmatpush.bf16.xpose.msrb.mxu1 %v2098_v33  ;;  %v1221_v33 = vand.u32 2147483647, %v4042_v54 }
 0x4c2   :  { %v1560_v35 = vpop.f32.mrf.mxu0  ;;  %v3282_v53 = vadd.s32 4294967169, %v1709_v62 }
 0x4c3   :  { %v1564_v45 = vsel %vm596_vm2, %v1560_v35, -inf }
 0x4c4   :  { %1565 = vmax.xlane.f32.xlu1 %v1564_v45 }
 0x4ca   :  { %v1562_v21 = vpop.f32.mrf.mxu0 }
 0x4cb   :  { %v4066_v21 = vpack.i.bf16 %v3717_v36, %v3714_v31 }
 0x4d0   :  { %3268 = vmatmul.msk.bf16.vlgmr.msra.gmra.mxu1 %vm576_vm1, %v1605_v6  ;;  %v1231_v6 = vadd.s32 1, %v3260_v16 }
 0x4d1   :  { %2586 = vmatpush.bf16.xpose.msra.mxu1 %v2577_v14  ;;  %v1228_v14 = vand.u32 8388607, %v1221_v33 }
 0x4d2   :  { %v2046_v38 = vpop.f32.mrf.mxu0  ;;  %vm1232_vm6 = vcmp.gt.s32.totalorder %v1231_v6, 0 }
 0x4d3   :  { %v2050_v40 = vsel %vm596_vm2, %v2046_v38, -inf  ;;  %v1233_v61 = vsel %vm1232_vm6, %v1231_v6, 0 }
 0x4d4   :  { %2051 = vmax.xlane.f32.xlu2 %v2050_v40  ;;  %v4077_v43 = vshrl.u32 %v1233_v61, 5 }
 0x4d6   :  { %vm1253_vm7 = vcmp.lt.s32.totalorder %v4077_v43, 1  ;;  %vm1255_vm8 = vcmp.lt.s32.totalorder %v4077_v43, 3  ;;  %vm1254_vm9 = vcmp.lt.s32.totalorder %v4077_v43, 2  ;;  %vm1256_vm10 = vcmp.lt.s32.totalorder %v4077_v43, 4 }
 0x4da   :  { %v2048_v42 = vpop.f32.mrf.mxu0 }
 0x4e0   :  { %3290 = vmatmul.msk.bf16.vlgmr.msrb.gmra.mxu1 %vm576_vm1, %v2090_v34 }
 0x4e1   :  { %3070 = vmatpush.bf16.xpose.msrb.mxu1 %v3061_v1 }
 0x4e2   :  { %v4020_v46 = vpop.f32.mrf.mxu0 }
 0x4e3   :  { %v2535_v39 = vsel %vm596_vm2, %v4020_v46, -inf }
 0x4ea   :  { %v2533_v59 = vpop.f32.mrf.mxu0 }
 0x4f0   :  { %3312 = vmatmul.msk.bf16.vlgmr.msra.gmra.mxu1 %vm576_vm1, %v3694_v17 }
 0x4f2   :  { %v4024_v47 = vpop.f32.mrf.mxu0 }
 0x4f3   :  { %v3013_v0 = vsel %vm596_vm2, %v4024_v47, -inf }
 0x4fa   :  { %v3011_v48 = vpop.f32.mrf.mxu0 }
 0x4fb   :  { %v1715_v48 = vadd.s32 1, %v3282_v53 }
 0x4fd   :  { %vm1716_vm0 = vcmp.gt.s32.totalorder %v1715_v48, 0 }
 0x4fe   :  { %v1717_v6 = vsel %vm1716_vm0, %v1715_v48, 0 }
 0x500   :  { %3334 = vmatmul.msk.bf16.vlgmr.msrb.gmra.mxu1 %vm576_vm1, %v3054_v28  ;;  %v1229_v28 = vor.u32 8388608, %v1228_v14 }
 0x537   :  { %v1566_v50 = vpop.xlane.xlu1 %1565 }
 0x538   :  { %v1567_v56 = vsub.f32 %v1560_v35, %v1566_v50  ;;  %v1235_v35 = vand.u32 31, %v1233_v61 }
 0x53a   :  { %v1568_v26 = vmul.f32 1.442695, %v1567_v56  ;;  %v1238_v40 = vshll.u32 %v3610_v8, %v1235_v35  ;;  %v1241_v1 = vshll.u32 %v3611_v11, %v1235_v35  ;;  %v1244_v36 = vshll.u32 %v3612_v15, %v1235_v35 }
 0x53d   :  { %v4027_v49 = vpop.f32.mrf.mxu1 }
 0x545   :  { %v4029_v27 = vpop.f32.mrf.mxu1 }
 0x547   :  { %v2052_v57 = vpop.xlane.xlu2 %2051 }
 0x548   :  { %v2053_v20 = vsub.f32 %v2046_v38, %v2052_v57  ;;  %v4070_v38 = vsub.s32 32, %v1235_v35 }
 0x54a   :  { %v2054_v22 = vmul.f32 1.442695, %v2053_v20  ;;  %v1239_v42 = vshrl.u32 %v3611_v11, %v4070_v38  ;;  %v1242_v31 = vshrl.u32 %v3612_v15, %v4070_v38  ;;  %v1245_v20 = vshrl.u32 %v3609_v3, %v4070_v38 }
 0x54b   :  { %v1248_v56 = vshrl.u32 %v3613_v23, %v4070_v38 }
 0x54c   :  { %3416 = vpow2.f32 %v2054_v22  ;;  %v4083_v57 = vor.u32 %v1239_v42, %v1238_v40  ;;  %v4087_v50 = vor.u32 %v1242_v31, %v1241_v1  ;;  %v1247_v22 = vshll.u32 %v3609_v3, %v1235_v35 }
 0x54d   :  { %v4031_v30 = vpop.f32.mrf.mxu1  ;;  %3418 = vpow2.f32 %v1568_v26  ;;  %v1246_v26 = vor.u32 %v1245_v20, %v1244_v36  ;;  %v1719_v42 = vand.u32 31, %v1717_v6 }
 0x54e   :  { %v1625_v17 = vsel %vm596_vm2, %v4031_v30, -inf  ;;  %v1261_v55 = vsel %vm1253_vm7, %v4083_v57, %v4087_v50 }
 0x54f   :  { %1626 = vmax.xlane.f32.xlu0 %v1625_v17  ;;  %v1250_v17 = vshll.u32 %v3613_v23, %v1235_v35 }
 0x552   :  { %v4035_v63 = vpop.eup %3416 }
 0x553   :  { %v2056_v13 = vsel %vm596_vm2, %v4035_v63, 0.0  ;;  %v4044_v29 = vpop.eup %3418 }
 0x554   :  { %2057 = vadd.xlane.f32.xlu2 %v2056_v13  ;;  %v1570_v52 = vsel %vm596_vm2, %v4044_v29, 0.0  ;;  %v1251_v13 = vshrl.u32 %v4662_v32, %v4070_v38 }
 0x555   :  { %v1623_v2 = vpop.f32.mrf.mxu1 }
 0x556   :  { %v1249_v2 = vor.u32 %v1248_v56, %v1247_v22 }
 0x557   :  { %2536 = vmax.xlane.f32.xlu0 %v2535_v39  ;;  %v1252_v39 = vor.u32 %v1251_v13, %v1250_v17  ;;  %v4126_v17 = vsub.s32 32, %v1719_v42 }
 0x558   :  { %v1262_v4 = vsel %vm1256_vm10, %v1249_v2, 920167782 }
 0x559   :  { %v1263_v9 = vsel %vm1255_vm8, %v1246_v26, %v1262_v4  ;;  %v1266_v12 = vsel %vm1256_vm10, %v1252_v39, 1326507024  ;;  %v1731_v4 = vshll.u32 %v3609_v3, %v1719_v42 }
 0x55a   :  { %v1264_v16 = vsel %vm1254_vm9, %v1261_v55, %v1263_v9  ;;  %v4661_v55 = vand.u32 2147483647, %v4054_v24  ;;  %v1237_v9 = vshrl.u32 %v3610_v8, %v4070_v38  ;;  %v1732_v38 = vshrl.u32 %v3613_v23, %v4126_v17 }
 0x55b   :  { %v1294_v14 = vand.u32 65535, %v1264_v16  ;;  %v1295_v40 = vshrl.u32 %v1264_v16, 16 }
 0x55d   :  { %v4047_v37 = vpop.f32.mrf.mxu1 }
 0x55e   :  { %v2113_v34 = vsel %vm596_vm2, %v4047_v37, -inf }
 0x55f   :  { %1571 = vadd.xlane.f32.xlu0 %v1570_v52  ;;  %2114 = vmax.xlane.f32.xlu1 %v2113_v34  ;;  %v1265_v52 = vsel %vm1253_vm7, %v4087_v50, %v1246_v26  ;;  %v4108_v34 = vshll.u32 %v1229_v28, 8 }
 0x561   :  { %v1270_v61 = vand.u32 65535, %v4108_v34  ;;  %v1271_v35 = vshrl.u32 %v4108_v34, 16 }
 0x563   :  { %v1297_v48 = vmul.u32 %v1295_v40, %v1270_v61  ;;  %v1298_v28 = vmul.u32 %v1294_v14, %v1271_v35  ;;  %v1299_v13 = vmul.u32 %v1295_v40, %v1271_v35 }
 0x565   :  { %v2111_v19 = vpop.f32.mrf.mxu1  ;;  %v1302_v16 = vshll.u32 %v1298_v28, 16 }
 0x566   :  { %v1267_v19 = vsel %vm1255_vm8, %v1249_v2, %v1266_v12  ;;  %v1300_v2 = vshll.u32 %v1297_v48, 16 }
 0x567   :  { %3014 = vmax.xlane.f32.xlu1 %v3013_v0  ;;  %v1268_v5 = vsel %vm1254_vm9, %v1265_v52, %v1267_v19 }
 0x568   :  { %v1273_v53 = vshrl.u32 %v1268_v5, 16 }
 0x56a   :  { %v1275_v31 = vmul.u32 %v1273_v53, %v1270_v61  ;;  %v1277_v20 = vmul.u32 %v1273_v53, %v1271_v35 }
 0x56c   :  { %v1278_v22 = vshll.u32 %v1275_v31, 16  ;;  %v1279_v19 = vshrl.u32 %v1275_v31, 16  ;;  %v1734_v31 = vshll.u32 %v3613_v23, %v1719_v42 }
 0x56d   :  { %v4059_v25 = vpop.f32.mrf.mxu1 }
 0x56e   :  { %v2592_v45 = vsel %vm596_vm2, %v4059_v25, -inf }
 0x56f   :  { %2593 = vmax.xlane.f32.xlu2 %v2592_v45  ;;  %v1272_v45 = vand.u32 65535, %v1268_v5 }
 0x571   :  { %v1274_v1 = vmul.u32 %v1272_v45, %v1270_v61  ;;  %v1276_v36 = vmul.u32 %v1272_v45, %v1271_v35 }
 0x573   :  { %3386 = vrot.lane.b32.xlu0 %v4066_v21, %s3603_s19  ;;  %v1280_v56 = vshll.u32 %v1276_v36, 16  ;;  %vm1282_vm11 = vc.u32 %v1274_v1, %v1278_v22  ;;  %v1284_v52 = vadd.s32 %v1278_v22, %v1274_v1  ;;  %v1281_v40 = vshrl.u32 %v1276_v36, 16  ;;  %s1378_s19 = ssub.f32 1.0, %s4250_s17 }
 0x574   :  { %v1283_v12 = vsel %vm1282_vm11, 1, %v3615_v18  ;;  %v1301_v22 = vshrl.u32 %v1297_v48, 16  ;;  %v1722_v36 = vshll.u32 %v3610_v8, %v1719_v42  ;;  %v1725_v48 = vshll.u32 %v3611_v11, %v1719_v42 }
 0x575   :  { %v2590_v59 = vpop.f32.mrf.mxu1  ;;  %v1285_v5 = vadd.s32 %v1283_v12, %v1277_v20  ;;  %vm1286_vm13 = vc.u32 %v1284_v52, %v1280_v56  ;;  %v1735_v20 = vshrl.u32 %v4662_v32, %v4126_v17  ;;  %v1726_v52 = vshrl.u32 %v3612_v15, %v4126_v17 }
 0x576   :  { %v1296_v59 = vmul.u32 %v1294_v14, %v1270_v61  ;;  %v1287_v35 = vsel %vm1286_vm13, 1, %v3615_v18  ;;  %v4137_v14 = vshrl.u32 %v1717_v6, 5  ;;  %v1729_v12 = vshrl.u32 %v3609_v3, %v4126_v17 }
 0x577   :  { %v1289_v1 = vadd.s32 %v1287_v35, %v1285_v5  ;;  %vm1222_vm13 = vcmp.le.f32.partialorder %v1221_v33, 0.7853982 }
 0x578   :  { %vm1304_vm12 = vc.u32 %v1296_v59, %v1300_v2  ;;  %v1306_v45 = vadd.s32 %v1300_v2, %v1296_v59  ;;  %v1303_v2 = vshrl.u32 %v1298_v28, 16  ;;  %v1733_v28 = vor.u32 %v1732_v38, %v1731_v4 }
 0x579   :  { %v1305_v61 = vsel %vm1304_vm12, 1, %v3615_v18  ;;  %v1290_v59 = vadd.s32 %v1289_v1, %v1279_v19  ;;  %vm1740_vm15 = vcmp.lt.s32.totalorder %v4137_v14, 4  ;;  %vm1737_vm4 = vcmp.lt.s32.totalorder %v4137_v14, 1 }
 0x57a   :  { %v1307_v53 = vadd.s32 %v1305_v61, %v1299_v13  ;;  %vm1308_vm14 = vc.u32 %v1306_v45, %v1302_v16  ;;  %v1723_v13 = vshrl.u32 %v3611_v11, %v4126_v17  ;;  %v1736_v61 = vor.u32 %v1735_v20, %v1734_v31 }
 0x57b   :  { %v1309_v56 = vsel %vm1308_vm14, 1, %v3615_v18  ;;  %vm1739_vm5 = vcmp.lt.s32.totalorder %v4137_v14, 3  ;;  %v1746_v4 = vsel %vm1740_vm15, %v1733_v28, 920167782  ;;  %vm1738_vm6 = vcmp.lt.s32.totalorder %v4137_v14, 2 }
 0x57c   :  { %vm1223_vm12 = vcmp.lt.s32.totalorder %v4042_v54, 0 }
 0x57d   :  { %v4118_v0 = vpop.f32.mrf.mxu1 }
 0x57e   :  { %v3076_v62 = vsel %vm596_vm2, %v4118_v0, -inf }
 0x57f   :  { %3077 = vmax.xlane.f32.xlu2 %v3076_v62  ;;  %v1258_v62 = vsel %vm1256_vm10, %v1246_v26, 2102212464  ;;  %v1257_v26 = vsel %vm1253_vm7, %v1237_v9, %v4083_v57  ;;  %v4157_v57 = vadd.s32 %v1290_v59, %v1281_v40  ;;  %v4159_v9 = vadd.s32 %v1306_v45, %v1302_v16 }
 0x580   :  { %v1259_v6 = vsel %vm1255_vm8, %v4087_v50, %v1258_v62  ;;  %v1728_v50 = vshll.u32 %v3612_v15, %v1719_v42  ;;  %v1712_v62 = vand.u32 8388607, %v4661_v55  ;;  %v4172_v42 = vor.u32 %v1723_v13, %v1722_v36 }
 0x581   :  { %v1260_v19 = vsel %vm1254_vm9, %v1257_v26, %v1259_v6  ;;  %vm1316_vm3 = vc.u32 %v4157_v57, %v4159_v9  ;;  %v4174_v45 = vor.u32 %v1726_v52, %v1725_v48 }
 0x582   :  { %v1314_v16 = vmul.u32 %v4108_v34, %v1260_v19  ;;  %v4176_v43 = vor.u32 %v1729_v12, %v1728_v50  ;;  %v1750_v34 = vsel %vm1740_vm15, %v1736_v61, 1326507024  ;;  %v1713_v38 = vor.u32 8388608, %v1712_v62 }
 0x583   :  { %v1745_v31 = vsel %vm1737_vm4, %v4172_v42, %v4174_v45  ;;  %v1751_v26 = vsel %vm1739_vm5, %v1733_v28, %v1750_v34 }
 0x584   :  { %v1747_v20 = vsel %vm1739_vm5, %v4176_v43, %v1746_v4  ;;  %v4200_v59 = vshll.u32 %v1713_v38, 8 }
 0x585   :  { %v3074_v39 = vpop.f32.mrf.mxu1 }
 0x586   :  { %v1311_v39 = vadd.s32 %v1309_v56, %v1307_v53  ;;  %v1748_v56 = vsel %vm1738_vm6, %v1745_v31, %v1747_v20  ;;  %v1755_v12 = vshrl.u32 %v4200_v59, 16 }
 0x587   :  { %v1779_v52 = vshrl.u32 %v1748_v56, 16  ;;  %v1778_v19 = vand.u32 65535, %v1748_v56 }
 0x588   :  { %v1312_v5 = vadd.s32 %v1311_v39, %v1301_v22  ;;  %v1749_v22 = vsel %vm1737_vm4, %v4174_v45, %v4176_v43  ;;  %v1754_v39 = vand.u32 65535, %v4200_v59 }
 0x589   :  { %v1752_v36 = vsel %vm1738_vm6, %v1749_v22, %v1751_v26  ;;  %v1782_v4 = vmul.u32 %v1778_v19, %v1755_v12  ;;  %v1783_v26 = vmul.u32 %v1779_v52, %v1755_v12 }
 0x58a   :  { %v1313_v35 = vadd.s32 %v1312_v5, %v1303_v2  ;;  %v1757_v48 = vshrl.u32 %v1752_v36, 16  ;;  %v1756_v28 = vand.u32 65535, %v1752_v36  ;;  %v1781_v62 = vmul.u32 %v1779_v52, %v1754_v39 }
 0x58c   :  { %v1317_v53 = vadd.s32 1, %v1313_v35  ;;  %v1759_v61 = vmul.u32 %v1757_v48, %v1754_v39  ;;  %v1758_v10 = vmul.u32 %v1756_v28, %v1754_v39  ;;  %v1760_v38 = vmul.u32 %v1756_v28, %v1755_v12 }
 0x58d   :  { %v1761_v56 = vmul.u32 %v1757_v48, %v1755_v12 }
 0x58e   :  { %v1318_v40 = vsel %vm1316_vm3, %v1317_v53, %v1313_v35  ;;  %v1780_v53 = vmul.u32 %v1778_v19, %v1754_v39  ;;  %v1762_v34 = vshll.u32 %v1759_v61, 16  ;;  %v1764_v31 = vshll.u32 %v1760_v38, 16 }
 0x58f   :  { %v1319_v1 = vadd.s32 %v1318_v40, %v1314_v16  ;;  %v1786_v40 = vshll.u32 %v1782_v4, 16 }
 0x590   :  { %vm1766_vm9 = vc.u32 %v1758_v10, %v1762_v34  ;;  %v1768_v20 = vadd.s32 %v1762_v34, %v1758_v10 }
 0x591   :  { %v1320_v6 = vadd.s32 536870912, %v1319_v1  ;;  %v1767_v36 = vsel %vm1766_vm9, 1, %v3615_v18 }
 0x592   :  { %vm1770_vm11 = vc.u32 %v1768_v20, %v1764_v31  ;;  %v1721_v31 = vshrl.u32 %v3610_v8, %v4126_v17  ;;  %v1765_v20 = vshrl.u32 %v1760_v38, 16 }
 0x593   :  { %v4206_v13 = vshrl.u32 %v1320_v6, 30  ;;  %v1315_v6 = vadd.s32 %v4159_v9, %v4157_v57  ;;  %v1771_v52 = vsel %vm1770_vm11, 1, %v3615_v18  ;;  %v1785_v9 = vshrl.u32 %v1781_v62, 16 }
 0x594   :  { %v1741_v17 = vsel %vm1737_vm4, %v1721_v31, %v4172_v42 }
 0x595   :  { %v1322_v2 = vshll.u32 %v4206_v13, 30 }
 0x597   :  { %3391 = vrot.lane.b32.xlu2 %v4066_v21, %s3607_s4  ;;  %v4213_v21 = vadd.f32 %v3848_v60, %v117_v58  ;;  %v1323_v50 = vsub.s32 %v1319_v1, %v1322_v2  ;;  %v1784_v60 = vshll.u32 %v1781_v62, 16  ;;  %v1345_v62 = vsub.s32 4, %v4206_v13  ;;  %s4617_s4 = sld [smem:[#allocation3 + $0x105]] }
 0x599   :  { %vm1324_vm7 = vcmp.lt.s32.totalorder %v1323_v50, 0  ;;  %v1325_v5 = vsub.s32 0, %v1323_v50  ;;  %vm1788_vm10 = vc.u32 %v1780_v53, %v1784_v60  ;;  %v1790_v1 = vadd.s32 %v1784_v60, %v1780_v53 }
 0x59a   :  { %v1789_v2 = vsel %vm1788_vm10, 1, %v3615_v18  ;;  %v1769_v53 = vadd.s32 %v1767_v36, %v1761_v56  ;;  %v1346_v36 = vsel %vm1223_vm12, %v1345_v62, %v4206_v13 }
 0x59b   :  { %v1326_v35 = vsel %vm1324_vm7, %v1325_v5, %v1323_v50  ;;  %vm1792_vm0 = vc.u32 %v1790_v1, %v1786_v40  ;;  %v1791_v28 = vadd.s32 %v1789_v2, %v1783_v26 }
 0x59c   :  { %v1327_v16 = vclz %v1326_v35  ;;  %v1793_v10 = vsel %vm1792_vm0, 1, %v3615_v18  ;;  %v1773_v55 = vadd.s32 %v1771_v52, %v1769_v53  ;;  %v1536_v52 = vstv %s3257_s16 }
 0x59d   :  { %v1795_v48 = vadd.s32 %v1793_v10, %v1791_v28 }
 0x59e   :  { %v3261_v58 = vadd.s32 4294967294, %v1327_v16 }
 0x59f   :  { %3027 = vrot.lane.b32.xlu2 %v4213_v21, %s3608_s5 }
 0x5a0   :  { %vm3262_vm8 = vcmp.lt.s32.totalorder %v3261_v58, 0 }
 0x5a1   :  { %v1330_v22 = vsel %vm3262_vm8, 0, %v3261_v58  ;;  %v1763_v58 = vshrl.u32 %v1759_v61, 16  ;;  %vm1364_vm8 = vweird.f32 %v4042_v54 }
 0x5a2   :  { %v1331_v39 = vsub.s32 32, %v1330_v22  ;;  %v1332_v19 = vshll.u32 %v1323_v50, %v1330_v22  ;;  %v1335_v5 = vsub.s32 4294967266, %v1330_v22  ;;  %v1787_v50 = vshrl.u32 %v1782_v4, 16 }
 0x5a3   :  { %v1796_v22 = vadd.s32 %v1795_v48, %v1785_v9  ;;  %v1774_v56 = vadd.s32 %v1773_v55, %v1763_v58  ;;  %v4241_v55 = vadd.s32 %v1790_v1, %v1786_v40  ;;  %v1537_v58 = vmul.f32 %v3732_v51, %v1536_v52 }
 0x5a4   :  { %v1333_v35 = vshrl.u32 %v1315_v6, %v1331_v39  ;;  %v1336_v16 = vadd.s32 127, %v1335_v5  ;;  %v1742_v6 = vsel %vm1740_vm15, %v4176_v43, 2102212464 }
 0x5a5   :  { %v1797_v4 = vadd.s32 %v1796_v22, %v1787_v50  ;;  %v4239_v43 = vadd.s32 %v1774_v56, %v1765_v20 }
 0x5a6   :  { %v1334_v34 = vor.u32 %v1333_v35, %v1332_v19  ;;  %v1337_v57 = vshll.u32 %v1336_v16, 23  ;;  %v1348_v19 = vsel %vm1222_vm13, 0, %v1346_v36 }
 0x5a7   :  { %v1801_v42 = vadd.s32 1, %v1797_v4  ;;  %vm1800_vm14 = vc.u32 %v4239_v43, %v4241_v55  ;;  %v1365_v1 = vadd.s32 3, %v1348_v19  ;;  %v1523_v48 = vand.u32 3, %v1348_v19 }
 0x5a8   :  { %v1338_v12 = vor.u32 4788187, %v1337_v57  ;;  %v1341_v60 = vcvt.s32.f32 %v1334_v34 }
 0x5a9   :  { %v1802_v13 = vsel %vm1800_vm14, %v1801_v42, %v1797_v4  ;;  %v1366_v9 = vand.u32 3, %v1365_v1  ;;  %vm1528_vm3 = vcmp.eq.s32.totalorder %v1523_v48, 2 }
 0x5aa   :  { %v1339_v32 = vand.u32 2147483647, %v1338_v12 }
 0x5ab   :  { %vm1371_vm15 = vcmp.eq.s32.totalorder %v1366_v9, 2  ;;  %vm1368_vm4 = vcmp.eq.s32.totalorder %v1366_v9, 0  ;;  %vm1367_vm7 = vcmp.lt.s32.totalorder %v1366_v9, 2 }
 0x5ac   :  { %v1342_v26 = vmul.f32 %v1341_v60, %v1339_v32  ;;  %v1743_v32 = vsel %vm1739_vm5, %v4174_v45, %v1742_v6  ;;  %v1538_v6 = vmul.f32 1.442695, %v1537_v58  ;;  %vm1524_vm5 = vcmp.lt.s32.totalorder %v1523_v48, 2 }
 0x5ad   :  { %v1744_v39 = vsel %vm1738_vm6, %v1741_v17, %v1743_v32  ;;  %vm1525_vm6 = vcmp.eq.s32.totalorder %v1523_v48, 0 }
 0x5ae   :  { %v1343_v61 = vxor.u32 2147483648, %v1342_v26  ;;  %v1798_v40 = vmul.u32 %v4200_v59, %v1744_v39  ;;  %3420 = vpow2.f32 %v1538_v6  ;;  %v1376_v39 = vstv %s4250_s17 }
 0x5b0   :  { %v1344_v38 = vsel %vm1223_vm12, %v1343_v61, %v1342_v26  ;;  %v1803_v57 = vadd.s32 %v1802_v13, %v1798_v40 }
 0x5b1   :  { %v1347_v33 = vsel %vm1222_vm13, %v4042_v54, %v1344_v38 }
 0x5b2   :  { %v1349_v2 = vmul.f32 %v1347_v33, %v1347_v33  ;;  %v1804_v31 = vadd.s32 536870912, %v1803_v57 }
 0x5b4   :  { %v1350_v5 = vmul.f32 -0.001358992, %v1349_v2  ;;  %v1357_v28 = vmul.f32 -0.00019511016, %v1349_v2  ;;  %v4258_v4 = vshrl.u32 %v1804_v31, 30 }
 0x5b6   :  { %v1351_v45 = vadd.f32 0.041655596, %v1350_v5  ;;  %v1358_v35 = vadd.f32 0.008332121, %v1357_v28  ;;  %v1533_v28 = vstv %s1378_s19  ;;  %v1806_v1 = vshll.u32 %v4258_v4, 30 }
 0x5b8   :  { %v1352_v53 = vmul.f32 %v1351_v45, %v1349_v2  ;;  %v1359_v10 = vmul.f32 %v1358_v35, %v1349_v2  ;;  %v4274_v48 = vsub.s32 %v1803_v57, %v1806_v1 }
 0x5ba   :  { %v1353_v14 = vadd.f32 -0.4999988, %v1352_v53  ;;  %v1360_v34 = vadd.f32 -0.16666654, %v1359_v10  ;;  %v3421_v53 = vpop.eup %3420  ;;  %vm1808_vm10 = vcmp.lt.s32.totalorder %v4274_v48, 0 }
 0x5bc   :  { %v1354_v12 = vmul.f32 %v1353_v14, %v1349_v2  ;;  %v1361_v60 = vmul.f32 %v1360_v34, %v1349_v2 }
 0x5be   :  { %v1355_v59 = vadd.f32 1.0, %v1354_v12  ;;  %v1362_v50 = vadd.f32 1.0, %v1361_v60  ;;  %v1540_v60 = vmul.f32 %v3421_v53, %v3825_v44 }
 0x5c0   :  { %v1363_v22 = vmul.f32 %v1362_v50, %v1347_v33  ;;  %v1372_v26 = vxor.u32 2147483648, %v1355_v59 }
 0x5c2   :  { %v1627_v16 = vpop.xlane.xlu0 %1626  ;;  %v1369_v62 = vxor.u32 2147483648, %v1363_v22  ;;  %v1373_v61 = vsel %vm1371_vm15, %v1372_v26, %v1363_v22  ;;  %v1530_v17 = vsel %vm1528_vm3, %v1372_v26, %v1363_v22  ;;  %v1809_v26 = vsub.s32 0, %v4274_v48 }
 0x5c3   :  { %v1628_v32 = vsub.f32 %v4031_v30, %v1627_v16 }
 0x5c4   :  { %v1370_v36 = vsel %vm1368_vm4, %v1355_v59, %v1369_v62  ;;  %v1527_v33 = vsel %vm1525_vm6, %v1355_v59, %v1369_v62 }
 0x5c5   :  { %v1374_v2 = vsel %vm1367_vm7, %v1370_v36, %v1373_v61  ;;  %v1531_v42 = vsel %vm1524_vm5, %v1527_v33, %v1530_v17  ;;  %v1629_v30 = vmul.f32 1.442695, %v1628_v32  ;;  %v4294_v36 = vsel %vm1808_vm10, %v1809_v26, %v4274_v48 }
 0x5c6   :  { %v1375_v19 = vsel %vm1364_vm8, nan, %v1374_v2  ;;  %v1532_v5 = vsel %vm1364_vm8, nan, %v1531_v42 }
 0x5c7   :  { %v1377_v16 = vmul.f32 %v1376_v39, %v1375_v19  ;;  %v1534_v13 = vmul.f32 %v1533_v28, %v1532_v5  ;;  %v4277_v31 = vpop.xlane.xlu2 %2057 }
 0x5c9   :  { %v1535_v12 = vadd.f32 %v1534_v13, %v1377_v16 }
 0x5ca   :  { %v2537_v20 = vpop.xlane.xlu0 %2536 }
 0x5cb   :  { %v2538_v56 = vsub.f32 %v4020_v46, %v2537_v20  ;;  %v2191_v46 = vstv %s4253_s18  ;;  %v4283_v6 = vmul.f32 %v1540_v60, %v1535_v12 }
 0x5cc   :  { %v4265_v45 = vmul.f32 %v3732_v51, %v2191_v46 }
 0x5cd   :  { %v2539_v38 = vmul.f32 1.442695, %v2538_v56 }
 0x5ce   :  { %v2196_v54 = vand.u32 2139095040, %v4265_v45  ;;  %v4664_v32 = vand.u32 2147483647, %v4265_v45 }
 0x5cf   :  { %3422 = vpow2.f32 %v2539_v38 }
 0x5d0   :  { %v2197_v10 = vshrl.u32 %v2196_v54, 23  ;;  %v2200_v46 = vand.u32 8388607, %v4664_v32 }
 0x5d2   :  { %v1572_v35 = vpop.xlane.xlu0 %1571  ;;  %v2115_v40 = vpop.xlane.xlu1 %2114  ;;  %v3304_v9 = vadd.s32 4294967169, %v2197_v10 }
 0x5d3   :  { %3424 = vrcp.f32 %v1572_v35  ;;  %v2116_v14 = vsub.f32 %v4047_v37, %v2115_v40  ;;  %v2201_v40 = vor.u32 8388608, %v2200_v46  ;;  %v2667_v46 = vstv %s4305_s1 }
 0x5d4   :  { %3426 = vpow2.f32 %v1629_v30  ;;  %v2203_v58 = vadd.s32 1, %v3304_v9 }
 0x5d5   :  { %v4269_v52 = vpop.eup %3422  ;;  %v2117_v50 = vmul.f32 1.442695, %v2116_v14 }
 0x5d6   :  { %v2541_v34 = vsel %vm596_vm2, %v4269_v52, 0.0  ;;  %vm2204_vm9 = vcmp.gt.s32.totalorder %v2203_v58, 0 }
 0x5d7   :  { %2542 = vadd.xlane.f32.xlu1 %v2541_v34  ;;  %v2205_v56 = vsel %vm2204_vm9, %v2203_v58, 0  ;;  %3428 = vpow2.f32 %v2117_v50  ;;  %v4670_v34 = vmov 1326507024  }
 0x5d8   :  { %v2207_v61 = vand.u32 31, %v2205_v56  ;;  %v4300_v2 = vshrl.u32 %v2205_v56, 5 }
 0x5d9   :  { %v3425_v59 = vpop.eup %3424 }
 0x5da   :  { %v1574_v20 = vmul.f32 %v3425_v59, %v4044_v29  ;;  %v3015_v22 = vpop.xlane.xlu1 %3014  ;;  %v4280_v37 = vpop.eup %3426  ;;  %v4291_v38 = vsub.s32 32, %v2207_v61  ;;  %v2219_v33 = vshll.u32 %v3609_v3, %v2207_v61  ;;  %v2210_v39 = vshll.u32 %v3610_v8, %v2207_v61 }
 0x5db   :  { %v3016_v57 = vsub.f32 %v4024_v47, %v3015_v22  ;;  %v1631_v29 = vsel %vm596_vm2, %v4280_v37, 0.0  ;;  %v2213_v19 = vshll.u32 %v3611_v11, %v2207_v61  ;;  %v2216_v28 = vshll.u32 %v3612_v15, %v2207_v61 }
 0x5dc   :  { %v1575_v62 = vmul.f32 %v1574_v20, %v3831_v41  ;;  %v2211_v42 = vshrl.u32 %v3611_v11, %v4291_v38  ;;  %v2214_v5 = vshrl.u32 %v3612_v15, %v4291_v38  ;;  %v2217_v30 = vshrl.u32 %v3609_v3, %v4291_v38 }
 0x5dd   :  { %v3017_v17 = vmul.f32 1.442695, %v3016_v57  ;;  %v2220_v1 = vshrl.u32 %v3613_v23, %v4291_v38  ;;  %v2222_v16 = vshll.u32 %v3613_v23, %v2207_v61  ;;  %v4318_v13 = vpop.eup %3428  ;;  %v2223_v9 = vshrl.u32 %v4670_v34, %v4291_v38 }
 0x5de   :  { %v1576_v47 = vadd.f32 %v1575_v62, %v4283_v6  ;;  %v4313_v54 = vor.u32 %v2211_v42, %v2210_v39  ;;  %v4321_v10 = vor.u32 %v2214_v5, %v2213_v19  ;;  %v4323_v14 = vor.u32 %v2217_v30, %v2216_v28 }
 0x5df   :  { %3430 = vpow2.f32 %v3017_v17  ;;  %1632 = vadd.xlane.f32.xlu1 %v1631_v29  ;;  %v2221_v12 = vor.u32 %v2220_v1, %v2219_v33  ;;  %vm2225_vm0 = vcmp.lt.s32.totalorder %v4300_v2, 1  ;;  %vm2226_vm11 = vcmp.lt.s32.totalorder %v4300_v2, 2 }
 0x5e0   :  { %vm2227_vm12 = vcmp.lt.s32.totalorder %v4300_v2, 3  ;;  %v2224_v50 = vor.u32 %v2223_v9, %v2222_v16  ;;  %vm2228_vm13 = vcmp.lt.s32.totalorder %v4300_v2, 4  ;;  %v2119_v26 = vsel %vm596_vm2, %v4318_v13, 0.0 }
 0x5e1   :  { %v2234_v57 = vsel %vm2228_vm13, %v2221_v12, 920167782  ;;  %v2237_v62 = vsel %vm2225_vm0, %v4321_v10, %v4323_v14  ;;  %v4354_v33 = vshll.u32 %v2201_v40, 8  ;;  %v4361_v5 = vmul.f32 %v3732_v51, %v2667_v46 }
 0x5e2   :  { %v2594_v35 = vpop.xlane.xlu2 %2593  ;;  %v2235_v56 = vsel %vm2227_vm12, %v4323_v14, %v2234_v57  ;;  %v2238_v61 = vsel %vm2228_vm13, %v2224_v50, 1326507024  ;;  %v1811_v40 = vclz %v4294_v36 }
 0x5e3   :  { %v2595_v53 = vsub.f32 %v4059_v25, %v2594_v35  ;;  %v2233_v25 = vsel %vm2225_vm0, %v4313_v54, %v4321_v10  ;;  %v2239_v29 = vsel %vm2227_vm12, %v2221_v12, %v2238_v61  ;;  %v2242_v28 = vand.u32 65535, %v4354_v33 }
 0x5e4   :  { %v2236_v17 = vsel %vm2226_vm11, %v2233_v25, %v2235_v56  ;;  %v2240_v39 = vsel %vm2226_vm11, %v2237_v62, %v2239_v29  ;;  %v2243_v30 = vshrl.u32 %v4354_v33, 16  ;;  %v2672_v16 = vand.u32 2139095040, %v4361_v5 }
 0x5e5   :  { %v4330_v60 = vpop.eup %3430  ;;  %v2596_v58 = vmul.f32 1.442695, %v2595_v53  ;;  %v3387_v59 = vpop.permute.xlu0 %3386  ;;  %v2266_v42 = vand.u32 65535, %v2236_v17  ;;  %v2267_v19 = vshrl.u32 %v2236_v17, 16  ;;  %v2244_v35 = vand.u32 65535, %v2240_v39 }
 0x5e6   :  { %v3389_v20 = vunpack.i.h.bf16 %v3387_v59  ;;  %v3388_v22 = vunpack.i.l.bf16 %v3387_v59  ;;  %v2245_v1 = vshrl.u32 %v2240_v39, 16  ;;  %v2673_v36 = vshrl.u32 %v2672_v16, 23 }
 0x5e7   :  { %3432 = vpow2.f32 %v2596_v58  ;;  %2120 = vadd.xlane.f32.xlu1 %v2119_v26  ;;  %v2246_v53 = vmul.u32 %v2244_v35, %v2242_v28  ;;  %v2248_v12 = vmul.u32 %v2244_v35, %v2243_v30  ;;  %v2268_v50 = vmul.u32 %v2266_v42, %v2242_v28 }
 0x5e8   :  { %1598 = vmatpush.msra.mxu2 %v3388_v22  ;;  %v2247_v9 = vmul.u32 %v2245_v1, %v2242_v28  ;;  %v2249_v59 = vmul.u32 %v2245_v1, %v2243_v30  ;;  %v2269_v25 = vmul.u32 %v2267_v19, %v2242_v28  ;;  %v3283_v56 = vadd.s32 4294967294, %v1811_v40 }
 0x5e9   :  { %3267 = vmatmul.msk.f32.vlgmr.msra.gmra.mxu2 %vm596_vm2, %v1576_v47  ;;  %v3019_v47 = vsel %vm596_vm2, %v4330_v60, 0.0  ;;  %v2252_v57 = vshll.u32 %v2248_v12, 16  ;;  %v2271_v62 = vmul.u32 %v2267_v19, %v2243_v30  ;;  %v2209_v19 = vshrl.u32 %v3610_v8, %v4291_v38 }
 0x5ea   :  { %1659 = vmatpush.msrb.mxu2 %v3389_v20  ;;  %v2270_v20 = vmul.u32 %v2266_v42, %v2243_v30  ;;  %v2250_v26 = vshll.u32 %v2247_v9, 16  ;;  %v2272_v61 = vshll.u32 %v2269_v25, 16  ;;  %v2273_v29 = vshrl.u32 %v2269_v25, 16 }
 0x5eb   :  { %v3326_v42 = vadd.s32 4294967169, %v2673_v36  ;;  %v2251_v1 = vshrl.u32 %v2247_v9, 16  ;;  %v2253_v30 = vshrl.u32 %v2248_v12, 16  ;;  %vm3284_vm5 = vcmp.lt.s32.totalorder %v3283_v56, 0 }
 0x5ec   :  { %vm2254_vm14 = vc.u32 %v2246_v53, %v2250_v26  ;;  %v2256_v17 = vadd.s32 %v2250_v26, %v2246_v53  ;;  %v2274_v46 = vshll.u32 %v2270_v20, 16  ;;  %vm2276_vm15 = vc.u32 %v2268_v50, %v2272_v61 }
 0x5ed   :  { %v4369_v58 = vpop.eup %3432  ;;  %v2255_v39 = vsel %vm2254_vm14, 1, %v3615_v18  ;;  %v2278_v28 = vadd.s32 %v2272_v61, %v2268_v50  ;;  %v2277_v16 = vsel %vm2276_vm15, 1, %v3615_v18  ;;  %v2230_v53 = vsel %vm2228_vm13, %v4323_v14, 2102212464 }
 0x5ee   :  { %v2598_v22 = vsel %vm596_vm2, %v4369_v58, 0.0  ;;  %v2257_v32 = vadd.s32 %v2255_v39, %v2249_v59  ;;  %vm2258_vm3 = vc.u32 %v2256_v17, %v2252_v57  ;;  %v2279_v25 = vadd.s32 %v2277_v16, %v2271_v62 }
 0x5ef   :  { %3020 = vadd.xlane.f32.xlu1 %v3019_v47  ;;  %2599 = vadd.xlane.f32.xlu0 %v2598_v22  ;;  %v2259_v47 = vsel %vm2258_vm3, 1, %v3615_v18  ;;  %vm2280_vm4 = vc.u32 %v2278_v28, %v2274_v46  ;;  %v2229_v59 = vsel %vm2225_vm0, %v2209_v19, %v4313_v54  ;;  %v2275_v22 = vshrl.u32 %v2270_v20, 16 }
 0x5f0   :  { %v2261_v50 = vadd.s32 %v2259_v47, %v2257_v32  ;;  %v2281_v38 = vsel %vm2280_vm4, 1, %v3615_v18  ;;  %v4389_v57 = vadd.s32 %v2278_v28, %v2274_v46  ;;  %v4665_v32 = vand.u32 2147483647, %v4361_v5 }
 0x5f1   :  { %v2283_v26 = vadd.s32 %v2281_v38, %v2279_v25  ;;  %v2679_v14 = vadd.s32 1, %v3326_v42  ;;  %v4406_v28 = vsel %vm3284_vm5, 0, %v3283_v56  ;;  %vm1707_vm5 = vcmp.lt.s32.totalorder %v4054_v24, 0 }
 0x5f2   :  { %v3078_v35 = vpop.xlane.xlu2 %3077  ;;  %v2262_v12 = vadd.s32 %v2261_v50, %v2251_v1 }
 0x5f3   :  { %v3079_v40 = vsub.f32 %v4118_v0, %v3078_v35  ;;  %v2231_v0 = vsel %vm2227_vm12, %v4321_v10, %v2230_v53  ;;  %v2284_v54 = vadd.s32 %v2283_v26, %v2273_v29  ;;  %v2676_v10 = vand.u32 8388607, %v4665_v32 }
 0x5f4   :  { %v2232_v36 = vsel %vm2226_vm11, %v2229_v59, %v2231_v0  ;;  %v4394_v62 = vadd.s32 %v2262_v12, %v2253_v30  ;;  %vm2680_vm6 = vcmp.gt.s32.totalorder %v2679_v14, 0 }
 0x5f5   :  { %v3080_v9 = vmul.f32 1.442695, %v3079_v40  ;;  %v2285_v20 = vadd.s32 %v2284_v54, %v2275_v22  ;;  %v2681_v17 = vsel %vm2680_vm6, %v2679_v14, 0  ;;  %v2286_v39 = vmul.u32 %v4354_v33, %v2232_v36 }
 0x5f6   :  { %vm2288_vm7 = vc.u32 %v4394_v62, %v4389_v57  ;;  %v4404_v2 = vshrl.u32 %v2681_v17, 5  ;;  %v2683_v42 = vand.u32 31, %v2681_v17  ;;  %v2677_v1 = vor.u32 8388608, %v2676_v10 }
 0x5f7   :  { %3434 = vpow2.f32 %v3080_v9  ;;  %v2289_v29 = vadd.s32 1, %v2285_v20  ;;  %v1819_v54 = vsub.s32 4294967266, %v4406_v28 }
 0x5f8   :  { %vm2701_vm8 = vcmp.lt.s32.totalorder %v4404_v2, 1  ;;  %vm2703_vm9 = vcmp.lt.s32.totalorder %v4404_v2, 3  ;;  %vm2704_vm10 = vcmp.lt.s32.totalorder %v4404_v2, 4  ;;  %v4415_v40 = vsub.s32 32, %v2683_v42 }
 0x5f9   :  { %v2290_v16 = vsel %vm2288_vm7, %v2289_v29, %v2285_v20  ;;  %v2686_v56 = vshll.u32 %v3610_v8, %v2683_v42  ;;  %v2689_v30 = vshll.u32 %v3611_v11, %v2683_v42  ;;  %v2692_v47 = vshll.u32 %v3612_v15, %v2683_v42 }
 0x5fa   :  { %v4398_v61 = vpop.permute.xlu2 %3391  ;;  %v2291_v19 = vadd.s32 %v2290_v16, %v2286_v39  ;;  %v2695_v53 = vshll.u32 %v3609_v3, %v2683_v42  ;;  %v2687_v50 = vshrl.u32 %v3611_v11, %v4415_v40  ;;  %v2690_v25 = vshrl.u32 %v3612_v15, %v4415_v40 }
 0x5fb   :  { %v3393_v46 = vunpack.i.l.bf16 %v4398_v61  ;;  %v2693_v9 = vshrl.u32 %v3609_v3, %v4415_v40  ;;  %v2696_v59 = vshrl.u32 %v3613_v23, %v4415_v40  ;;  %v2698_v38 = vshll.u32 %v3613_v23, %v2683_v42 }
 0x5fc   :  { %v2292_v0 = vadd.s32 536870912, %v2291_v19  ;;  %v2699_v12 = vshrl.u32 %v4670_v34, %v4415_v40  ;;  %v4432_v22 = vshll.u32 %v2677_v1, 8  ;;  %v4434_v26 = vor.u32 %v2687_v50, %v2686_v56 }
 0x5fd   :  { %v4408_v35 = vpop.eup %3434  ;;  %2084 = vmatpush.msra.mxu2 %v3393_v46  ;;  %v4436_v11 = vor.u32 %v2690_v25, %v2689_v30  ;;  %v2694_v14 = vor.u32 %v2693_v9, %v2692_v47  ;;  %v2697_v15 = vor.u32 %v2696_v59, %v2695_v53  ;;  %vm2702_vm0 = vcmp.lt.s32.totalorder %v4404_v2, 2 }
 0x5fe   :  { %v3082_v33 = vsel %vm596_vm2, %v4408_v35, 0.0  ;;  %v4438_v36 = vshrl.u32 %v2292_v0, 30  ;;  %v2700_v3 = vor.u32 %v2699_v12, %v2698_v38  ;;  %v2718_v42 = vand.u32 65535, %v4432_v22 }
 0x5ff   :  { %3083 = vadd.xlane.f32.xlu1 %v3082_v33  ;;  %v2709_v23 = vsel %vm2701_vm8, %v4434_v26, %v4436_v11  ;;  %v2710_v34 = vsel %vm2704_vm10, %v2697_v15, 920167782  ;;  %v2713_v10 = vsel %vm2701_vm8, %v4436_v11, %v2694_v14  ;;  %v2719_v1 = vshrl.u32 %v4432_v22, 16 }
 0x600   :  { %v2294_v20 = vshll.u32 %v4438_v36, 30  ;;  %v2711_v17 = vsel %vm2703_vm9, %v2694_v14, %v2710_v34  ;;  %v2714_v46 = vsel %vm2704_vm10, %v2700_v3, 1326507024  ;;  %v1799_v33 = vadd.s32 %v4241_v55, %v4239_v43 }
 0x601   :  { %v2712_v39 = vsel %vm2702_vm0, %v2709_v23, %v2711_v17  ;;  %v2715_v29 = vsel %vm2703_vm9, %v2697_v15, %v2714_v46  ;;  %v1815_v16 = vsub.s32 32, %v4406_v28  ;;  %v1820_v47 = vadd.s32 127, %v1819_v54 }
 0x602   :  { %v4465_v56 = vsub.s32 %v2291_v19, %v2294_v20  ;;  %v2716_v30 = vsel %vm2702_vm0, %v2713_v10, %v2715_v29  ;;  %v2743_v25 = vshrl.u32 %v2712_v39, 16  ;;  %v2742_v59 = vand.u32 65535, %v2712_v39 }
 0x603   :  { %v2720_v53 = vand.u32 65535, %v2716_v30  ;;  %v2721_v50 = vshrl.u32 %v2716_v30, 16  ;;  %v1816_v43 = vshll.u32 %v4274_v48, %v4406_v28  ;;  %v1817_v15 = vshrl.u32 %v1799_v33, %v1815_v16 }
 0x604   :  { %vm2296_vm11 = vcmp.lt.s32.totalorder %v4465_v56, 0  ;;  %v2297_v9 = vsub.s32 0, %v4465_v56  ;;  %v2745_v19 = vmul.u32 %v2743_v25, %v2718_v42  ;;  %v1821_v3 = vshll.u32 %v1820_v47, 23 }
 0x605   :  { %v2722_v0 = vmul.u32 %v2720_v53, %v2718_v42  ;;  %v2723_v38 = vmul.u32 %v2721_v50, %v2718_v42  ;;  %v2724_v12 = vmul.u32 %v2720_v53, %v2719_v1  ;;  %v2725_v34 = vmul.u32 %v2721_v50, %v2719_v1 }
 0x606   :  { %v2298_v55 = vsel %vm2296_vm11, %v2297_v9, %v4465_v56  ;;  %v2744_v20 = vmul.u32 %v2742_v59, %v2718_v42  ;;  %v2746_v17 = vmul.u32 %v2742_v59, %v2719_v1  ;;  %v2748_v30 = vshll.u32 %v2745_v19, 16 }
 0x607   :  { %v2299_v54 = vclz %v2298_v55  ;;  %v2726_v23 = vshll.u32 %v2723_v38, 16  ;;  %v2728_v10 = vshll.u32 %v2724_v12, 16  ;;  %v1818_v53 = vor.u32 %v1817_v15, %v1816_v43 }
 0x608   :  { %v1822_v32 = vor.u32 4788187, %v1821_v3  ;;  %v2747_v48 = vmul.u32 %v2743_v25, %v2719_v1  ;;  %v2750_v9 = vshll.u32 %v2746_v17, 16  ;;  %vm2752_vm14 = vc.u32 %v2744_v20, %v2748_v30 }
 0x609   :  { %v3305_v46 = vadd.s32 4294967294, %v2299_v54  ;;  %vm2730_vm12 = vc.u32 %v2722_v0, %v2726_v23  ;;  %v2732_v39 = vadd.s32 %v2726_v23, %v2722_v0  ;;  %v2685_v33 = vshrl.u32 %v3610_v8, %v4415_v40 }
 0x60a   :  { %v2731_v29 = vsel %vm2730_vm12, 1, %v3615_v18  ;;  %v2727_v16 = vshrl.u32 %v2723_v38, 16  ;;  %v2753_v47 = vsel %vm2752_vm14, 1, %v3615_v18  ;;  %v2754_v50 = vadd.s32 %v2748_v30, %v2744_v20 }
 0x60b   :  { %v2733_v28 = vadd.s32 %v2731_v29, %v2725_v34  ;;  %vm2734_vm13 = vc.u32 %v2732_v39, %v2728_v10  ;;  %vm3306_vm15 = vcmp.lt.s32.totalorder %v3305_v46, 0  ;;  %v1823_v59 = vand.u32 2147483647, %v1822_v32 }
 0x60c   :  { %v2735_v42 = vsel %vm2734_vm13, 1, %v3615_v18  ;;  %v1825_v0 = vcvt.s32.f32 %v1818_v53  ;;  %v2706_v43 = vsel %vm2704_vm10, %v2694_v14, 2102212464  ;;  %v2302_v1 = vsel %vm3306_vm15, 0, %v3305_v46 }
 0x60d   :  { %v2737_v25 = vadd.s32 %v2735_v42, %v2733_v28  ;;  %v2755_v55 = vadd.s32 %v2753_v47, %v2747_v48  ;;  %vm2756_vm3 = vc.u32 %v2754_v50, %v2750_v9  ;;  %v2729_v15 = vshrl.u32 %v2724_v12, 16 }
 0x60e   :  { %v2749_v3 = vshrl.u32 %v2745_v19, 16  ;;  %v2757_v54 = vsel %vm2756_vm3, 1, %v3615_v18  ;;  %v2705_v8 = vsel %vm2701_vm8, %v2685_v33, %v4434_v26  ;;  %v2707_v32 = vsel %vm2703_vm9, %v4436_v11, %v2706_v43 }
 0x60f   :  { %v2738_v40 = vadd.s32 %v2737_v25, %v2727_v16  ;;  %v2307_v14 = vsub.s32 4294967266, %v2302_v1  ;;  %v2751_v38 = vshrl.u32 %v2746_v17, 16  ;;  %v2759_v23 = vadd.s32 %v2757_v54, %v2755_v55 }
 0x610   :  { %v1826_v34 = vmul.f32 %v1825_v0, %v1823_v59  ;;  %v2758_v12 = vadd.s32 %v2754_v50, %v2750_v9  ;;  %v2708_v18 = vsel %vm2702_vm0, %v2705_v8, %v2707_v32  ;;  %v2287_v26 = vadd.s32 %v4389_v57, %v4394_v62 }
 0x611   :  { %v2739_v19 = vadd.s32 %v2738_v40, %v2729_v15  ;;  %v2760_v10 = vadd.s32 %v2759_v23, %v2749_v3  ;;  %v2303_v20 = vsub.s32 32, %v2302_v1  ;;  %v2308_v46 = vadd.s32 127, %v2307_v14 }
 0x612   :  { %v1827_v39 = vxor.u32 2147483648, %v1826_v34  ;;  %v2762_v29 = vmul.u32 %v4432_v22, %v2708_v18  ;;  %v2304_v30 = vshll.u32 %v4465_v56, %v2302_v1  ;;  %v4671_v28 = vand.u32 2147483647, %v4054_v24 }
 0x613   :  { %v2761_v11 = vadd.s32 %v2760_v10, %v2751_v38  ;;  %vm2764_vm4 = vc.u32 %v2739_v19, %v2758_v12  ;;  %v2305_v53 = vshrl.u32 %v2287_v26, %v2303_v20  ;;  %v2309_v2 = vshll.u32 %v2308_v46, 23 }
 0x614   :  { %vm4499_vm6 = vcmp.le.f32.partialorder %v4671_v28, 0.7853982  ;;  %v1828_v57 = vsel %vm1707_vm5, %v1827_v39, %v1826_v34  ;;  %vm2195_vm8 = vcmp.lt.s32.totalorder %v4265_v45, 0  ;;  %v2763_v23 = vadd.s32 %v2758_v12, %v2739_v19 }
 0x615   :  { %v2765_v17 = vadd.s32 1, %v2761_v11  ;;  %v1831_v33 = vsel %vm4499_vm6, %v4054_v24, %v1828_v57  ;;  %v2306_v16 = vor.u32 %v2305_v53, %v2304_v30  ;;  %v2310_v56 = vor.u32 4788187, %v2309_v2 }
 0x616   :  { %v1833_v47 = vmul.f32 %v1831_v33, %v1831_v33  ;;  %v4674_v34 = vand.u32 2147483647, %v4265_v45  ;;  %vm2671_vm0 = vcmp.lt.s32.totalorder %v4361_v5, 0 }
 0x617   :  { %v2766_v48 = vsel %vm2764_vm4, %v2765_v17, %v2761_v11  ;;  %v2311_v59 = vand.u32 2147483647, %v2310_v56  ;;  %v2313_v0 = vcvt.s32.f32 %v2306_v16  ;;  %v1829_v11 = vsub.s32 4, %v4258_v4 }
 0x618   :  { %3090 = vrot.lane.b32.xlu1 %v3855_v7, %s3608_s5  ;;  %v2767_v62 = vadd.s32 %v2766_v48, %v2762_v29  ;;  %v1841_v1 = vmul.f32 -0.00019511016, %v1833_v47  ;;  %v1834_v54 = vmul.f32 -0.001358992, %v1833_v47  ;;  %vm4514_vm10 = vcmp.le.f32.partialorder %v4674_v34, 0.7853982 }
 0x619   :  { %v2314_v55 = vmul.f32 %v2313_v0, %v2311_v59  ;;  %v1830_v2 = vsel %vm1707_vm5, %v1829_v11, %v4258_v4  ;;  %vm1848_vm5 = vweird.f32 %v4054_v24  ;;  %s2826_s5 = ssub.f32 1.0, %s4617_s4 }
 0x61a   :  { %v2768_v22 = vadd.s32 536870912, %v2767_v62  ;;  %v1842_v8 = vadd.f32 0.008332121, %v1841_v1  ;;  %v1835_v14 = vadd.f32 0.041655596, %v1834_v54  ;;  %v1832_v56 = vsel %vm4499_vm6, 0, %v1830_v2 }
 0x61b   :  { %v2315_v32 = vxor.u32 2147483648, %v2314_v55  ;;  %v1849_v1 = vadd.s32 3, %v1832_v56  ;;  %v2007_v9 = vand.u32 3, %v1832_v56 }
 0x61c   :  { %v4508_v42 = vshrl.u32 %v2768_v22, 30  ;;  %v1843_v38 = vmul.f32 %v1842_v8, %v1833_v47  ;;  %v1836_v29 = vmul.f32 %v1835_v14, %v1833_v47 }
 0x61d   :  { %v2316_v10 = vsel %vm2195_vm8, %v2315_v32, %v2314_v55  ;;  %v1850_v8 = vand.u32 3, %v1849_v1  ;;  %v2020_v32 = vstv %s3279_s20  ;;  %vm2009_vm14 = vcmp.eq.s32.totalorder %v2007_v9, 0 }
 0x61e   :  { %v2770_v50 = vshll.u32 %v4508_v42, 30  ;;  %v1844_v17 = vadd.f32 -0.16666654, %v1843_v38  ;;  %v4524_v12 = vsel %vm4514_vm10, %v4265_v45, %v2316_v10  ;;  %v1837_v57 = vadd.f32 -0.4999988, %v1836_v29 }
 0x61f   :  { %v4531_v48 = vmul.f32 %v4524_v12, %v4524_v12  ;;  %vm1852_vm12 = vcmp.eq.s32.totalorder %v1850_v8, 0  ;;  %vm1855_vm13 = vcmp.eq.s32.totalorder %v1850_v8, 2  ;;  %v2021_v10 = vmul.f32 %v3732_v51, %v2020_v32 }
 0x620   :  { %v2771_v43 = vsub.s32 %v2767_v62, %v2770_v50  ;;  %v1845_v62 = vmul.f32 %v1844_v17, %v1833_v47  ;;  %v1838_v0 = vmul.f32 %v1837_v57, %v1833_v47  ;;  %vm2012_vm15 = vcmp.eq.s32.totalorder %v2007_v9, 2 }
 0x621   :  { %v2329_v50 = vmul.f32 -0.00019511016, %v4531_v48  ;;  %vm1851_vm3 = vcmp.lt.s32.totalorder %v1850_v8, 2  ;;  %vm2008_vm4 = vcmp.lt.s32.totalorder %v2007_v9, 2 }
 0x622   :  { %vm2772_vm7 = vcmp.lt.s32.totalorder %v2771_v43, 0  ;;  %v2773_v25 = vsub.s32 0, %v2771_v43 }
 0x623   :  { %v2330_v55 = vadd.f32 0.008332121, %v2329_v50 }
 0x624   :  { %v2774_v15 = vsel %vm2772_vm7, %v2773_v25, %v2771_v43  ;;  %v2322_v25 = vmul.f32 -0.001358992, %v4531_v48 }
 0x625   :  { %v2775_v3 = vclz %v2774_v15  ;;  %v1839_v15 = vadd.f32 1.0, %v1838_v0  ;;  %v2331_v14 = vmul.f32 %v2330_v55, %v4531_v48 }
 0x627   :  { %v3327_v40 = vadd.s32 4294967294, %v2775_v3  ;;  %v1856_v38 = vxor.u32 2147483648, %v1839_v15 }
 0x629   :  { %vm3328_vm9 = vcmp.lt.s32.totalorder %v3327_v40, 0 }
 0x62a   :  { %v2778_v26 = vsel %vm3328_vm9, 0, %v3327_v40  ;;  %v2323_v40 = vadd.f32 0.041655596, %v2322_v25 }
 0x62b   :  { %v2779_v20 = vsub.s32 32, %v2778_v26  ;;  %v2780_v46 = vshll.u32 %v2771_v43, %v2778_v26  ;;  %v2783_v39 = vsub.s32 4294967266, %v2778_v26  ;;  %v1846_v43 = vadd.f32 1.0, %v1845_v62 }
 0x62c   :  { %v2317_v26 = vsub.s32 4, %v4438_v36 }
 0x62d   :  { %v2781_v19 = vshrl.u32 %v2763_v23, %v2779_v20  ;;  %v2784_v30 = vadd.s32 127, %v2783_v39  ;;  %v1847_v3 = vmul.f32 %v1846_v43, %v1831_v33  ;;  %v4677_v23 = vand.u32 2147483647, %v4361_v5 }
 0x62e   :  { %v2324_v20 = vmul.f32 %v2323_v40, %v4531_v48  ;;  %v2318_v2 = vsel %vm2195_vm8, %v2317_v26, %v4438_v36  ;;  %v2017_v36 = vstv %s1862_s22 }
 0x62f   :  { %v2782_v53 = vor.u32 %v2781_v19, %v2780_v46  ;;  %v2785_v28 = vshll.u32 %v2784_v30, 23  ;;  %v1853_v47 = vxor.u32 2147483648, %v1847_v3  ;;  %vm4543_vm11 = vcmp.le.f32.partialorder %v4677_v23, 0.7853982 }
 0x630   :  { %v2332_v46 = vadd.f32 -0.16666654, %v2331_v14  ;;  %v1857_v17 = vsel %vm1855_vm13, %v1856_v38, %v1847_v3  ;;  %v2014_v30 = vsel %vm2012_vm15, %v1856_v38, %v1847_v3  ;;  %v2325_v62 = vadd.f32 -0.4999988, %v2324_v20 }
 0x631   :  { %v2786_v22 = vor.u32 4788187, %v2785_v28  ;;  %v2789_v16 = vcvt.s32.f32 %v2782_v53  ;;  %v1854_v29 = vsel %vm1852_vm12, %v1839_v15, %v1853_v47  ;;  %v2011_v19 = vsel %vm2009_vm14, %v1839_v15, %v1853_v47 }
 0x632   :  { %v2022_v53 = vmul.f32 1.442695, %v2021_v10  ;;  %v1858_v57 = vsel %vm1851_vm3, %v1854_v29, %v1857_v17  ;;  %v2320_v56 = vsel %vm4514_vm10, 0, %v2318_v2  ;;  %v2326_v24 = vmul.f32 %v2325_v62, %v4531_v48 }
 0x633   :  { %v2787_v59 = vand.u32 2147483647, %v2786_v22  ;;  %v2333_v22 = vmul.f32 %v2332_v46, %v4531_v48  ;;  %v1859_v50 = vsel %vm1848_vm5, nan, %v1858_v57  ;;  %v2337_v25 = vadd.s32 3, %v2320_v56 }
 0x634   :  { %3436 = vpow2.f32 %v2022_v53  ;;  %v2327_v8 = vadd.f32 1.0, %v2326_v24  ;;  %v2508_v48 = vstv %s4569_s23  ;;  %vm2336_vm13 = vweird.f32 %v4265_v45 }
 0x635   :  { %v2790_v4 = vmul.f32 %v2789_v16, %v2787_v59  ;;  %v2015_v16 = vsel %vm2008_vm4, %v2011_v19, %v2014_v30  ;;  %v1860_v59 = vstv %s4538_s21  ;;  %3438 = vrcp.f32 %v4277_v31 }
 0x636   :  { %v2016_v43 = vsel %vm1848_vm5, nan, %v2015_v16  ;;  %v2334_v1 = vadd.f32 1.0, %v2333_v22  ;;  %v1861_v55 = vmul.f32 %v1860_v59, %v1859_v50  ;;  %v2338_v32 = vand.u32 3, %v2337_v25 }
 0x637   :  { %v2791_v54 = vxor.u32 2147483648, %v2790_v4  ;;  %v2018_v15 = vmul.f32 %v2017_v36, %v2016_v43  ;;  %v2495_v31 = vand.u32 3, %v2320_v56  ;;  %v2344_v26 = vxor.u32 2147483648, %v2327_v8 }
 0x638   :  { %v2335_v9 = vmul.f32 %v2334_v1, %v4524_v12  ;;  %v2793_v12 = vsub.s32 4, %v4508_v42  ;;  %vm2340_vm6 = vcmp.eq.s32.totalorder %v2338_v32, 0  ;;  %vm2343_vm7 = vcmp.eq.s32.totalorder %v2338_v32, 2 }
 0x639   :  { %v2792_v33 = vsel %vm2671_vm0, %v2791_v54, %v2790_v4  ;;  %v2019_v47 = vadd.f32 %v2018_v15, %v1861_v55  ;;  %v2509_v17 = vmul.f32 %v3732_v51, %v2508_v48  ;;  %v3394_v19 = vunpack.i.h.bf16 %v4398_v61 }
 0x63a   :  { %v4557_v39 = vsel %vm4543_vm11, %v4361_v5, %v2792_v33  ;;  %v3437_v54 = vpop.eup %3436  ;;  %v2341_v10 = vxor.u32 2147483648, %v2335_v9  ;;  %vm2497_vm8 = vcmp.eq.s32.totalorder %v2495_v31, 0  ;;  %vm2500_vm9 = vcmp.eq.s32.totalorder %v2495_v31, 2 }
 0x63b   :  { %v4565_v28 = vmul.f32 %v4557_v39, %v4557_v39  ;;  %v3439_v40 = vpop.eup %3438  ;;  %v2024_v38 = vmul.f32 %v3437_v54, %v3825_v44  ;;  %vm2339_vm10 = vcmp.lt.s32.totalorder %v2338_v32, 2  ;;  %v2345_v57 = vsel %vm2343_vm7, %v2344_v26, %v2335_v9 }
 0x63c   :  { %v2060_v29 = vmul.f32 %v3439_v40, %v4035_v63  ;;  %v2342_v2 = vsel %vm2340_vm6, %v2327_v8, %v2341_v10  ;;  %v2794_v62 = vsel %vm2671_vm0, %v2793_v12, %v4508_v42  ;;  %vm2496_vm12 = vcmp.lt.s32.totalorder %v2495_v31, 2 }
 0x63d   :  { %v2805_v0 = vmul.f32 -0.00019511016, %v4565_v28  ;;  %v2798_v18 = vmul.f32 -0.001358992, %v4565_v28  ;;  %v2499_v61 = vsel %vm2497_vm8, %v2327_v8, %v2341_v10  ;;  %v2502_v22 = vsel %vm2500_vm9, %v2344_v26, %v2335_v9  ;;  %v3356_v26 = vld [vmem:[#allocation11 + $0x28] sm:$0xff] }
 0x63e   :  { %v2510_v16 = vmul.f32 1.442695, %v2509_v17  ;;  %v2346_v56 = vsel %vm2339_vm10, %v2342_v2, %v2345_v57  ;;  %v2025_v59 = vmul.f32 %v2024_v38, %v2019_v47  ;;  %v2061_v36 = vmul.f32 %v2060_v29, %v3831_v41  ;;  %1690 = vmatpush.bf16.msra.mxu3 %v3356_v26 }
 0x63f   :  { %v2806_v3 = vadd.f32 0.008332121, %v2805_v0  ;;  %v2799_v23 = vadd.f32 0.041655596, %v2798_v18  ;;  %v2503_v0 = vsel %vm2496_vm12, %v2499_v61, %v2502_v22  ;;  %v2347_v24 = vsel %vm2336_vm13, nan, %v2346_v56  ;;  %v3028_v61 = vpop.permute.xlu2 %3027 }
 0x640   :  { %v2348_v1 = vstv %s4579_s2  ;;  %v2504_v34 = vsel %vm2336_vm13, nan, %v2503_v0  ;;  %v2062_v18 = vadd.f32 %v2061_v36, %v2025_v59  ;;  %v2984_v48 = vstv %s4598_s25 }
 0x641   :  { %v2807_v33 = vmul.f32 %v2806_v3, %v4565_v28  ;;  %v2349_v54 = vmul.f32 %v2348_v1, %v2347_v24  ;;  %v2985_v38 = vmul.f32 %v3732_v51, %v2984_v48  ;;  %vm2812_vm5 = vweird.f32 %v4361_v5 }
 0x643   :  { %v2808_v53 = vadd.f32 -0.16666654, %v2807_v33  ;;  %v2986_v10 = vmul.f32 1.442695, %v2985_v38 }
 0x645   :  { %v2809_v42 = vmul.f32 %v2808_v53, %v4565_v28 }
 0x647   :  { %v2810_v15 = vadd.f32 1.0, %v2809_v42 }
 0x649   :  { %v2811_v31 = vmul.f32 %v2810_v15, %v4557_v39  ;;  %v3357_v15 = vld [vmem:[#allocation11 + $0x30] sm:$0xff] }
 0x64a   :  { %v4552_v11 = vpop.xlane.xlu1 %2542 }
 0x652   :  { %v1633_v4 = vpop.xlane.xlu1 %1632 }
 0x653   :  { %3440 = vrcp.f32 %v1633_v4  ;;  %v2505_v4 = vstv %s2350_s24 }
 0x654   :  { %v2506_v8 = vmul.f32 %v2505_v4, %v2504_v34 }
 0x659   :  { %v3441_v14 = vpop.eup %3440 }
 0x65a   :  { %v1635_v20 = vmul.f32 %v3441_v14, %v4280_v37  ;;  %v2121_v46 = vpop.xlane.xlu1 %2120  ;;  %v2800_v37 = vmul.f32 %v2799_v23, %v4565_v28  ;;  %v2817_v23 = vxor.u32 2147483648, %v2811_v31 }
 0x65b   :  { %3442 = vrcp.f32 %v2121_v46 }
 0x65c   :  { %v1636_v30 = vmul.f32 %v1635_v20, %v3831_v41  ;;  %v2801_v50 = vadd.f32 -0.4999988, %v2800_v37  ;;  %3444 = vpow2.f32 %v2510_v16 }
 0x65d   :  { %3446 = vrcp.f32 %v4552_v11 }
 0x65e   :  { %v1637_v63 = vadd.f32 %v1636_v30, %v4283_v6  ;;  %v2796_v6 = vsel %vm4543_vm11, 0, %v2794_v62  ;;  %v2802_v55 = vmul.f32 %v2801_v50, %v4565_v28  ;;  %v2981_v62 = vstv %s2826_s5 }
 0x65f   :  { %v2813_v25 = vadd.s32 3, %v2796_v6  ;;  %v2971_v11 = vand.u32 3, %v2796_v6 }
 0x660   :  { %3269 = vmatmul.msk.f32.vlgmr.msrb.gmra.mxu2 %vm596_vm2, %v1637_v63  ;;  %v2803_v40 = vadd.f32 1.0, %v2802_v55 }
 0x661   :  { %2147 = vmatpush.msrb.mxu2 %v3394_v19  ;;  %v3443_v43 = vpop.eup %3442  ;;  %v2814_v9 = vand.u32 3, %v2813_v25  ;;  %vm2973_vm14 = vcmp.eq.s32.totalorder %v2971_v11, 0  ;;  %vm2976_vm15 = vcmp.eq.s32.totalorder %v2971_v11, 2  ;;  %vm2972_vm4 = vcmp.lt.s32.totalorder %v2971_v11, 2 }
 0x662   :  { %v2123_v3 = vmul.f32 %v3443_v43, %v4318_v13  ;;  %v3445_v32 = vpop.eup %3444  ;;  %v2600_v28 = vpop.xlane.xlu0 %2599  ;;  %v2507_v13 = vadd.f32 %v2506_v8, %v2349_v54  ;;  %v2820_v33 = vxor.u32 2147483648, %v2803_v40  ;;  %v2975_v12 = vsel %vm2973_vm14, %v2803_v40, %v2817_v23  ;;  %v3360_v54 = vld [vmem:[#allocation11 + $0x48] sm:$0xff] }
 0x663   :  { %v3447_v14 = vpop.eup %3446  ;;  %v2512_v47 = vmul.f32 %v3445_v32, %v3825_v44  ;;  %vm2816_vm0 = vcmp.eq.s32.totalorder %v2814_v9, 0  ;;  %vm2819_vm11 = vcmp.eq.s32.totalorder %v2814_v9, 2  ;;  %3448 = vrcp.f32 %v2600_v28  ;;  %v3021_v17 = vpop.xlane.xlu1 %3020  ;;  %v3362_v32 = vld [vmem:[#allocation11 + $0x58] sm:$0xff] }
 0x664   :  { %v2124_v45 = vmul.f32 %v2123_v3, %v3831_v41  ;;  %v2545_v39 = vmul.f32 %v3447_v14, %v4269_v52  ;;  %vm2815_vm3 = vcmp.lt.s32.totalorder %v2814_v9, 2  ;;  %v2818_v20 = vsel %vm2816_vm0, %v2803_v40, %v2817_v23 }
 0x665   :  { %v2821_v46 = vsel %vm2819_vm11, %v2820_v33, %v2811_v31  ;;  %v2978_v51 = vsel %vm2976_vm15, %v2820_v33, %v2811_v31  ;;  %v2513_v29 = vmul.f32 %v2512_v47, %v2507_v13  ;;  %3450 = vpow2.f32 %v2986_v10  ;;  %v3361_v31 = vld [vmem:[#allocation11 + $0x50] sm:$0xff]  ;;  %v1211_v47 = vpop.f32.mrf.mxu3 }
 0x666   :  { %v2546_v52 = vmul.f32 %v2545_v39, %v3831_v41  ;;  %v2822_v30 = vsel %vm2815_vm3, %v2818_v20, %v2821_v46  ;;  %v2979_v37 = vsel %vm2972_vm4, %v2975_v12, %v2978_v51  ;;  %3452 = vrcp.f32 %v3021_v17 }
 0x667   :  { %v2823_v57 = vsel %vm2812_vm5, nan, %v2822_v30  ;;  %v2980_v63 = vsel %vm2812_vm5, nan, %v2979_v37  ;;  %v1212_v20 = vadd.f32 %v1211_v47, %v4027_v49 }
 0x668   :  { %3289 = vmatmul.msk.f32.vlgmr.msra.gmra.mxu2 %vm596_vm2, %v2062_v18  ;;  %v2547_v53 = vadd.f32 %v2546_v52, %v2513_v29  ;;  %v2982_v5 = vmul.f32 %v2981_v62, %v2980_v63 }
 0x669   :  { %2566 = vmatpush.msra.mxu2 %v4213_v21  ;;  %v2125_v21 = vadd.f32 %v2124_v45, %v2025_v59  ;;  %v3449_v19 = vpop.eup %3448 }
 0x66a   :  { %v2602_v2 = vmul.f32 %v3449_v19, %v4369_v58 }
 0x66b   :  { %v3451_v22 = vpop.eup %3450 }
 0x66c   :  { %v2603_v56 = vmul.f32 %v2602_v2, %v3831_v41  ;;  %v3453_v50 = vpop.eup %3452  ;;  %v2988_v59 = vmul.f32 %v3451_v22, %v3825_v44  ;;  %v3355_v44 = vld [vmem:[#allocation11 + $0x20] sm:$0xff]  ;;  %v1600_v18 = vpop.f32.mrf.mxu2 }
 0x66d   :  { %v3023_v58 = vmul.f32 %v3453_v50, %v4330_v60  ;;  %1691 = vmatpush.bf16.msra.mxu3 %v3355_v44  ;;  %v3358_v60 = vld [vmem:[#allocation11 + $0x38] sm:$0xff]  ;;  %v1213_v38 = vpop.f32.mrf.mxu3 }
 0x66e   :  { %v2604_v36 = vadd.f32 %v2603_v56, %v2513_v29  ;;  %v3395_v29 = vld [vmem:[%s4659_s6] ss:$0 sm:$0xff]  ;;  %v1214_v17 = vadd.f32 %v1213_v38, %v4029_v27  ;;  %s3618_s6 = smov 128  }
 0x66f   :  { %v3024_v43 = vmul.f32 %v3023_v58, %v3831_v41 }
 0x670   :  { %3291 = vmatmul.msk.f32.vlgmr.msrb.gmra.mxu2 %vm596_vm2, %v2125_v21 }
 0x671   :  { %2623 = vmatpush.msrb.mxu2 %v3855_v7  ;;  %v2824_v7 = vstv %s4617_s4  ;;  %2178 = vmatpush.bf16.msrb.mxu3 %v3358_v60 }
 0x672   :  { %v2825_v16 = vmul.f32 %v2824_v7, %v2823_v57  ;;  %v3084_v6 = vpop.xlane.xlu1 %3083 }
 0x673   :  { %3454 = vrcp.f32 %v3084_v6 }
 0x674   :  { %v2983_v42 = vadd.f32 %v2982_v5, %v2825_v16 }
 0x675   :  { %2179 = vmatpush.bf16.msrb.mxu3 %v3357_v15 }
 0x676   :  { %v2989_v0 = vmul.f32 %v2988_v59, %v2983_v42 }
 0x678   :  { %3311 = vmatmul.msk.f32.vlgmr.msra.gmra.mxu2 %vm596_vm2, %v2547_v53  ;;  %v3025_v1 = vadd.f32 %v3024_v43, %v2989_v0 }
 0x679   :  { %3048 = vmatpush.msra.mxu2 %v3028_v61  ;;  %v3455_v24 = vpop.eup %3454 }
 0x67a   :  { %v3086_v4 = vmul.f32 %v3455_v24, %v4408_v35  ;;  %v3359_v35 = vld [vmem:[#allocation11 + $0x40] sm:$0xff] }
 0x67c   :  { %v3087_v25 = vmul.f32 %v3086_v4, %v3831_v41 }
 0x67e   :  { %v3088_v55 = vadd.f32 %v3087_v25, %v2989_v0 }
 0x680   :  { %3313 = vmatmul.msk.f32.vlgmr.msrb.gmra.mxu2 %vm596_vm2, %v2604_v36 }
 0x688   :  { %3333 = vmatmul.msk.f32.vlgmr.msra.gmra.mxu2 %vm596_vm2, %v3025_v1 }
 0x68a   :  { %v3091_v34 = vpop.permute.xlu1 %3090 }
 0x68b   :  { %3111 = vmatpush.msrb.mxu2 %v3091_v34 }
 0x690   :  { %3335 = vmatmul.msk.f32.vlgmr.msrb.gmra.mxu2 %vm596_vm2, %v3088_v55 }
 0x6e3   :  { %v1661_v3 = vpop.f32.mrf.mxu2 }
 0x6e4   :  { %v1664_v8 = vpack.c.bf16 %v1661_v3, %v1600_v18 }
 0x6e6   :  { %3278 = vmatmul.msk.bf16.vlgmr.msra.gmra.mxu3 %vm576_vm1, %v1664_v8 }
 0x6e7   :  { %2654 = vmatpush.bf16.msra.mxu3 %v3360_v54 }
 0x6eb   :  { %v2086_v41 = vpop.f32.mrf.mxu2  ;;  %2655 = vmatpush.bf16.msra.mxu3 %v3359_v35 }
 0x6f3   :  { %v2149_v9 = vpop.f32.mrf.mxu2 }
 0x6f4   :  { %v2152_v40 = vpack.c.bf16 %v2149_v9, %v2086_v41 }
 0x6f6   :  { %3300 = vmatmul.msk.bf16.vlgmr.msrb.gmra.mxu3 %vm576_vm1, %v2152_v40 }
 0x6f7   :  { %3142 = vmatpush.bf16.msrb.mxu3 %v3362_v32 }
 0x6fb   :  { %v2568_v48 = vpop.f32.mrf.mxu2  ;;  %3143 = vmatpush.bf16.msrb.mxu3 %v3361_v31 }
 0x703   :  { %v2625_v45 = vpop.f32.mrf.mxu2 }
 0x704   :  { %v2628_v11 = vpack.c.bf16 %v2625_v45, %v2568_v48 }
 0x706   :  { %3322 = vmatmul.msk.bf16.vlgmr.msra.gmra.mxu3 %vm576_vm1, %v2628_v11 }
 0x70b   :  { %v3050_v28 = vpop.f32.mrf.mxu2 }
 0x713   :  { %v3113_v14 = vpop.f32.mrf.mxu2 }
 0x714   :  { %v3116_v13 = vpack.c.bf16 %v3113_v14, %v3050_v28 }
 0x716   :  { %3344 = vmatmul.msk.bf16.vlgmr.msrb.gmra.mxu3 %vm576_vm1, %v3116_v13 }
 0x769   :  { %v1693_v23 = vpop.f32.mrf.mxu3 }
 0x76a   :  { %v1698_v46 = vadd.f32 %v1693_v23, %v1212_v20 }
 0x771   :  { %v1695_v33 = vpop.f32.mrf.mxu3 }
 0x772   :  { %v1699_v30 = vadd.f32 %v1695_v33, %v1214_v17 }
 0x779   :  { %v2181_v39 = vpop.f32.mrf.mxu3 }
 0x77a   :  { %v2186_v12 = vadd.f32 %v2181_v39, %v1698_v46 }
 0x781   :  { %v2183_v21 = vpop.f32.mrf.mxu3 }
 0x782   :  { %v2187_v53 = vadd.f32 %v2183_v21, %v1699_v30 }
 0x789   :  { %v2657_v10 = vpop.f32.mrf.mxu3 }
 0x78a   :  { %v2662_v51 = vadd.f32 %v2657_v10, %v2186_v12 }
 0x791   :  { %v2659_v26 = vpop.f32.mrf.mxu3 }
 0x792   :  { %v2663_v2 = vadd.f32 %v2659_v26, %v2187_v53 }
 0x799   :  { %v3145_v52 = vpop.f32.mrf.mxu3 }
 0x79a   :  { %v3150_v19 = vadd.f32 %v3145_v52, %v2662_v51 }
 0x79c   :  { %v3156_v37 = vadd.f32 %v3395_v29, %v3150_v19 }
 0x79e   :  { %3158 = vst [vmem:[#allocation13] sm:$0xff] %v3156_v37 }
 0x7a1   :  { %v3147_v49 = vpop.f32.mrf.mxu3 }
 0x7a2   :  { %v3151_v57 = vadd.f32 %v3147_v49, %v2663_v2 }
 0x7a4   :  { %v3157_v7 = vadd.f32 %v3395_v29, %v3151_v57 }
 0x7a6   :  { %3159 = vst [vmem:[#allocation13 + $0x8] sm:$0xff] %v3157_v7 }
 0x7a7   :  { %3172 = dma.vmem_to_hbm [thread:$0]  %s3165_s29, 256, %s3167_s9, [#allocation5], %s3618_s6, %s3618_s6, %s3619_s10  }
 0x7a8   :  { %3596 = dma.done.wait [#allocation5], 256  }
 0x7a9   :  { %3597 = vsyncadd [#allocation5], 4294967040 }
 0x7aa   :  { %3177 = vsyncpa [#allocation4], 1 }
 0x7ab   :  { %3178 = vsyncpa [#allocation9], 1 }
 0x7ac   :  { %3179 = vsyncpa [#allocation12], 1 }
 0x7ad   :  { %3180 = vsyncpa [#allocation5], 1 }
 0x7ae   :  { %3181 = vsyncpa [#allocation6], 1 }

</bundles_post_ra>
